<compile_context>
chip_gen: v7x
topology: tpu7x:2x2x1
jax: 0.10.0
libtpu: 0.0.40
codegen_flags: <defaults>
</compile_context>

<pallas_src>
import numpy as np
import jax
import jax.numpy as jnp
from jax import lax
from jax.experimental import pallas as pl
from jax.experimental.pallas import tpu as pltpu


LPAD = 8  # sublane-aligned left margin inside the padded-width VMEM scratch


# ---------------------------------------------------------------------------
# Fused Pallas kernel (one image per grid step)
# ---------------------------------------------------------------------------
def _make_fused_up_block_kernel(H, W, k, channels):
    """conv 'same'(+ReLU) x (n-1) -> conv 'same' -> ConvTranspose2d(2, 2), in VMEM."""
    n_convs = len(channels) - 1
    HW = H * W
    plo = (k - 1) // 2            # PyTorch 'same' top/left padding (exact for odd k)

    def kernel(*refs):
        x_ref = refs[0]
        conv_w = [refs[1 + 2 * i] for i in range(n_convs)]     # (k, k, cin, cout)
        conv_b = [refs[2 + 2 * i] for i in range(n_convs)]     # (1, cout)
        wd_ref = refs[1 + 2 * n_convs]                         # (C, 4C)
        bd_ref = refs[2 + 2 * n_convs]                         # (1, 4C)
        o_ref = refs[3 + 2 * n_convs]                          # (H*W, 4C)
        pad_refs = refs[4 + 2 * n_convs:]                      # per-layer padded scratch

        cur = x_ref[...]                                       # (H, W, C_in)
        acc = None
        for i in range(n_convs):
            cin, cout = channels[i], channels[i + 1]
            pad = pad_refs[i]
            # 'same' padding in VMEM: zero the scratch, copy the interior at a
            # sublane-aligned column offset so the store is unmasked.
            pad[...] = jnp.zeros_like(pad)
            pad[pl.ds(plo, H), pl.ds(LPAD, W), :] = cur
            # One whole-image matmul per tap: M = H*W, accumulated in f32.
            acc = jnp.zeros((HW, cout), jnp.float32)
            for dy in range(k):
                for dx in range(k):
                    patch = pad[pl.ds(dy, H), pl.ds(LPAD - plo + dx, W), :]  # (H, W, cin)
                    acc = acc + jnp.dot(patch.reshape(HW, cin), conv_w[i][dy, dx],
                                        preferred_element_type=jnp.float32)
            acc = acc + conv_b[i][...]                         # bias once per layer
            if i < n_convs - 1:
                acc = jnp.maximum(acc, 0.0)                    # fused ReLU
                cur = acc.reshape(H, W, cout)                  # feed next layer's pad

        # ConvTranspose2d(k=2, s=2): single (H*W, C) @ (C, 4C) matmul,
        # one contiguous lane-dense block store.
        y4 = jnp.dot(acc, wd_ref[...], preferred_element_type=jnp.float32) + bd_ref[...]
        o_ref[...] = y4.astype(o_ref.dtype)

    return kernel


# ---------------------------------------------------------------------------
# Wrapper (NCHW in / NCHW out, PyTorch semantics)
# ---------------------------------------------------------------------------
def simple_unet_up_block(params, x_nchw, kernel_size):
    k = kernel_size
    channels = params["channels"]
    n_convs = len(params["convs"])
    B, C0, H, W = x_nchw.shape
    assert C0 == channels[0]
    assert W % 8 == 0, "W should be a multiple of 8 for clean (H,W,C)->(H*W,C) layout"
    C_last = channels[-1]
    plo = (k - 1) // 2
    phi = (k - 1) - plo
    Hp = H + k - 1
    WPAD = LPAD + W + phi

    x = jnp.transpose(x_nchw, (0, 2, 3, 1))                    # NCHW -> NHWC
    flat_args = [x]
    in_specs = [pl.BlockSpec((None, H, W, C0), lambda b: (b, 0, 0, 0))]

    # Conv weights as per-tap (cin, cout) matrices; biases as (1, cout).
    for (w, bias) in params["convs"]:
        cout, cin = w.shape[0], w.shape[1]
        w_taps = jnp.transpose(w, (2, 3, 1, 0))                # (k, k, cin, cout)
        b2 = bias.reshape(1, cout)
        flat_args += [w_taps, b2]
        in_specs += [pl.BlockSpec((k, k, cin, cout), lambda b: (0, 0, 0, 0)),
                     pl.BlockSpec((1, cout), lambda b: (0, 0))]

    # Deconv weight packed to (C, 4C), column order (di, dj, c); bias tiled 4x.
    wT, bT = params["deconv"]                                  # (C, C, 2, 2), (C,)
    wd = jnp.transpose(wT, (0, 2, 3, 1)).reshape(C_last, 4 * C_last)
    bd = jnp.tile(bT, 4).reshape(1, 4 * C_last)
    flat_args += [wd, bd]
    in_specs += [pl.BlockSpec((C_last, 4 * C_last), lambda b: (0, 0)),
                 pl.BlockSpec((1, 4 * C_last), lambda b: (0, 0))]

    kernel = _make_fused_up_block_kernel(H, W, k, channels)

    y4 = pl.pallas_call(
        kernel,
        out_shape=jax.ShapeDtypeStruct((B, H * W, 4 * C_last), jnp.float32),
        grid_spec=pltpu.PrefetchScalarGridSpec(
            num_scalar_prefetch=0,
            grid=(B,),
            in_specs=in_specs,
            out_specs=pl.BlockSpec((None, H * W, 4 * C_last), lambda b: (b, 0, 0)),
            scratch_shapes=[pltpu.VMEM((Hp, WPAD, channels[i]), jnp.float32)
                            for i in range(n_convs)],
        ),
        compiler_params=pltpu.CompilerParams(
            dimension_semantics=("parallel",),
            vmem_limit_bytes=32 * 1024 * 1024,
        ),
    )(*flat_args)

    # Fuse the 2x2/stride-2 interleave with the NHWC->NCHW conversion:
    # out[b, c, 2h+di, 2w+dj] = y4[b, h*W+w, (di*2+dj)*C + c]
    y = y4.reshape(B, H, W, 2, 2, C_last)
    y = jnp.transpose(y, (0, 5, 1, 3, 2, 4)).reshape(B, C_last, 2 * H, 2 * W)
    return y


# ---------------------------------------------------------------------------
# Parameter init (mirrors torch defaults) and pure-JAX reference
# ---------------------------------------------------------------------------
def init_params(key, in_channels, out_channels, kernel_size, block_size=2):
    channels = [int(v) for v in np.linspace(in_channels, out_channels, block_size + 1)]

    def init_conv(k_, cin, cout, ksz):
        kw, kb = jax.random.split(k_)
        bound = 1.0 / np.sqrt(cin * ksz * ksz)
        w = jax.random.uniform(kw, (cout, cin, ksz, ksz), jnp.float32, -bound, bound)
        b = jax.random.uniform(kb, (cout,), jnp.float32, -bound, bound)
        return w, b

    convs = []
    for c1, c2 in zip(channels[:-1], channels[1:]):
        key, sub = jax.random.split(key)
        convs.append(init_conv(sub, c1, c2, kernel_size))

    c_last = channels[-1]
    key, sub = jax.random.split(key)
    kw, kb = jax.random.split(sub)
    bound = 1.0 / np.sqrt(c_last * 2 * 2)
    wT = jax.random.uniform(kw, (c_last, c_last, 2, 2), jnp.float32, -bound, bound)
    bT = jax.random.uniform(kb, (c_last,), jnp.float32, -bound, bound)
    return {"channels": channels, "convs": convs, "deconv": (wT, bT)}


def reference_forward(params, x_nchw, kernel_size):
    x = jnp.transpose(x_nchw, (0, 2, 3, 1))
    n_convs = len(params["convs"])
    for i, (w, b) in enumerate(params["convs"]):
        wt = jnp.transpose(w, (2, 3, 1, 0))                    # HWIO
        x = lax.conv_general_dilated(
            x, wt, window_strides=(1, 1), padding="SAME",
            dimension_numbers=("NHWC", "HWIO", "NHWC")) + b
        if i < n_convs - 1:
            x = jnp.maximum(x, 0.0)
    wT, bT = params["deconv"]
    wt = jnp.transpose(wT, (2, 3, 0, 1))                       # (2, 2, Cin, Cout)
    y = jnp.einsum("bijc,xycd->bixjyd", x, wt)
    B, H, _, W, _, C = y.shape
    y = y.reshape(B, 2 * H, 2 * W, C) + bT
    return jnp.transpose(y, (0, 3, 1, 2))


# ---------------------------------------------------------------------------
if __name__ == "__main__":
    in_channels, out_channels, kernel_size, block_size = 4, 8, 3, 2
    B, H, W = 2, 16, 16

    key = jax.random.PRNGKey(0)
    k_params, k_x = jax.random.split(key)
    params = init_params(k_params, in_channels, out_channels, kernel_size, block_size)
    x = jax.random.normal(k_x, (B, in_channels, H, W), jnp.float32)

    out = simple_unet_up_block(params, x, kernel_size)
    out = jax.block_until_ready(out)

    ref = jax.block_until_ready(reference_forward(params, x, kernel_size))
    assert out.shape == (B, out_channels, 2 * H, 2 * W), out.shape
    np.testing.assert_allclose(np.asarray(out), np.asarray(ref), rtol=1e-3, atol=1e-3)

    print("KERNEL_OK")
</pallas_src>

<mosaic_0001>
module attributes {stable_mosaic.version = 11 : i64} {
  func.func @kernel(%arg0: i32, %arg1: memref<1x16x16x4xf32, #tpu.memory_space<vmem>>, %arg2: memref<3x3x4x6xf32, #tpu.memory_space<vmem>>, %arg3: memref<1x6xf32, #tpu.memory_space<vmem>>, %arg4: memref<3x3x6x8xf32, #tpu.memory_space<vmem>>, %arg5: memref<1x8xf32, #tpu.memory_space<vmem>>, %arg6: memref<8x32xf32, #tpu.memory_space<vmem>>, %arg7: memref<1x32xf32, #tpu.memory_space<vmem>>, %arg8: memref<1x256x32xf32, #tpu.memory_space<vmem>>, %arg9: memref<18x25x4xf32, #tpu.memory_space<vmem>>, %arg10: memref<18x25x6xf32, #tpu.memory_space<vmem>>) attributes {dimension_semantics = [#tpu.dimension_semantics<parallel>], iteration_bounds = array<i64: 2>, scalar_prefetch = 0 : i64, scratch_operands = 2 : i64, tpu.core_type = #tpu.core_type<tc>, window_params = [{transform_indices = @transform_0, window_bounds = array<i64: 1, 16, 16, 4>}, {pipeline_mode = #tpu.pipeline_mode<synchronous>, transform_indices = @transform_1, window_bounds = array<i64: 3, 3, 4, 6>}, {pipeline_mode = #tpu.pipeline_mode<synchronous>, transform_indices = @transform_2, window_bounds = array<i64: 1, 6>}, {pipeline_mode = #tpu.pipeline_mode<synchronous>, transform_indices = @transform_3, window_bounds = array<i64: 3, 3, 6, 8>}, {pipeline_mode = #tpu.pipeline_mode<synchronous>, transform_indices = @transform_4, window_bounds = array<i64: 1, 8>}, {pipeline_mode = #tpu.pipeline_mode<synchronous>, transform_indices = @transform_5, window_bounds = array<i64: 8, 32>}, {pipeline_mode = #tpu.pipeline_mode<synchronous>, transform_indices = @transform_6, window_bounds = array<i64: 1, 32>}, {transform_indices = @transform_7, window_bounds = array<i64: 1, 256, 32>}]} {
    %c0 = arith.constant 0 : index
    %c0_0 = arith.constant 0 : index
    %c0_1 = arith.constant 0 : index
    %c0_2 = arith.constant 0 : index
    %0 = vector.load %arg1[%c0, %c0_0, %c0_1, %c0_2] : memref<1x16x16x4xf32, #tpu.memory_space<vmem>>, vector<1x16x16x4xf32>
    %1 = vector.shape_cast %0 : vector<1x16x16x4xf32> to vector<16x16x4xf32>
    %cst = arith.constant 0.000000e+00 : f32
    %2 = vector.broadcast %cst : f32 to vector<18x25x4xf32>
    %c0_3 = arith.constant 0 : index
    %c0_4 = arith.constant 0 : index
    %c0_5 = arith.constant 0 : index
    %3 = vector.load %arg9[%c0_3, %c0_4, %c0_5] : memref<18x25x4xf32, #tpu.memory_space<vmem>>, vector<18x25x4xf32>
    tpu.vector_store %arg9[%c0_3, %c0_4, %c0_5], %2 {strides = array<i32>} : memref<18x25x4xf32, #tpu.memory_space<vmem>>, vector<18x25x4xf32>,
    %c1 = arith.constant 1 : index
    %c8 = arith.constant 8 : index
    %c0_6 = arith.constant 0 : index
    %4 = vector.load %arg9[%c1, %c8, %c0_6] : memref<18x25x4xf32, #tpu.memory_space<vmem>>, vector<16x16x4xf32>
    tpu.vector_store %arg9[%c1, %c8, %c0_6], %1 {strides = array<i32>} : memref<18x25x4xf32, #tpu.memory_space<vmem>>, vector<16x16x4xf32>,
    %cst_7 = arith.constant 0.000000e+00 : f32
    %5 = vector.broadcast %cst_7 : f32 to vector<256x6xf32>
    %c0_8 = arith.constant 0 : index
    %c7 = arith.constant 7 : index
    %c0_9 = arith.constant 0 : index
    %6 = vector.load %arg9[%c0_8, %c7, %c0_9] : memref<18x25x4xf32, #tpu.memory_space<vmem>>, vector<16x16x4xf32>
    %7 = vector.shape_cast %6 : vector<16x16x4xf32> to vector<256x4xf32>
    %c0_10 = arith.constant 0 : index
    %c0_11 = arith.constant 0 : index
    %c0_12 = arith.constant 0 : index
    %c0_13 = arith.constant 0 : index
    %8 = vector.load %arg2[%c0_10, %c0_11, %c0_12, %c0_13] : memref<3x3x4x6xf32, #tpu.memory_space<vmem>>, vector<1x1x4x6xf32>
    %9 = vector.shape_cast %8 : vector<1x1x4x6xf32> to vector<4x6xf32>
    %cst_14 = arith.constant dense<0.000000e+00> : vector<256x6xf32>
    %10 = tpu.matmul %7, %9, %cst_14 {dimension_numbers = #tpu.dot_dimension_numbers<[1], [0], [0], [1], [0, 0, 1, 1], [], []>} : vector<256x4xf32>, vector<4x6xf32>, vector<256x6xf32> -> vector<256x6xf32>
    %11 = arith.addf %5, %10 : vector<256x6xf32>
    %c0_15 = arith.constant 0 : index
    %c8_16 = arith.constant 8 : index
    %c0_17 = arith.constant 0 : index
    %12 = vector.load %arg9[%c0_15, %c8_16, %c0_17] : memref<18x25x4xf32, #tpu.memory_space<vmem>>, vector<16x16x4xf32>
    %13 = vector.shape_cast %12 : vector<16x16x4xf32> to vector<256x4xf32>
    %c0_18 = arith.constant 0 : index
    %c1_19 = arith.constant 1 : index
    %c0_20 = arith.constant 0 : index
    %c0_21 = arith.constant 0 : index
    %14 = vector.load %arg2[%c0_18, %c1_19, %c0_20, %c0_21] : memref<3x3x4x6xf32, #tpu.memory_space<vmem>>, vector<1x1x4x6xf32>
    %15 = vector.shape_cast %14 : vector<1x1x4x6xf32> to vector<4x6xf32>
    %cst_22 = arith.constant dense<0.000000e+00> : vector<256x6xf32>
    %16 = tpu.matmul %13, %15, %cst_22 {dimension_numbers = #tpu.dot_dimension_numbers<[1], [0], [0], [1], [0, 0, 1, 1], [], []>} : vector<256x4xf32>, vector<4x6xf32>, vector<256x6xf32> -> vector<256x6xf32>
    %17 = arith.addf %11, %16 : vector<256x6xf32>
    %c0_23 = arith.constant 0 : index
    %c9 = arith.constant 9 : index
    %c0_24 = arith.constant 0 : index
    %18 = vector.load %arg9[%c0_23, %c9, %c0_24] : memref<18x25x4xf32, #tpu.memory_space<vmem>>, vector<16x16x4xf32>
    %19 = vector.shape_cast %18 : vector<16x16x4xf32> to vector<256x4xf32>
    %c0_25 = arith.constant 0 : index
    %c2 = arith.constant 2 : index
    %c0_26 = arith.constant 0 : index
    %c0_27 = arith.constant 0 : index
    %20 = vector.load %arg2[%c0_25, %c2, %c0_26, %c0_27] : memref<3x3x4x6xf32, #tpu.memory_space<vmem>>, vector<1x1x4x6xf32>
    %21 = vector.shape_cast %20 : vector<1x1x4x6xf32> to vector<4x6xf32>
    %cst_28 = arith.constant dense<0.000000e+00> : vector<256x6xf32>
    %22 = tpu.matmul %19, %21, %cst_28 {dimension_numbers = #tpu.dot_dimension_numbers<[1], [0], [0], [1], [0, 0, 1, 1], [], []>} : vector<256x4xf32>, vector<4x6xf32>, vector<256x6xf32> -> vector<256x6xf32>
    %23 = arith.addf %17, %22 : vector<256x6xf32>
    %c1_29 = arith.constant 1 : index
    %c7_30 = arith.constant 7 : index
    %c0_31 = arith.constant 0 : index
    %24 = vector.load %arg9[%c1_29, %c7_30, %c0_31] : memref<18x25x4xf32, #tpu.memory_space<vmem>>, vector<16x16x4xf32>
    %25 = vector.shape_cast %24 : vector<16x16x4xf32> to vector<256x4xf32>
    %c1_32 = arith.constant 1 : index
    %c0_33 = arith.constant 0 : index
    %c0_34 = arith.constant 0 : index
    %c0_35 = arith.constant 0 : index
    %26 = vector.load %arg2[%c1_32, %c0_33, %c0_34, %c0_35] : memref<3x3x4x6xf32, #tpu.memory_space<vmem>>, vector<1x1x4x6xf32>
    %27 = vector.shape_cast %26 : vector<1x1x4x6xf32> to vector<4x6xf32>
    %cst_36 = arith.constant dense<0.000000e+00> : vector<256x6xf32>
    %28 = tpu.matmul %25, %27, %cst_36 {dimension_numbers = #tpu.dot_dimension_numbers<[1], [0], [0], [1], [0, 0, 1, 1], [], []>} : vector<256x4xf32>, vector<4x6xf32>, vector<256x6xf32> -> vector<256x6xf32>
    %29 = arith.addf %23, %28 : vector<256x6xf32>
    %c1_37 = arith.constant 1 : index
    %c8_38 = arith.constant 8 : index
    %c0_39 = arith.constant 0 : index
    %30 = vector.load %arg9[%c1_37, %c8_38, %c0_39] : memref<18x25x4xf32, #tpu.memory_space<vmem>>, vector<16x16x4xf32>
    %31 = vector.shape_cast %30 : vector<16x16x4xf32> to vector<256x4xf32>
    %c1_40 = arith.constant 1 : index
    %c1_41 = arith.constant 1 : index
    %c0_42 = arith.constant 0 : index
    %c0_43 = arith.constant 0 : index
    %32 = vector.load %arg2[%c1_40, %c1_41, %c0_42, %c0_43] : memref<3x3x4x6xf32, #tpu.memory_space<vmem>>, vector<1x1x4x6xf32>
    %33 = vector.shape_cast %32 : vector<1x1x4x6xf32> to vector<4x6xf32>
    %cst_44 = arith.constant dense<0.000000e+00> : vector<256x6xf32>
    %34 = tpu.matmul %31, %33, %cst_44 {dimension_numbers = #tpu.dot_dimension_numbers<[1], [0], [0], [1], [0, 0, 1, 1], [], []>} : vector<256x4xf32>, vector<4x6xf32>, vector<256x6xf32> -> vector<256x6xf32>
    %35 = arith.addf %29, %34 : vector<256x6xf32>
    %c1_45 = arith.constant 1 : index
    %c9_46 = arith.constant 9 : index
    %c0_47 = arith.constant 0 : index
    %36 = vector.load %arg9[%c1_45, %c9_46, %c0_47] : memref<18x25x4xf32, #tpu.memory_space<vmem>>, vector<16x16x4xf32>
    %37 = vector.shape_cast %36 : vector<16x16x4xf32> to vector<256x4xf32>
    %c1_48 = arith.constant 1 : index
    %c2_49 = arith.constant 2 : index
    %c0_50 = arith.constant 0 : index
    %c0_51 = arith.constant 0 : index
    %38 = vector.load %arg2[%c1_48, %c2_49, %c0_50, %c0_51] : memref<3x3x4x6xf32, #tpu.memory_space<vmem>>, vector<1x1x4x6xf32>
    %39 = vector.shape_cast %38 : vector<1x1x4x6xf32> to vector<4x6xf32>
    %cst_52 = arith.constant dense<0.000000e+00> : vector<256x6xf32>
    %40 = tpu.matmul %37, %39, %cst_52 {dimension_numbers = #tpu.dot_dimension_numbers<[1], [0], [0], [1], [0, 0, 1, 1], [], []>} : vector<256x4xf32>, vector<4x6xf32>, vector<256x6xf32> -> vector<256x6xf32>
    %41 = arith.addf %35, %40 : vector<256x6xf32>
    %c2_53 = arith.constant 2 : index
    %c7_54 = arith.constant 7 : index
    %c0_55 = arith.constant 0 : index
    %42 = vector.load %arg9[%c2_53, %c7_54, %c0_55] : memref<18x25x4xf32, #tpu.memory_space<vmem>>, vector<16x16x4xf32>
    %43 = vector.shape_cast %42 : vector<16x16x4xf32> to vector<256x4xf32>
    %c2_56 = arith.constant 2 : index
    %c0_57 = arith.constant 0 : index
    %c0_58 = arith.constant 0 : index
    %c0_59 = arith.constant 0 : index
    %44 = vector.load %arg2[%c2_56, %c0_57, %c0_58, %c0_59] : memref<3x3x4x6xf32, #tpu.memory_space<vmem>>, vector<1x1x4x6xf32>
    %45 = vector.shape_cast %44 : vector<1x1x4x6xf32> to vector<4x6xf32>
    %cst_60 = arith.constant dense<0.000000e+00> : vector<256x6xf32>
    %46 = tpu.matmul %43, %45, %cst_60 {dimension_numbers = #tpu.dot_dimension_numbers<[1], [0], [0], [1], [0, 0, 1, 1], [], []>} : vector<256x4xf32>, vector<4x6xf32>, vector<256x6xf32> -> vector<256x6xf32>
    %47 = arith.addf %41, %46 : vector<256x6xf32>
    %c2_61 = arith.constant 2 : index
    %c8_62 = arith.constant 8 : index
    %c0_63 = arith.constant 0 : index
    %48 = vector.load %arg9[%c2_61, %c8_62, %c0_63] : memref<18x25x4xf32, #tpu.memory_space<vmem>>, vector<16x16x4xf32>
    %49 = vector.shape_cast %48 : vector<16x16x4xf32> to vector<256x4xf32>
    %c2_64 = arith.constant 2 : index
    %c1_65 = arith.constant 1 : index
    %c0_66 = arith.constant 0 : index
    %c0_67 = arith.constant 0 : index
    %50 = vector.load %arg2[%c2_64, %c1_65, %c0_66, %c0_67] : memref<3x3x4x6xf32, #tpu.memory_space<vmem>>, vector<1x1x4x6xf32>
    %51 = vector.shape_cast %50 : vector<1x1x4x6xf32> to vector<4x6xf32>
    %cst_68 = arith.constant dense<0.000000e+00> : vector<256x6xf32>
    %52 = tpu.matmul %49, %51, %cst_68 {dimension_numbers = #tpu.dot_dimension_numbers<[1], [0], [0], [1], [0, 0, 1, 1], [], []>} : vector<256x4xf32>, vector<4x6xf32>, vector<256x6xf32> -> vector<256x6xf32>
    %53 = arith.addf %47, %52 : vector<256x6xf32>
    %c2_69 = arith.constant 2 : index
    %c9_70 = arith.constant 9 : index
    %c0_71 = arith.constant 0 : index
    %54 = vector.load %arg9[%c2_69, %c9_70, %c0_71] : memref<18x25x4xf32, #tpu.memory_space<vmem>>, vector<16x16x4xf32>
    %55 = vector.shape_cast %54 : vector<16x16x4xf32> to vector<256x4xf32>
    %c2_72 = arith.constant 2 : index
    %c2_73 = arith.constant 2 : index
    %c0_74 = arith.constant 0 : index
    %c0_75 = arith.constant 0 : index
    %56 = vector.load %arg2[%c2_72, %c2_73, %c0_74, %c0_75] : memref<3x3x4x6xf32, #tpu.memory_space<vmem>>, vector<1x1x4x6xf32>
    %57 = vector.shape_cast %56 : vector<1x1x4x6xf32> to vector<4x6xf32>
    %cst_76 = arith.constant dense<0.000000e+00> : vector<256x6xf32>
    %58 = tpu.matmul %55, %57, %cst_76 {dimension_numbers = #tpu.dot_dimension_numbers<[1], [0], [0], [1], [0, 0, 1, 1], [], []>} : vector<256x4xf32>, vector<4x6xf32>, vector<256x6xf32> -> vector<256x6xf32>
    %59 = arith.addf %53, %58 : vector<256x6xf32>
    %c0_77 = arith.constant 0 : index
    %c0_78 = arith.constant 0 : index
    %60 = vector.load %arg3[%c0_77, %c0_78] : memref<1x6xf32, #tpu.memory_space<vmem>>, vector<1x6xf32>
    %61 = vector.broadcast %60 : vector<1x6xf32> to vector<256x6xf32>
    %62 = arith.addf %59, %61 : vector<256x6xf32>
    %cst_79 = arith.constant 0.000000e+00 : f32
    %63 = vector.broadcast %cst_79 : f32 to vector<256x6xf32>
    %64 = arith.maximumf %62, %63 : vector<256x6xf32>
    %65 = vector.shape_cast %64 : vector<256x6xf32> to vector<16x16x6xf32>
    %cst_80 = arith.constant 0.000000e+00 : f32
    %66 = vector.broadcast %cst_80 : f32 to vector<18x25x6xf32>
    %c0_81 = arith.constant 0 : index
    %c0_82 = arith.constant 0 : index
    %c0_83 = arith.constant 0 : index
    %67 = vector.load %arg10[%c0_81, %c0_82, %c0_83] : memref<18x25x6xf32, #tpu.memory_space<vmem>>, vector<18x25x6xf32>
    tpu.vector_store %arg10[%c0_81, %c0_82, %c0_83], %66 {strides = array<i32>} : memref<18x25x6xf32, #tpu.memory_space<vmem>>, vector<18x25x6xf32>,
    %c1_84 = arith.constant 1 : index
    %c8_85 = arith.constant 8 : index
    %c0_86 = arith.constant 0 : index
    %68 = vector.load %arg10[%c1_84, %c8_85, %c0_86] : memref<18x25x6xf32, #tpu.memory_space<vmem>>, vector<16x16x6xf32>
    tpu.vector_store %arg10[%c1_84, %c8_85, %c0_86], %65 {strides = array<i32>} : memref<18x25x6xf32, #tpu.memory_space<vmem>>, vector<16x16x6xf32>,
    %cst_87 = arith.constant 0.000000e+00 : f32
    %69 = vector.broadcast %cst_87 : f32 to vector<256x8xf32>
    %c0_88 = arith.constant 0 : index
    %c7_89 = arith.constant 7 : index
    %c0_90 = arith.constant 0 : index
    %70 = vector.load %arg10[%c0_88, %c7_89, %c0_90] : memref<18x25x6xf32, #tpu.memory_space<vmem>>, vector<16x16x6xf32>
    %71 = vector.shape_cast %70 : vector<16x16x6xf32> to vector<256x6xf32>
    %c0_91 = arith.constant 0 : index
    %c0_92 = arith.constant 0 : index
    %c0_93 = arith.constant 0 : index
    %c0_94 = arith.constant 0 : index
    %72 = vector.load %arg4[%c0_91, %c0_92, %c0_93, %c0_94] : memref<3x3x6x8xf32, #tpu.memory_space<vmem>>, vector<1x1x6x8xf32>
    %73 = vector.shape_cast %72 : vector<1x1x6x8xf32> to vector<6x8xf32>
    %cst_95 = arith.constant dense<0.000000e+00> : vector<256x8xf32>
    %74 = tpu.matmul %71, %73, %cst_95 {dimension_numbers = #tpu.dot_dimension_numbers<[1], [0], [0], [1], [0, 0, 1, 1], [], []>} : vector<256x6xf32>, vector<6x8xf32>, vector<256x8xf32> -> vector<256x8xf32>
    %75 = arith.addf %69, %74 : vector<256x8xf32>
    %c0_96 = arith.constant 0 : index
    %c8_97 = arith.constant 8 : index
    %c0_98 = arith.constant 0 : index
    %76 = vector.load %arg10[%c0_96, %c8_97, %c0_98] : memref<18x25x6xf32, #tpu.memory_space<vmem>>, vector<16x16x6xf32>
    %77 = vector.shape_cast %76 : vector<16x16x6xf32> to vector<256x6xf32>
    %c0_99 = arith.constant 0 : index
    %c1_100 = arith.constant 1 : index
    %c0_101 = arith.constant 0 : index
    %c0_102 = arith.constant 0 : index
    %78 = vector.load %arg4[%c0_99, %c1_100, %c0_101, %c0_102] : memref<3x3x6x8xf32, #tpu.memory_space<vmem>>, vector<1x1x6x8xf32>
    %79 = vector.shape_cast %78 : vector<1x1x6x8xf32> to vector<6x8xf32>
    %cst_103 = arith.constant dense<0.000000e+00> : vector<256x8xf32>
    %80 = tpu.matmul %77, %79, %cst_103 {dimension_numbers = #tpu.dot_dimension_numbers<[1], [0], [0], [1], [0, 0, 1, 1], [], []>} : vector<256x6xf32>, vector<6x8xf32>, vector<256x8xf32> -> vector<256x8xf32>
    %81 = arith.addf %75, %80 : vector<256x8xf32>
    %c0_104 = arith.constant 0 : index
    %c9_105 = arith.constant 9 : index
    %c0_106 = arith.constant 0 : index
    %82 = vector.load %arg10[%c0_104, %c9_105, %c0_106] : memref<18x25x6xf32, #tpu.memory_space<vmem>>, vector<16x16x6xf32>
    %83 = vector.shape_cast %82 : vector<16x16x6xf32> to vector<256x6xf32>
    %c0_107 = arith.constant 0 : index
    %c2_108 = arith.constant 2 : index
    %c0_109 = arith.constant 0 : index
    %c0_110 = arith.constant 0 : index
    %84 = vector.load %arg4[%c0_107, %c2_108, %c0_109, %c0_110] : memref<3x3x6x8xf32, #tpu.memory_space<vmem>>, vector<1x1x6x8xf32>
    %85 = vector.shape_cast %84 : vector<1x1x6x8xf32> to vector<6x8xf32>
    %cst_111 = arith.constant dense<0.000000e+00> : vector<256x8xf32>
    %86 = tpu.matmul %83, %85, %cst_111 {dimension_numbers = #tpu.dot_dimension_numbers<[1], [0], [0], [1], [0, 0, 1, 1], [], []>} : vector<256x6xf32>, vector<6x8xf32>, vector<256x8xf32> -> vector<256x8xf32>
    %87 = arith.addf %81, %86 : vector<256x8xf32>
    %c1_112 = arith.constant 1 : index
    %c7_113 = arith.constant 7 : index
    %c0_114 = arith.constant 0 : index
    %88 = vector.load %arg10[%c1_112, %c7_113, %c0_114] : memref<18x25x6xf32, #tpu.memory_space<vmem>>, vector<16x16x6xf32>
    %89 = vector.shape_cast %88 : vector<16x16x6xf32> to vector<256x6xf32>
    %c1_115 = arith.constant 1 : index
    %c0_116 = arith.constant 0 : index
    %c0_117 = arith.constant 0 : index
    %c0_118 = arith.constant 0 : index
    %90 = vector.load %arg4[%c1_115, %c0_116, %c0_117, %c0_118] : memref<3x3x6x8xf32, #tpu.memory_space<vmem>>, vector<1x1x6x8xf32>
    %91 = vector.shape_cast %90 : vector<1x1x6x8xf32> to vector<6x8xf32>
    %cst_119 = arith.constant dense<0.000000e+00> : vector<256x8xf32>
    %92 = tpu.matmul %89, %91, %cst_119 {dimension_numbers = #tpu.dot_dimension_numbers<[1], [0], [0], [1], [0, 0, 1, 1], [], []>} : vector<256x6xf32>, vector<6x8xf32>, vector<256x8xf32> -> vector<256x8xf32>
    %93 = arith.addf %87, %92 : vector<256x8xf32>
    %c1_120 = arith.constant 1 : index
    %c8_121 = arith.constant 8 : index
    %c0_122 = arith.constant 0 : index
    %94 = vector.load %arg10[%c1_120, %c8_121, %c0_122] : memref<18x25x6xf32, #tpu.memory_space<vmem>>, vector<16x16x6xf32>
    %95 = vector.shape_cast %94 : vector<16x16x6xf32> to vector<256x6xf32>
    %c1_123 = arith.constant 1 : index
    %c1_124 = arith.constant 1 : index
    %c0_125 = arith.constant 0 : index
    %c0_126 = arith.constant 0 : index
    %96 = vector.load %arg4[%c1_123, %c1_124, %c0_125, %c0_126] : memref<3x3x6x8xf32, #tpu.memory_space<vmem>>, vector<1x1x6x8xf32>
    %97 = vector.shape_cast %96 : vector<1x1x6x8xf32> to vector<6x8xf32>
    %cst_127 = arith.constant dense<0.000000e+00> : vector<256x8xf32>
    %98 = tpu.matmul %95, %97, %cst_127 {dimension_numbers = #tpu.dot_dimension_numbers<[1], [0], [0], [1], [0, 0, 1, 1], [], []>} : vector<256x6xf32>, vector<6x8xf32>, vector<256x8xf32> -> vector<256x8xf32>
    %99 = arith.addf %93, %98 : vector<256x8xf32>
    %c1_128 = arith.constant 1 : index
    %c9_129 = arith.constant 9 : index
    %c0_130 = arith.constant 0 : index
    %100 = vector.load %arg10[%c1_128, %c9_129, %c0_130] : memref<18x25x6xf32, #tpu.memory_space<vmem>>, vector<16x16x6xf32>
    %101 = vector.shape_cast %100 : vector<16x16x6xf32> to vector<256x6xf32>
    %c1_131 = arith.constant 1 : index
    %c2_132 = arith.constant 2 : index
    %c0_133 = arith.constant 0 : index
    %c0_134 = arith.constant 0 : index
    %102 = vector.load %arg4[%c1_131, %c2_132, %c0_133, %c0_134] : memref<3x3x6x8xf32, #tpu.memory_space<vmem>>, vector<1x1x6x8xf32>
    %103 = vector.shape_cast %102 : vector<1x1x6x8xf32> to vector<6x8xf32>
    %cst_135 = arith.constant dense<0.000000e+00> : vector<256x8xf32>
    %104 = tpu.matmul %101, %103, %cst_135 {dimension_numbers = #tpu.dot_dimension_numbers<[1], [0], [0], [1], [0, 0, 1, 1], [], []>} : vector<256x6xf32>, vector<6x8xf32>, vector<256x8xf32> -> vector<256x8xf32>
    %105 = arith.addf %99, %104 : vector<256x8xf32>
    %c2_136 = arith.constant 2 : index
    %c7_137 = arith.constant 7 : index
    %c0_138 = arith.constant 0 : index
    %106 = vector.load %arg10[%c2_136, %c7_137, %c0_138] : memref<18x25x6xf32, #tpu.memory_space<vmem>>, vector<16x16x6xf32>
    %107 = vector.shape_cast %106 : vector<16x16x6xf32> to vector<256x6xf32>
    %c2_139 = arith.constant 2 : index
    %c0_140 = arith.constant 0 : index
    %c0_141 = arith.constant 0 : index
    %c0_142 = arith.constant 0 : index
    %108 = vector.load %arg4[%c2_139, %c0_140, %c0_141, %c0_142] : memref<3x3x6x8xf32, #tpu.memory_space<vmem>>, vector<1x1x6x8xf32>
    %109 = vector.shape_cast %108 : vector<1x1x6x8xf32> to vector<6x8xf32>
    %cst_143 = arith.constant dense<0.000000e+00> : vector<256x8xf32>
    %110 = tpu.matmul %107, %109, %cst_143 {dimension_numbers = #tpu.dot_dimension_numbers<[1], [0], [0], [1], [0, 0, 1, 1], [], []>} : vector<256x6xf32>, vector<6x8xf32>, vector<256x8xf32> -> vector<256x8xf32>
    %111 = arith.addf %105, %110 : vector<256x8xf32>
    %c2_144 = arith.constant 2 : index
    %c8_145 = arith.constant 8 : index
    %c0_146 = arith.constant 0 : index
    %112 = vector.load %arg10[%c2_144, %c8_145, %c0_146] : memref<18x25x6xf32, #tpu.memory_space<vmem>>, vector<16x16x6xf32>
    %113 = vector.shape_cast %112 : vector<16x16x6xf32> to vector<256x6xf32>
    %c2_147 = arith.constant 2 : index
    %c1_148 = arith.constant 1 : index
    %c0_149 = arith.constant 0 : index
    %c0_150 = arith.constant 0 : index
    %114 = vector.load %arg4[%c2_147, %c1_148, %c0_149, %c0_150] : memref<3x3x6x8xf32, #tpu.memory_space<vmem>>, vector<1x1x6x8xf32>
    %115 = vector.shape_cast %114 : vector<1x1x6x8xf32> to vector<6x8xf32>
    %cst_151 = arith.constant dense<0.000000e+00> : vector<256x8xf32>
    %116 = tpu.matmul %113, %115, %cst_151 {dimension_numbers = #tpu.dot_dimension_numbers<[1], [0], [0], [1], [0, 0, 1, 1], [], []>} : vector<256x6xf32>, vector<6x8xf32>, vector<256x8xf32> -> vector<256x8xf32>
    %117 = arith.addf %111, %116 : vector<256x8xf32>
    %c2_152 = arith.constant 2 : index
    %c9_153 = arith.constant 9 : index
    %c0_154 = arith.constant 0 : index
    %118 = vector.load %arg10[%c2_152, %c9_153, %c0_154] : memref<18x25x6xf32, #tpu.memory_space<vmem>>, vector<16x16x6xf32>
    %119 = vector.shape_cast %118 : vector<16x16x6xf32> to vector<256x6xf32>
    %c2_155 = arith.constant 2 : index
    %c2_156 = arith.constant 2 : index
    %c0_157 = arith.constant 0 : index
    %c0_158 = arith.constant 0 : index
    %120 = vector.load %arg4[%c2_155, %c2_156, %c0_157, %c0_158] : memref<3x3x6x8xf32, #tpu.memory_space<vmem>>, vector<1x1x6x8xf32>
    %121 = vector.shape_cast %120 : vector<1x1x6x8xf32> to vector<6x8xf32>
    %cst_159 = arith.constant dense<0.000000e+00> : vector<256x8xf32>
    %122 = tpu.matmul %119, %121, %cst_159 {dimension_numbers = #tpu.dot_dimension_numbers<[1], [0], [0], [1], [0, 0, 1, 1], [], []>} : vector<256x6xf32>, vector<6x8xf32>, vector<256x8xf32> -> vector<256x8xf32>
    %123 = arith.addf %117, %122 : vector<256x8xf32>
    %c0_160 = arith.constant 0 : index
    %c0_161 = arith.constant 0 : index
    %124 = vector.load %arg5[%c0_160, %c0_161] : memref<1x8xf32, #tpu.memory_space<vmem>>, vector<1x8xf32>
    %125 = vector.broadcast %124 : vector<1x8xf32> to vector<256x8xf32>
    %126 = arith.addf %123, %125 : vector<256x8xf32>
    %c0_162 = arith.constant 0 : index
    %c0_163 = arith.constant 0 : index
    %127 = vector.load %arg6[%c0_162, %c0_163] : memref<8x32xf32, #tpu.memory_space<vmem>>, vector<8x32xf32>
    %cst_164 = arith.constant dense<0.000000e+00> : vector<256x32xf32>
    %128 = tpu.matmul %126, %127, %cst_164 {dimension_numbers = #tpu.dot_dimension_numbers<[1], [0], [0], [1], [0, 0, 1, 1], [], []>} : vector<256x8xf32>, vector<8x32xf32>, vector<256x32xf32> -> vector<256x32xf32>
    %c0_165 = arith.constant 0 : index
    %c0_166 = arith.constant 0 : index
    %129 = vector.load %arg7[%c0_165, %c0_166] : memref<1x32xf32, #tpu.memory_space<vmem>>, vector<1x32xf32>
    %130 = vector.broadcast %129 : vector<1x32xf32> to vector<256x32xf32>
    %131 = arith.addf %128, %130 : vector<256x32xf32>
    %c0_167 = arith.constant 0 : index
    %c0_168 = arith.constant 0 : index
    %c0_169 = arith.constant 0 : index
    %132 = vector.load %arg8[%c0_167, %c0_168, %c0_169] : memref<1x256x32xf32, #tpu.memory_space<vmem>>, vector<1x256x32xf32>
    %133 = vector.shape_cast %132 : vector<1x256x32xf32> to vector<256x32xf32>
    %134 = vector.shape_cast %131 : vector<256x32xf32> to vector<1x256x32xf32>
    tpu.vector_store %arg8[%c0_167, %c0_168, %c0_169], %134 {strides = array<i32>} : memref<1x256x32xf32, #tpu.memory_space<vmem>>, vector<1x256x32xf32>,
    return
  }
  func.func @transform_0(%arg0: i32) -> (i32, i32, i32, i32) {
    %c0_i32 = arith.constant 0 : i32
    %c0_i32_0 = arith.constant 0 : i32
    %c0_i32_1 = arith.constant 0 : i32
    %c0_i32_2 = arith.constant 0 : i32
    return %arg0, %c0_i32, %c0_i32_0, %c0_i32_1 : i32, i32, i32, i32
  }
  func.func @transform_1(%arg0: i32) -> (i32, i32, i32, i32) {
    %c0_i32 = arith.constant 0 : i32
    %c0_i32_0 = arith.constant 0 : i32
    %c0_i32_1 = arith.constant 0 : i32
    %c0_i32_2 = arith.constant 0 : i32
    %c0_i32_3 = arith.constant 0 : i32
    return %c0_i32, %c0_i32_0, %c0_i32_1, %c0_i32_2 : i32, i32, i32, i32
  }
  func.func @transform_2(%arg0: i32) -> (i32, i32) {
    %c0_i32 = arith.constant 0 : i32
    %c0_i32_0 = arith.constant 0 : i32
    %c0_i32_1 = arith.constant 0 : i32
    return %c0_i32, %c0_i32_0 : i32, i32
  }
  func.func @transform_3(%arg0: i32) -> (i32, i32, i32, i32) {
    %c0_i32 = arith.constant 0 : i32
    %c0_i32_0 = arith.constant 0 : i32
    %c0_i32_1 = arith.constant 0 : i32
    %c0_i32_2 = arith.constant 0 : i32
    %c0_i32_3 = arith.constant 0 : i32
    return %c0_i32, %c0_i32_0, %c0_i32_1, %c0_i32_2 : i32, i32, i32, i32
  }
  func.func @transform_4(%arg0: i32) -> (i32, i32) {
    %c0_i32 = arith.constant 0 : i32
    %c0_i32_0 = arith.constant 0 : i32
    %c0_i32_1 = arith.constant 0 : i32
    return %c0_i32, %c0_i32_0 : i32, i32
  }
  func.func @transform_5(%arg0: i32) -> (i32, i32) {
    %c0_i32 = arith.constant 0 : i32
    %c0_i32_0 = arith.constant 0 : i32
    %c0_i32_1 = arith.constant 0 : i32
    return %c0_i32, %c0_i32_0 : i32, i32
  }
  func.func @transform_6(%arg0: i32) -> (i32, i32) {
    %c0_i32 = arith.constant 0 : i32
    %c0_i32_0 = arith.constant 0 : i32
    %c0_i32_1 = arith.constant 0 : i32
    return %c0_i32, %c0_i32_0 : i32, i32
  }
  func.func @transform_7(%arg0: i32) -> (i32, i32, i32) {
    %c0_i32 = arith.constant 0 : i32
    %c0_i32_0 = arith.constant 0 : i32
    %c0_i32_1 = arith.constant 0 : i32
    return %arg0, %c0_i32, %c0_i32_0 : i32, i32, i32
  }
}

</mosaic_0001>

<bundles_post_ra>
// kernel: tpu_custom_call.1
= control target key start
LH: loop header
LB: loop body
LE: loop exit
PB: predicated region body
PF: predicated region fallthrough
CT: control target
= control target key end

     0   :  { %s10754_s24 = smov 0   ;;  %s13052_s0 = inlined_call_operand.vmem [shape: f32[2,16,16,4], index: 0, kind: input, shape index: {}]   ;;  %s13053_s1 = inlined_call_operand.vmem [shape: f32[3,3,4,6], index: 1, kind: input, shape index: {}]   ;;  %s13054_s2 = inlined_call_operand.vmem [shape: f32[1,6], index: 2, kind: input, shape index: {}]   ;;  %s13055_s3 = inlined_call_operand.vmem [shape: f32[3,3,6,8], index: 3, kind: input, shape index: {}]   ;;  %s13056_s4 = inlined_call_operand.vmem [shape: f32[1,8], index: 4, kind: input, shape index: {}]   ;;  %s13057_s5 = inlined_call_operand.vmem [shape: f32[8,32], index: 5, kind: input, shape index: {}]   ;;  %s13058_s6 = inlined_call_operand.vmem [shape: f32[1,32], index: 6, kind: input, shape index: {}]   ;;  %s13059_s7 = inlined_call_operand.vmem [shape: f32[2,256,32], index: 7, kind: output, shape index: {}]  }
   0x1 LB: > { %s7947_s25 = sadd.s32 4294967295, %s10711_s24   ;;  %p7951_p0 = scmp.ge.s32.totalorder %s10711_s24, 1  ;;  %s10711_s24 = sphi %s10754_s24, %s17_s24  }
   0x2   : > { %p237_p1 = scmp.lt.s32.totalorder %s10711_s24, 3 }
   0x4   : > { %p238_p2 = pnand %p7951_p0, %p237_p1 }
   0x6   : > { %241 = sbr.rel (%p238_p2) target bundleno = 1763 (0x6e3), region = 48 }
   0xd   : > { %v10765_v0 = vld [vmem:[%s13053_s1 + $0x4] sm:$0xf]  ;;  %vm581_vm0 = vcmask 1043456   ;;  %vm311_vm1 = vcmask 31744   ;;  %p10769_p3 = scmp.lt.s32.totalorder %s7947_s25, 1  ;;  %v13060_v1 = vmov 0.0  }
   0xe   : > { %9232 = vmatprep.subr.msk.mxu0 %vm581_vm0, %v10765_v0  ;;  %313 = vst.msk [vmem:[#allocation2 + $0x8] sm:$0xff] %vm311_vm1, %v13060_v1  ;;  %312 = vst.msk [vmem:[#allocation2] sm:$0xff] %vm311_vm1, %v13060_v1  ;;  %v450_v2 = vld [vmem:[%s13053_s1] sm:$0xf]  ;;  %10182 = vmatprep.subr.msk.mxu1 %vm581_vm0, %v10765_v0  ;;  %vm315_vm2 = vcmask 24576   ;;  %vm4206_vm3 = vcmask 1045504  }
   0xf   : > { %314 = vst.msk [vmem:[#allocation2 + $0x10] sm:$0xff] %vm311_vm1, %v13060_v1  ;;  %317 = vst.msk [vmem:[#allocation2 + $0x20] sm:$0xff] %vm311_vm1, %v13060_v1  ;;  %9233 = vmatpush3.msk.msra.mxu0 %vm581_vm0, %v10765_v0  ;;  %s13343_s25 = smov (!%p10769_p3, %s7947_s25), 1  ;;  %10183 = vmatpush3.msk.msra.mxu1 %vm581_vm0, %v10765_v0  ;;  %v10955_v9 = vld [vmem:[%s13053_s1 + $0x8] sm:$0xf]  ;;  %vm3936_vm4 = vcmask 48128  }
  0x10   : > { %318 = vst.msk [vmem:[#allocation2 + $0x28] sm:$0xff] %vm311_vm1, %v13060_v1  ;;  %319 = vst.msk [vmem:[#allocation2 + $0x30] sm:$0xff] %vm311_vm1, %v13060_v1  ;;  %9282 = vmatprep.subr.msk.mxu0 %vm581_vm0, %v450_v2  ;;  %s8603_s8 = sshll.u32 %s13343_s25, 8  ;;  %v11075_v53 = vld [vmem:[%s13053_s1 + $0xc] sm:$0xf]  ;;  %vm3940_vm5 = vcmask 40960  }
  0x11   : > { %321 = vst.msk [vmem:[#allocation2 + $0x40] sm:$0xff] %vm311_vm1, %v13060_v1  ;;  %322 = vst.msk [vmem:[#allocation2 + $0x48] sm:$0xff] %vm311_vm1, %v13060_v1  ;;  %s10941_s11 = scalar_lea.vmem %s13052_s0, %s8603_s8  ;;  %vm7537_vm6 = vcmask 64512   ;;  %s12951_s14 = scalar_lea.vmem %s13059_s7, %s8603_s8  ;;  %vm7859_vm7 = vcmask 261120  }
  0x12   : > { %323 = vst.msk [vmem:[#allocation2 + $0x50] sm:$0xff] %vm311_vm1, %v13060_v1  ;;  %325 = vst.msk [vmem:[#allocation2 + $0x60] sm:$0xff] %vm311_vm1, %v13060_v1  ;;  %v279_v3 = vld [vmem:[%s10941_s11] sm:$0xff]  ;;  %v280_v4 = vld [vmem:[%s10941_s11 + $0x8] sm:$0xff] }
  0x13   : > { %326 = vst.msk [vmem:[#allocation2 + $0x68] sm:$0xff] %vm311_vm1, %v13060_v1  ;;  %327 = vst.msk [vmem:[#allocation2 + $0x70] sm:$0xff] %vm311_vm1, %v13060_v1  ;;  %v281_v5 = vld [vmem:[%s10941_s11 + $0x10] sm:$0xff]  ;;  %v282_v6 = vld [vmem:[%s10941_s11 + $0x18] sm:$0xff] }
  0x14   : > { %329 = vst.msk [vmem:[#allocation2 + $0x80] sm:$0xff] %vm311_vm1, %v13060_v1  ;;  %330 = vst.msk [vmem:[#allocation2 + $0x88] sm:$0xff] %vm311_vm1, %v13060_v1  ;;  %v283_v7 = vld [vmem:[%s10941_s11 + $0x20] sm:$0xff]  ;;  %v284_v8 = vld [vmem:[%s10941_s11 + $0x28] sm:$0xff] }
  0x15   : > { %331 = vst.msk [vmem:[#allocation2 + $0x90] sm:$0xff] %vm311_vm1, %v13060_v1  ;;  %333 = vst.msk [vmem:[#allocation2 + $0xa0] sm:$0xff] %vm311_vm1, %v13060_v1  ;;  %v451_v10 = vld [vmem:[#allocation2 + $0x8] sm:$0xff]  ;;  %v285_v12 = vld [vmem:[%s10941_s11 + $0x30] sm:$0xff] }
  0x16   : > { %334 = vst.msk [vmem:[#allocation2 + $0xa8] sm:$0xff] %vm311_vm1, %v13060_v1  ;;  %335 = vst.msk [vmem:[#allocation2 + $0xb0] sm:$0xff] %vm311_vm1, %v13060_v1  ;;  %v452_v11 = vld [vmem:[#allocation2 + $0x10] sm:$0xff]  ;;  %9234 = vmatprep.mubr.msk.f32.mxu0 %vm311_vm1, %v451_v10  ;;  %v286_v13 = vld [vmem:[%s10941_s11 + $0x38] sm:$0xff] }
  0x17   : > { %337 = vst.msk [vmem:[#allocation2 + $0xc0] sm:$0xff] %vm311_vm1, %v13060_v1  ;;  %338 = vst.msk [vmem:[#allocation2 + $0xc8] sm:$0xff] %vm311_vm1, %v13060_v1  ;;  %v287_v14 = vld [vmem:[%s10941_s11 + $0x40] sm:$0xff]  ;;  %v288_v15 = vld [vmem:[%s10941_s11 + $0x48] sm:$0xff]  ;;  %9235 = vmatmul.mubr.msk.f32.vlgmr.msra.gmra.mrb[0].mxu0 %vm311_vm1, %v452_v11 }
  0x18   : > { %339 = vst.msk [vmem:[#allocation2 + $0xd0] sm:$0xff] %vm311_vm1, %v13060_v1  ;;  %341 = vst.msk [vmem:[#allocation2 + $0xe0] sm:$0xff] %vm311_vm1, %v13060_v1  ;;  %v289_v16 = vld [vmem:[%s10941_s11 + $0x50] sm:$0xff]  ;;  %v290_v17 = vld [vmem:[%s10941_s11 + $0x58] sm:$0xff]  ;;  %9283 = vmatpush3.msk.msra.mxu0 %vm581_vm0, %v450_v2 }
  0x19   : > { %342 = vst.msk [vmem:[#allocation2 + $0xe8] sm:$0xff] %vm311_vm1, %v13060_v1  ;;  %343 = vst.msk [vmem:[#allocation2 + $0xf0] sm:$0xff] %vm311_vm1, %v13060_v1  ;;  %v291_v18 = vld [vmem:[%s10941_s11 + $0x60] sm:$0xff]  ;;  %v292_v19 = vld [vmem:[%s10941_s11 + $0x68] sm:$0xff]  ;;  %9332 = vmatprep.subr.msk.mxu0 %vm581_vm0, %v10955_v9 }
  0x1a   : > { %345 = vst.msk [vmem:[#allocation2 + $0x100] sm:$0xff] %vm311_vm1, %v13060_v1  ;;  %346 = vst.msk [vmem:[#allocation2 + $0x108] sm:$0xff] %vm311_vm1, %v13060_v1  ;;  %v293_v20 = vld [vmem:[%s10941_s11 + $0x70] sm:$0xff]  ;;  %v294_v21 = vld [vmem:[%s10941_s11 + $0x78] sm:$0xff] }
  0x1b   : > { %347 = vst.msk [vmem:[#allocation2 + $0x110] sm:$0xff] %vm311_vm1, %v13060_v1  ;;  %349 = vst.msk [vmem:[#allocation2 + $0x120] sm:$0xff] %vm311_vm1, %v13060_v1  ;;  %v295_v22 = vld [vmem:[%s10941_s11 + $0x80] sm:$0xff]  ;;  %v296_v23 = vld [vmem:[%s10941_s11 + $0x88] sm:$0xff] }
  0x1c   : > { %350 = vst.msk [vmem:[#allocation2 + $0x128] sm:$0xff] %vm311_vm1, %v13060_v1  ;;  %351 = vst.msk [vmem:[#allocation2 + $0x130] sm:$0xff] %vm311_vm1, %v13060_v1  ;;  %v297_v24 = vld [vmem:[%s10941_s11 + $0x90] sm:$0xff]  ;;  %v298_v25 = vld [vmem:[%s10941_s11 + $0x98] sm:$0xff] }
  0x1d   : > { %353 = vst.msk [vmem:[#allocation2 + $0x140] sm:$0xff] %vm311_vm1, %v13060_v1  ;;  %354 = vst.msk [vmem:[#allocation2 + $0x148] sm:$0xff] %vm311_vm1, %v13060_v1  ;;  %v299_v35 = vld [vmem:[%s10941_s11 + $0xa0] sm:$0xff]  ;;  %v300_v36 = vld [vmem:[%s10941_s11 + $0xa8] sm:$0xff] }
  0x1e   : > { %355 = vst.msk [vmem:[#allocation2 + $0x150] sm:$0xff] %vm311_vm1, %v13060_v1  ;;  %357 = vst.msk [vmem:[#allocation2 + $0x160] sm:$0xff] %vm311_vm1, %v13060_v1  ;;  %v301_v37 = vld [vmem:[%s10941_s11 + $0xb0] sm:$0xff]  ;;  %v302_v38 = vld [vmem:[%s10941_s11 + $0xb8] sm:$0xff] }
  0x1f   : > { %358 = vst.msk [vmem:[#allocation2 + $0x168] sm:$0xff] %vm311_vm1, %v13060_v1  ;;  %359 = vst.msk [vmem:[#allocation2 + $0x170] sm:$0xff] %vm311_vm1, %v13060_v1  ;;  %v303_v39 = vld [vmem:[%s10941_s11 + $0xc0] sm:$0xff]  ;;  %v304_v40 = vld [vmem:[%s10941_s11 + $0xc8] sm:$0xff] }
  0x20   : > { %361 = vst.msk [vmem:[#allocation2 + $0x180] sm:$0xff] %vm311_vm1, %v13060_v1  ;;  %362 = vst.msk [vmem:[#allocation2 + $0x188] sm:$0xff] %vm311_vm1, %v13060_v1  ;;  %v305_v41 = vld [vmem:[%s10941_s11 + $0xd0] sm:$0xff]  ;;  %v306_v42 = vld [vmem:[%s10941_s11 + $0xd8] sm:$0xff] }
  0x21   : > { %363 = vst.msk [vmem:[#allocation2 + $0x190] sm:$0xff] %vm311_vm1, %v13060_v1  ;;  %365 = vst.msk [vmem:[#allocation2 + $0x1a0] sm:$0xff] %vm311_vm1, %v13060_v1  ;;  %v307_v43 = vld [vmem:[%s10941_s11 + $0xe0] sm:$0xff]  ;;  %v308_v44 = vld [vmem:[%s10941_s11 + $0xe8] sm:$0xff] }
  0x22   : > { %366 = vst.msk [vmem:[#allocation2 + $0x1a8] sm:$0xff] %vm311_vm1, %v13060_v1  ;;  %367 = vst.msk [vmem:[#allocation2 + $0x1b0] sm:$0xff] %vm311_vm1, %v13060_v1  ;;  %v418_v50 = vld [vmem:[#allocation2 + $0x7] sm:$0xff]  ;;  %v419_v51 = vld [vmem:[#allocation2 + $0xf] sm:$0xff] }
  0x23   : > { %369 = vst.msk [vmem:[#allocation2 + $0x1c0] sm:$0xff] %vm311_vm1, %v13060_v1  ;;  %370 = vst.msk [vmem:[#allocation2 + $0x1c8] sm:$0xff] %vm311_vm1, %v13060_v1 }
  0x24   : > { %371 = vst.msk [vmem:[#allocation2 + $0x1d0] sm:$0xff] %vm311_vm1, %v13060_v1  ;;  %373 = vst.msk [vmem:[#allocation2 + $0x1e0] sm:$0xff] %vm311_vm1, %v13060_v1 }
  0x25   : > { %374 = vst.msk [vmem:[#allocation2 + $0x1e8] sm:$0xff] %vm311_vm1, %v13060_v1  ;;  %375 = vst.msk [vmem:[#allocation2 + $0x1f0] sm:$0xff] %vm311_vm1, %v13060_v1 }
  0x26   : > { %377 = vst.msk [vmem:[#allocation2 + $0x200] sm:$0xff] %vm311_vm1, %v13060_v1  ;;  %378 = vst.msk [vmem:[#allocation2 + $0x208] sm:$0xff] %vm311_vm1, %v13060_v1 }
  0x27   : > { %379 = vst.msk [vmem:[#allocation2 + $0x210] sm:$0xff] %vm311_vm1, %v13060_v1  ;;  %381 = vst.msk [vmem:[#allocation2 + $0x220] sm:$0xff] %vm311_vm1, %v13060_v1 }
  0x28   : > { %382 = vst.msk [vmem:[#allocation2 + $0x228] sm:$0xff] %vm311_vm1, %v13060_v1  ;;  %383 = vst.msk [vmem:[#allocation2 + $0x230] sm:$0xff] %vm311_vm1, %v13060_v1 }
  0x29   : > { %316 = vst.msk [vmem:[#allocation2 + $0x18] sm:$0x1] %vm315_vm2, %v13060_v1  ;;  %320 = vst.msk [vmem:[#allocation2 + $0x38] sm:$0x1] %vm315_vm2, %v13060_v1 }
  0x2a   : > { %324 = vst.msk [vmem:[#allocation2 + $0x58] sm:$0x1] %vm315_vm2, %v13060_v1  ;;  %328 = vst.msk [vmem:[#allocation2 + $0x78] sm:$0x1] %vm315_vm2, %v13060_v1 }
  0x2b   : > { %332 = vst.msk [vmem:[#allocation2 + $0x98] sm:$0x1] %vm315_vm2, %v13060_v1  ;;  %336 = vst.msk [vmem:[#allocation2 + $0xb8] sm:$0x1] %vm315_vm2, %v13060_v1 }
  0x2c   : > { %340 = vst.msk [vmem:[#allocation2 + $0xd8] sm:$0x1] %vm315_vm2, %v13060_v1  ;;  %344 = vst.msk [vmem:[#allocation2 + $0xf8] sm:$0x1] %vm315_vm2, %v13060_v1 }
  0x2d   : > { %348 = vst.msk [vmem:[#allocation2 + $0x118] sm:$0x1] %vm315_vm2, %v13060_v1  ;;  %352 = vst.msk [vmem:[#allocation2 + $0x138] sm:$0x1] %vm315_vm2, %v13060_v1 }
  0x2e   : > { %356 = vst.msk [vmem:[#allocation2 + $0x158] sm:$0x1] %vm315_vm2, %v13060_v1  ;;  %360 = vst.msk [vmem:[#allocation2 + $0x178] sm:$0x1] %vm315_vm2, %v13060_v1 }
  0x2f   : > { %364 = vst.msk [vmem:[#allocation2 + $0x198] sm:$0x1] %vm315_vm2, %v13060_v1  ;;  %368 = vst.msk [vmem:[#allocation2 + $0x1b8] sm:$0x1] %vm315_vm2, %v13060_v1 }
  0x30   : > { %372 = vst.msk [vmem:[#allocation2 + $0x1d8] sm:$0x1] %vm315_vm2, %v13060_v1  ;;  %376 = vst.msk [vmem:[#allocation2 + $0x1f8] sm:$0x1] %vm315_vm2, %v13060_v1 }
  0x31   : > { %380 = vst.msk [vmem:[#allocation2 + $0x218] sm:$0x1] %vm315_vm2, %v13060_v1  ;;  %384 = vst.msk [vmem:[#allocation2 + $0x238] sm:$0x1] %vm315_vm2, %v13060_v1 }
  0x32   : > { %386 = vst.msk [vmem:[#allocation2 + $0x28] sm:$0xff] %vm311_vm1, %v279_v3  ;;  %387 = vst.msk [vmem:[#allocation2 + $0x30] sm:$0xff] %vm311_vm1, %v280_v4 }
  0x33   : > { %388 = vst.msk [vmem:[#allocation2 + $0x48] sm:$0xff] %vm311_vm1, %v281_v5  ;;  %389 = vst.msk [vmem:[#allocation2 + $0x50] sm:$0xff] %vm311_vm1, %v282_v6 }
  0x34   : > { %390 = vst.msk [vmem:[#allocation2 + $0x68] sm:$0xff] %vm311_vm1, %v283_v7  ;;  %391 = vst.msk [vmem:[#allocation2 + $0x70] sm:$0xff] %vm311_vm1, %v284_v8 }
  0x35   : > { %392 = vst.msk [vmem:[#allocation2 + $0x88] sm:$0xff] %vm311_vm1, %v285_v12  ;;  %393 = vst.msk [vmem:[#allocation2 + $0x90] sm:$0xff] %vm311_vm1, %v286_v13 }
  0x36   : > { %394 = vst.msk [vmem:[#allocation2 + $0xa8] sm:$0xff] %vm311_vm1, %v287_v14  ;;  %395 = vst.msk [vmem:[#allocation2 + $0xb0] sm:$0xff] %vm311_vm1, %v288_v15 }
  0x37   : > { %396 = vst.msk [vmem:[#allocation2 + $0xc8] sm:$0xff] %vm311_vm1, %v289_v16  ;;  %397 = vst.msk [vmem:[#allocation2 + $0xd0] sm:$0xff] %vm311_vm1, %v290_v17  ;;  %v309_v17 = vld [vmem:[%s10941_s11 + $0xf0] sm:$0xff] }
  0x38   : > { %398 = vst.msk [vmem:[#allocation2 + $0xe8] sm:$0xff] %vm311_vm1, %v291_v18  ;;  %399 = vst.msk [vmem:[#allocation2 + $0xf0] sm:$0xff] %vm311_vm1, %v292_v19  ;;  %v310_v18 = vld [vmem:[%s10941_s11 + $0xf8] sm:$0xff] }
  0x39   : > { %400 = vst.msk [vmem:[#allocation2 + $0x108] sm:$0xff] %vm311_vm1, %v293_v20  ;;  %401 = vst.msk [vmem:[#allocation2 + $0x110] sm:$0xff] %vm311_vm1, %v294_v21  ;;  %v10990_v26 = vld [vmem:[#allocation2 + $0x28] sm:$0xff]  ;;  %v10992_v27 = vld [vmem:[#allocation2 + $0x30] sm:$0xff] }
  0x3a   : > { %402 = vst.msk [vmem:[#allocation2 + $0x128] sm:$0xff] %vm311_vm1, %v295_v22  ;;  %v10994_v28 = vld [vmem:[#allocation2 + $0x48] sm:$0xff]  ;;  %403 = vst.msk [vmem:[#allocation2 + $0x130] sm:$0xff] %vm311_vm1, %v296_v23  ;;  %9237 = vmatprep.mubr.msk.f32.mxu0 %vm311_vm1, %v10990_v26  ;;  %v11005_v29 = vld [vmem:[#allocation2 + $0x50] sm:$0xff] }
  0x3b   : > { %404 = vst.msk [vmem:[#allocation2 + $0x148] sm:$0xff] %vm311_vm1, %v297_v24  ;;  %405 = vst.msk [vmem:[#allocation2 + $0x150] sm:$0xff] %vm311_vm1, %v298_v25  ;;  %9238 = vmatmul.mubr.msk.f32.gmra.mrb[2].mxu0 %vm311_vm1, %v10992_v27  ;;  %v11007_v30 = vld [vmem:[#allocation2 + $0x68] sm:$0xff]  ;;  %v11013_v31 = vld [vmem:[#allocation2 + $0x70] sm:$0xff] }
  0x3c   : > { %9240 = vmatprep.mubr.msk.f32.mxu0 %vm311_vm1, %v10994_v28  ;;  %v11015_v32 = vld [vmem:[#allocation2 + $0x88] sm:$0xff]  ;;  %v11019_v33 = vld [vmem:[#allocation2 + $0x90] sm:$0xff]  ;;  %406 = vst.msk [vmem:[#allocation2 + $0x168] sm:$0xff] %vm311_vm1, %v299_v35  ;;  %407 = vst.msk [vmem:[#allocation2 + $0x170] sm:$0xff] %vm311_vm1, %v300_v36 }
  0x3d   : > { %v11023_v34 = vld [vmem:[#allocation2 + $0xa8] sm:$0xff]  ;;  %408 = vst.msk [vmem:[#allocation2 + $0x188] sm:$0xff] %vm311_vm1, %v301_v37  ;;  %409 = vst.msk [vmem:[#allocation2 + $0x190] sm:$0xff] %vm311_vm1, %v302_v38  ;;  %v11047_v45 = vld [vmem:[#allocation2 + $0xb0] sm:$0xff] }
  0x3e   : > { %410 = vst.msk [vmem:[#allocation2 + $0x1a8] sm:$0xff] %vm311_vm1, %v303_v39  ;;  %411 = vst.msk [vmem:[#allocation2 + $0x1b0] sm:$0xff] %vm311_vm1, %v304_v40  ;;  %v11051_v46 = vld [vmem:[#allocation2 + $0xc8] sm:$0xff]  ;;  %v11057_v47 = vld [vmem:[#allocation2 + $0xd0] sm:$0xff] }
  0x3f   : > { %9241 = vmatmul.mubr.msk.f32.gmra.mrb[4].mxu0 %vm311_vm1, %v11005_v29  ;;  %412 = vst.msk [vmem:[#allocation2 + $0x1c8] sm:$0xff] %vm311_vm1, %v305_v41  ;;  %413 = vst.msk [vmem:[#allocation2 + $0x1d0] sm:$0xff] %vm311_vm1, %v306_v42  ;;  %v11059_v48 = vld [vmem:[#allocation2 + $0xe8] sm:$0xff]  ;;  %v11065_v49 = vld [vmem:[#allocation2 + $0xf0] sm:$0xff] }
  0x40   : > { %9243 = vmatprep.mubr.msk.f32.mxu0 %vm311_vm1, %v11007_v30  ;;  %414 = vst.msk [vmem:[#allocation2 + $0x1e8] sm:$0xff] %vm311_vm1, %v307_v43  ;;  %415 = vst.msk [vmem:[#allocation2 + $0x1f0] sm:$0xff] %vm311_vm1, %v308_v44  ;;  %v11070_v52 = vld [vmem:[#allocation2 + $0x27] sm:$0xff]  ;;  %v11082_v54 = vld [vmem:[#allocation2 + $0x2f] sm:$0xff] }
  0x41   : > { %v11084_v55 = vld [vmem:[#allocation2 + $0x47] sm:$0xff]  ;;  %v11092_v56 = vld [vmem:[#allocation2 + $0x4f] sm:$0xff]  ;;  %416 = vst.msk [vmem:[#allocation2 + $0x208] sm:$0xff] %vm311_vm1, %v309_v17  ;;  %417 = vst.msk [vmem:[#allocation2 + $0x210] sm:$0xff] %vm311_vm1, %v310_v18 }
  0x42   : > { %v11094_v57 = vld [vmem:[#allocation2 + $0x67] sm:$0xff]  ;;  %v11100_v58 = vld [vmem:[#allocation2 + $0x6f] sm:$0xff] }
  0x43   : > { %9244 = vmatmul.mubr.msk.f32.gmra.mrb[6].mxu0 %vm311_vm1, %v11013_v31  ;;  %v11102_v59 = vld [vmem:[#allocation2 + $0x87] sm:$0xff]  ;;  %v11108_v60 = vld [vmem:[#allocation2 + $0x8f] sm:$0xff] }
  0x44   : > { %9246 = vmatprep.mubr.msk.f32.mxu0 %vm311_vm1, %v11015_v32  ;;  %v11110_v61 = vld [vmem:[#allocation2 + $0xa7] sm:$0xff]  ;;  %v11116_v62 = vld [vmem:[#allocation2 + $0xaf] sm:$0xff] }
  0x45   : > { %v11118_v63 = vld [vmem:[#allocation2 + $0xc7] sm:$0xff]  ;;  %v11124_v0 = vld [vmem:[#allocation2 + $0xcf] sm:$0xff] }
  0x46   : > { %v11126_v2 = vld [vmem:[#allocation2 + $0xe7] sm:$0xff]  ;;  %v11132_v3 = vld [vmem:[#allocation2 + $0xef] sm:$0xff] }
  0x47   : > { %9247 = vmatmul.mubr.msk.f32.gmra.mrb[8].mxu0 %vm311_vm1, %v11019_v33  ;;  %v11134_v4 = vld [vmem:[#allocation2 + $0x107] sm:$0xff]  ;;  %v11140_v5 = vld [vmem:[#allocation2 + $0x10f] sm:$0xff] }
  0x48   : > { %9249 = vmatprep.mubr.msk.f32.mxu0 %vm311_vm1, %v11023_v34  ;;  %v11142_v6 = vld [vmem:[#allocation2 + $0x127] sm:$0xff]  ;;  %v11148_v7 = vld [vmem:[#allocation2 + $0x12f] sm:$0xff] }
  0x49   : > { %v11150_v8 = vld [vmem:[#allocation2 + $0x147] sm:$0xff]  ;;  %v11164_v11 = vld [vmem:[#allocation2 + $0x16f] sm:$0xff] }
  0x4a   : > { %v11158_v10 = vld [vmem:[#allocation2 + $0x167] sm:$0xff]  ;;  %v11172_v13 = vld [vmem:[#allocation2 + $0x18f] sm:$0xff] }
  0x4b   : > { %9250 = vmatmul.mubr.msk.f32.gmra.mrb[10].mxu0 %vm311_vm1, %v11047_v45  ;;  %v11166_v12 = vld [vmem:[#allocation2 + $0x187] sm:$0xff]  ;;  %v11180_v15 = vld [vmem:[#allocation2 + $0x1af] sm:$0xff] }
  0x4c   : > { %9252 = vmatprep.mubr.msk.f32.mxu0 %vm311_vm1, %v11051_v46  ;;  %v11174_v14 = vld [vmem:[#allocation2 + $0x1a7] sm:$0xff]  ;;  %v11192_v19 = vld [vmem:[#allocation2 + $0x1cf] sm:$0xff] }
  0x4d   : > { %v11182_v16 = vld [vmem:[#allocation2 + $0x1c7] sm:$0xff]  ;;  %v11200_v21 = vld [vmem:[#allocation2 + $0x1ef] sm:$0xff] }
  0x4e   : > { %v11194_v20 = vld [vmem:[#allocation2 + $0x1e7] sm:$0xff]  ;;  %v1135_v23 = vld [vmem:[#allocation2 + $0x11] sm:$0xff] }
  0x4f   : > { %9253 = vmatmul.mubr.msk.f32.gmra.mrb[12].mxu0 %vm311_vm1, %v11057_v47  ;;  %v1134_v22 = vld [vmem:[#allocation2 + $0x9] sm:$0xff]  ;;  %v11217_v35 = vld [vmem:[#allocation2 + $0x31] sm:$0xff] }
  0x50   : > { %9255 = vmatprep.mubr.msk.f32.mxu0 %vm311_vm1, %v11059_v48  ;;  %v11205_v24 = vld [vmem:[#allocation2 + $0x29] sm:$0xff]  ;;  %13181 = vst [vmem:[#allocation5_spill] sm:$0xff] %v11217_v35  ;;  %v11227_v37 = vld [vmem:[#allocation2 + $0x51] sm:$0xff] }
  0x51   : > { %13180 = vst [vmem:[#allocation4_spill] sm:$0xff] %v11205_v24  ;;  %v11210_v25 = vld [vmem:[%s13053_s1 + $0x10] sm:$0xf]  ;;  %13183 = vst [vmem:[#allocation7_spill] sm:$0xff] %v11227_v37 }
  0x52   : > { %v11219_v36 = vld [vmem:[#allocation2 + $0x49] sm:$0xff]  ;;  %v11235_v39 = vld [vmem:[#allocation2 + $0x71] sm:$0xff] }
  0x53   : > { %9256 = vmatmul.mubr.msk.f32.gmra.mrb[14].mxu0 %vm311_vm1, %v11065_v49  ;;  %13182 = vst [vmem:[#allocation6_spill] sm:$0xff] %v11219_v36  ;;  %v11229_v38 = vld [vmem:[#allocation2 + $0x69] sm:$0xff]  ;;  %13185 = vst [vmem:[#allocation9_spill] sm:$0xff] %v11235_v39  ;;  %v11243_v41 = vld [vmem:[#allocation2 + $0x91] sm:$0xff] }
  0x54   : > { %9284 = vmatprep.mubr.msk.f32.mxu0 %vm311_vm1, %v418_v50  ;;  %13184 = vst [vmem:[#allocation8_spill] sm:$0xff] %v11229_v38  ;;  %v11237_v40 = vld [vmem:[#allocation2 + $0x89] sm:$0xff]  ;;  %13187 = vst [vmem:[#allocation11_spill] sm:$0xff] %v11243_v41  ;;  %v11251_v43 = vld [vmem:[#allocation2 + $0xb1] sm:$0xff] }
  0x55   : > { %13186 = vst [vmem:[#allocation10_spill] sm:$0xff] %v11237_v40  ;;  %v11245_v42 = vld [vmem:[#allocation2 + $0xa9] sm:$0xff]  ;;  %13189 = vst [vmem:[#allocation13_spill] sm:$0xff] %v11251_v43  ;;  %v11259_v50 = vld [vmem:[#allocation2 + $0xd1] sm:$0xff] }
  0x56   : > { %13188 = vst [vmem:[#allocation12_spill] sm:$0xff] %v11245_v42  ;;  %v11253_v44 = vld [vmem:[#allocation2 + $0xc9] sm:$0xff]  ;;  %13191 = vst [vmem:[#allocation15_spill] sm:$0xff] %v11259_v50  ;;  %v11269_v17 = vld [vmem:[#allocation2 + $0xf1] sm:$0xff] }
  0x57   : > { %9285 = vmatmul.mubr.msk.f32.vlgmr.msra.gmra.mrb[0].mxu0 %vm311_vm1, %v419_v51  ;;  %13190 = vst [vmem:[#allocation14_spill] sm:$0xff] %v11253_v44  ;;  %v11261_v51 = vld [vmem:[#allocation2 + $0xe9] sm:$0xff]  ;;  %13193 = vst [vmem:[#allocation17_spill] sm:$0xff] %v11269_v17  ;;  %v11285_v1 = vld [vmem:[#allocation2 + $0x111] sm:$0xff] }
  0x58   : > { %9333 = vmatpush3.msk.msra.mxu0 %vm581_vm0, %v10955_v9  ;;  %9287 = vmatprep.mubr.msk.f32.mxu0 %vm311_vm1, %v11070_v52  ;;  %v11156_v9 = vld [vmem:[#allocation2 + $0x14f] sm:$0xff]  ;;  %13192 = vst [vmem:[#allocation16_spill] sm:$0xff] %v11261_v51  ;;  %13195 = vst [vmem:[#allocation19_spill] sm:$0xff] %v11285_v1 }
  0x59   : > { %9382 = vmatprep.subr.msk.mxu0 %vm581_vm0, %v11075_v53  ;;  %v11271_v18 = vld [vmem:[#allocation2 + $0x110] sm:$0xff] }
  0x5b   : > { %9288 = vmatmul.mubr.msk.f32.gmra.mrb[2].mxu0 %vm311_vm1, %v11082_v54 }
  0x5c   : > { %9290 = vmatprep.mubr.msk.f32.mxu0 %vm311_vm1, %v11084_v55 }
  0x5f   : > { %9291 = vmatmul.mubr.msk.f32.gmra.mrb[4].mxu0 %vm311_vm1, %v11092_v56 }
  0x60   : > { %9293 = vmatprep.mubr.msk.f32.mxu0 %vm311_vm1, %v11094_v57 }
  0x63   : > { %9294 = vmatmul.mubr.msk.f32.gmra.mrb[6].mxu0 %vm311_vm1, %v11100_v58 }
  0x64   : > { %9296 = vmatprep.mubr.msk.f32.mxu0 %vm311_vm1, %v11102_v59 }
  0x67   : > { %9297 = vmatmul.mubr.msk.f32.gmra.mrb[8].mxu0 %vm311_vm1, %v11108_v60 }
  0x68   : > { %9299 = vmatprep.mubr.msk.f32.mxu0 %vm311_vm1, %v11110_v61 }
  0x6b   : > { %9300 = vmatmul.mubr.msk.f32.gmra.mrb[10].mxu0 %vm311_vm1, %v11116_v62 }
  0x6c   : > { %9302 = vmatprep.mubr.msk.f32.mxu0 %vm311_vm1, %v11118_v63 }
  0x6f   : > { %9303 = vmatmul.mubr.msk.f32.gmra.mrb[12].mxu0 %vm311_vm1, %v11124_v0 }
  0x70   : > { %9305 = vmatprep.mubr.msk.f32.mxu0 %vm311_vm1, %v11126_v2 }
  0x73   : > { %9306 = vmatmul.mubr.msk.f32.gmra.mrb[14].mxu0 %vm311_vm1, %v11132_v3 }
  0x74   : > { %9308 = vmatprep.mubr.msk.f32.mxu0 %vm311_vm1, %v11134_v4 }
  0x77   : > { %9309 = vmatmul.mubr.msk.f32.gmra.mrb[16].mxu0 %vm311_vm1, %v11140_v5 }
  0x78   : > { %9311 = vmatprep.mubr.msk.f32.mxu0 %vm311_vm1, %v11142_v6 }
  0x7b   : > { %9312 = vmatmul.mubr.msk.f32.gmra.mrb[18].mxu0 %vm311_vm1, %v11148_v7 }
  0x7c   : > { %9314 = vmatprep.mubr.msk.f32.mxu0 %vm311_vm1, %v11150_v8 }
  0x7f   : > { %9315 = vmatmul.mubr.msk.f32.gmra.mrb[20].mxu0 %vm311_vm1, %v11156_v9 }
  0x80   : > { %9317 = vmatprep.mubr.msk.f32.mxu0 %vm311_vm1, %v11158_v10 }
  0x83   : > { %9318 = vmatmul.mubr.msk.f32.gmra.mrb[22].mxu0 %vm311_vm1, %v11164_v11 }
  0x84   : > { %9320 = vmatprep.mubr.msk.f32.mxu0 %vm311_vm1, %v11166_v12 }
  0x87   : > { %9321 = vmatmul.mubr.msk.f32.gmra.mrb[24].mxu0 %vm311_vm1, %v11172_v13 }
  0x88   : > { %9323 = vmatprep.mubr.msk.f32.mxu0 %vm311_vm1, %v11174_v14 }
  0x8b   : > { %9324 = vmatmul.mubr.msk.f32.gmra.mrb[26].mxu0 %vm311_vm1, %v11180_v15 }
  0x8c   : > { %9326 = vmatprep.mubr.msk.f32.mxu0 %vm311_vm1, %v11182_v16 }
  0x8f   : > { %9327 = vmatmul.mubr.msk.f32.gmra.mrb[28].mxu0 %vm311_vm1, %v11192_v19 }
  0x90   : > { %9329 = vmatprep.mubr.msk.f32.mxu0 %vm311_vm1, %v11194_v20 }
  0x93   : > { %9330 = vmatmul.mubr.msk.f32.gmra.mrb[30].mxu0 %vm311_vm1, %v11200_v21 }
  0x94   : > { %9334 = vmatprep.mubr.msk.f32.mxu0 %vm311_vm1, %v1134_v22  ;;  %v11275_v22 = vld [vmem:[#allocation2 + $0x109] sm:$0xff] }
  0x95   : > { %13194 = vst [vmem:[#allocation18_spill] sm:$0xff] %v11275_v22 }
  0x97   : > { %9335 = vmatmul.mubr.msk.f32.vlgmr.msra.gmra.mrb[0].mxu0 %vm311_vm1, %v1135_v23  ;;  %v11281_v23 = vld [vmem:[#allocation2 + $0x128] sm:$0xff] }
  0x98   : > { %9383 = vmatpush3.msk.msra.mxu0 %vm581_vm0, %v11075_v53  ;;  %9337 = vmatprep.mubr.msk.f32.mxu0 %vm311_vm1, %v11205_v24  ;;  %v11265_v53 = vld [vmem:[#allocation2 + $0x108] sm:$0xff]  ;;  %v11383_v24 = vld [vmem:[#allocation2 + $0x1f0] sm:$0xff] }
  0x99   : > { %9432 = vmatprep.subr.msk.mxu0 %vm581_vm0, %v11210_v25  ;;  %9258 = vmatprep.mubr.msk.f32.mxu1 %vm311_vm1, %v11265_v53  ;;  %13212 = vst [vmem:[#allocation36_spill] sm:$0xff] %v11383_v24 }
  0x9a   : > { %9259 = vmatmul.mubr.msk.f32.vlgmr.msra.gmra.mrb[0].mxu1 %vm311_vm1, %v11271_v18 }
  0x9b   : > { %9338 = vmatmul.mubr.msk.f32.gmra.mrb[2].mxu0 %vm311_vm1, %v11217_v35  ;;  %9261 = vmatprep.mubr.msk.f32.mxu1 %vm311_vm1, %v11281_v23  ;;  %v11371_v35 = vld [vmem:[#allocation2 + $0x1c9] sm:$0xff] }
  0x9c   : > { %9340 = vmatprep.mubr.msk.f32.mxu0 %vm311_vm1, %v11219_v36  ;;  %v11367_v36 = vld [vmem:[#allocation2 + $0x1d0] sm:$0xff]  ;;  %13210 = vst [vmem:[#allocation34_spill] sm:$0xff] %v11371_v35 }
  0x9d   : > { %13209 = vst [vmem:[#allocation33_spill] sm:$0xff] %v11367_v36 }
  0x9f   : > { %9341 = vmatmul.mubr.msk.f32.gmra.mrb[4].mxu0 %vm311_vm1, %v11227_v37  ;;  %v11355_v37 = vld [vmem:[#allocation2 + $0x1a9] sm:$0xff] }
  0xa0   : > { %9343 = vmatprep.mubr.msk.f32.mxu0 %vm311_vm1, %v11229_v38  ;;  %v11351_v38 = vld [vmem:[#allocation2 + $0x1b0] sm:$0xff]  ;;  %13206 = vst [vmem:[#allocation30_spill] sm:$0xff] %v11355_v37 }
  0xa1   : > { %13205 = vst [vmem:[#allocation29_spill] sm:$0xff] %v11351_v38 }
  0xa3   : > { %9344 = vmatmul.mubr.msk.f32.gmra.mrb[6].mxu0 %vm311_vm1, %v11235_v39  ;;  %v11339_v39 = vld [vmem:[#allocation2 + $0x189] sm:$0xff] }
  0xa4   : > { %9346 = vmatprep.mubr.msk.f32.mxu0 %vm311_vm1, %v11237_v40  ;;  %v11335_v40 = vld [vmem:[#allocation2 + $0x190] sm:$0xff]  ;;  %13202 = vst [vmem:[#allocation26_spill] sm:$0xff] %v11339_v39 }
  0xa7   : > { %9347 = vmatmul.mubr.msk.f32.gmra.mrb[8].mxu0 %vm311_vm1, %v11243_v41  ;;  %v11323_v41 = vld [vmem:[#allocation2 + $0x169] sm:$0xff] }
  0xa8   : > { %9349 = vmatprep.mubr.msk.f32.mxu0 %vm311_vm1, %v11245_v42  ;;  %v11319_v42 = vld [vmem:[#allocation2 + $0x170] sm:$0xff]  ;;  %13200 = vst [vmem:[#allocation24_spill] sm:$0xff] %v11323_v41 }
  0xab   : > { %9350 = vmatmul.mubr.msk.f32.gmra.mrb[10].mxu0 %vm311_vm1, %v11251_v43  ;;  %v11307_v43 = vld [vmem:[#allocation2 + $0x149] sm:$0xff] }
  0xac   : > { %9352 = vmatprep.mubr.msk.f32.mxu0 %vm311_vm1, %v11253_v44  ;;  %v11303_v44 = vld [vmem:[#allocation2 + $0x150] sm:$0xff]  ;;  %13198 = vst [vmem:[#allocation22_spill] sm:$0xff] %v11307_v43 }
  0xaf   : > { %9353 = vmatmul.mubr.msk.f32.gmra.mrb[12].mxu0 %vm311_vm1, %v11259_v50  ;;  %v11291_v50 = vld [vmem:[#allocation2 + $0x129] sm:$0xff] }
  0xb0   : > { %9355 = vmatprep.mubr.msk.f32.mxu0 %vm311_vm1, %v11261_v51  ;;  %v11287_v51 = vld [vmem:[#allocation2 + $0x130] sm:$0xff]  ;;  %13196 = vst [vmem:[#allocation20_spill] sm:$0xff] %v11291_v50 }
  0xb1   : > { %9262 = vmatmul.mubr.msk.f32.gmra.mrb[2].mxu1 %vm311_vm1, %v11287_v51 }
  0xb3   : > { %9356 = vmatmul.mubr.msk.f32.gmra.mrb[14].mxu0 %vm311_vm1, %v11269_v17  ;;  %v11297_v17 = vld [vmem:[#allocation2 + $0x148] sm:$0xff] }
  0xb4   : > { %9358 = vmatprep.mubr.msk.f32.mxu0 %vm311_vm1, %v11275_v22  ;;  %v11301_v22 = vld [vmem:[#allocation2 + $0x131] sm:$0xff]  ;;  %9264 = vmatprep.mubr.msk.f32.mxu1 %vm311_vm1, %v11297_v17 }
  0xb5   : > { %13197 = vst [vmem:[#allocation21_spill] sm:$0xff] %v11301_v22  ;;  %9265 = vmatmul.mubr.msk.f32.gmra.mrb[4].mxu1 %vm311_vm1, %v11303_v44 }
  0xb7   : > { %9359 = vmatmul.mubr.msk.f32.gmra.mrb[16].mxu0 %vm311_vm1, %v11285_v1  ;;  %v11313_v1 = vld [vmem:[#allocation2 + $0x168] sm:$0xff] }
  0xb8   : > { %9361 = vmatprep.mubr.msk.f32.mxu0 %vm311_vm1, %v11291_v50  ;;  %v11317_v50 = vld [vmem:[#allocation2 + $0x151] sm:$0xff]  ;;  %9267 = vmatprep.mubr.msk.f32.mxu1 %vm311_vm1, %v11313_v1 }
  0xb9   : > { %13199 = vst [vmem:[#allocation23_spill] sm:$0xff] %v11317_v50  ;;  %9268 = vmatmul.mubr.msk.f32.gmra.mrb[6].mxu1 %vm311_vm1, %v11319_v42 }
  0xbb   : > { %9362 = vmatmul.mubr.msk.f32.gmra.mrb[18].mxu0 %vm311_vm1, %v11301_v22  ;;  %v11329_v22 = vld [vmem:[#allocation2 + $0x188] sm:$0xff] }
  0xbc   : > { %9364 = vmatprep.mubr.msk.f32.mxu0 %vm311_vm1, %v11307_v43  ;;  %v11333_v43 = vld [vmem:[#allocation2 + $0x171] sm:$0xff]  ;;  %9270 = vmatprep.mubr.msk.f32.mxu1 %vm311_vm1, %v11329_v22 }
  0xbd   : > { %13201 = vst [vmem:[#allocation25_spill] sm:$0xff] %v11333_v43  ;;  %9271 = vmatmul.mubr.msk.f32.gmra.mrb[8].mxu1 %vm311_vm1, %v11335_v40 }
  0xbf   : > { %9365 = vmatmul.mubr.msk.f32.gmra.mrb[20].mxu0 %vm311_vm1, %v11317_v50  ;;  %v11345_v50 = vld [vmem:[#allocation2 + $0x1a8] sm:$0xff] }
  0xc0   : > { %9367 = vmatprep.mubr.msk.f32.mxu0 %vm311_vm1, %v11323_v41  ;;  %13203 = vst [vmem:[#allocation27_spill] sm:$0xff] %v11345_v50  ;;  %v11349_v41 = vld [vmem:[#allocation2 + $0x191] sm:$0xff]  ;;  %9273 = vmatprep.mubr.msk.f32.mxu1 %vm311_vm1, %v11345_v50 }
  0xc1   : > { %13204 = vst [vmem:[#allocation28_spill] sm:$0xff] %v11349_v41  ;;  %9274 = vmatmul.mubr.msk.f32.gmra.mrb[10].mxu1 %vm311_vm1, %v11351_v38 }
  0xc3   : > { %9368 = vmatmul.mubr.msk.f32.gmra.mrb[22].mxu0 %vm311_vm1, %v11333_v43  ;;  %v11361_v43 = vld [vmem:[#allocation2 + $0x1c8] sm:$0xff] }
  0xc4   : > { %9370 = vmatprep.mubr.msk.f32.mxu0 %vm311_vm1, %v11339_v39  ;;  %13207 = vst [vmem:[#allocation31_spill] sm:$0xff] %v11361_v43  ;;  %v11365_v39 = vld [vmem:[#allocation2 + $0x1b1] sm:$0xff]  ;;  %9276 = vmatprep.mubr.msk.f32.mxu1 %vm311_vm1, %v11361_v43  ;;  %v11387_v43 = vld [vmem:[#allocation2 + $0x1e9] sm:$0xff] }
  0xc5   : > { %13208 = vst [vmem:[#allocation32_spill] sm:$0xff] %v11365_v39  ;;  %9277 = vmatmul.mubr.msk.f32.gmra.mrb[12].mxu1 %vm311_vm1, %v11367_v36  ;;  %13213 = vst [vmem:[#allocation37_spill] sm:$0xff] %v11387_v43 }
  0xc7   : > { %9371 = vmatmul.mubr.msk.f32.gmra.mrb[24].mxu0 %vm311_vm1, %v11349_v41  ;;  %v11377_v41 = vld [vmem:[#allocation2 + $0x1e8] sm:$0xff] }
  0xc8   : > { %9373 = vmatprep.mubr.msk.f32.mxu0 %vm311_vm1, %v11355_v37  ;;  %13211 = vst [vmem:[#allocation35_spill] sm:$0xff] %v11377_v41  ;;  %v11381_v37 = vld [vmem:[#allocation2 + $0x1d1] sm:$0xff]  ;;  %9279 = vmatprep.mubr.msk.f32.mxu1 %vm311_vm1, %v11377_v41 }
  0xc9   : > { %9280 = vmatmul.mubr.msk.f32.gmra.mrb[14].mxu1 %vm311_vm1, %v11383_v24 }
  0xcb   : > { %9374 = vmatmul.mubr.msk.f32.gmra.mrb[26].mxu0 %vm311_vm1, %v11365_v39  ;;  %v11395_v39 = vld [vmem:[#allocation2 + $0x1f1] sm:$0xff] }
  0xcc   : > { %9376 = vmatprep.mubr.msk.f32.mxu0 %vm311_vm1, %v11371_v35  ;;  %v8125_v35 = vld [vmem:[%s13053_s1 + $0x14] sm:$0xf] }
  0xcf   : > { %9377 = vmatmul.mubr.msk.f32.gmra.mrb[28].mxu0 %vm311_vm1, %v11381_v37 }
  0xd0   : > { %9379 = vmatprep.mubr.msk.f32.mxu0 %vm311_vm1, %v11387_v43 }
  0xd3   : > { %9380 = vmatmul.mubr.msk.f32.gmra.mrb[30].mxu0 %vm311_vm1, %v11395_v39 }
  0xd4   : > { %9384 = vmatprep.mubr.msk.f32.mxu0 %vm311_vm1, %v11070_v52  ;;  %v11463_v52 = vld [vmem:[#allocation2 + $0x207] sm:$0xff] }
  0xd7   : > { %9385 = vmatmul.mubr.msk.f32.vlgmr.msra.gmra.mrb[0].mxu0 %vm311_vm1, %v11082_v54  ;;  %v11469_v54 = vld [vmem:[#allocation2 + $0x20f] sm:$0xff] }
  0xd8   : > { %9433 = vmatpush3.msk.msra.mxu0 %vm581_vm0, %v11210_v25  ;;  %9387 = vmatprep.mubr.msk.f32.mxu0 %vm311_vm1, %v11084_v55  ;;  %v8159_v25 = vld [vmem:[%s13053_s1 + $0x18] sm:$0xf] }
  0xd9   : > { %9482 = vmatprep.subr.msk.mxu0 %vm581_vm0, %v8125_v35 }
  0xdb   : > { %9388 = vmatmul.mubr.msk.f32.gmra.mrb[2].mxu0 %vm311_vm1, %v11092_v56 }
  0xdc   : > { %9390 = vmatprep.mubr.msk.f32.mxu0 %vm311_vm1, %v11094_v57 }
  0xdf   : > { %9391 = vmatmul.mubr.msk.f32.gmra.mrb[4].mxu0 %vm311_vm1, %v11100_v58 }
  0xe0   : > { %9393 = vmatprep.mubr.msk.f32.mxu0 %vm311_vm1, %v11102_v59 }
  0xe3   : > { %9394 = vmatmul.mubr.msk.f32.gmra.mrb[6].mxu0 %vm311_vm1, %v11108_v60 }
  0xe4   : > { %9396 = vmatprep.mubr.msk.f32.mxu0 %vm311_vm1, %v11110_v61 }
  0xe7   : > { %9397 = vmatmul.mubr.msk.f32.gmra.mrb[8].mxu0 %vm311_vm1, %v11116_v62 }
  0xe8   : > { %9399 = vmatprep.mubr.msk.f32.mxu0 %vm311_vm1, %v11118_v63 }
  0xeb   : > { %9400 = vmatmul.mubr.msk.f32.gmra.mrb[10].mxu0 %vm311_vm1, %v11124_v0 }
  0xec   : > { %9402 = vmatprep.mubr.msk.f32.mxu0 %vm311_vm1, %v11126_v2 }
  0xef   : > { %9403 = vmatmul.mubr.msk.f32.gmra.mrb[12].mxu0 %vm311_vm1, %v11132_v3 }
  0xf0   : > { %9405 = vmatprep.mubr.msk.f32.mxu0 %vm311_vm1, %v11134_v4 }
  0xf3   : > { %9406 = vmatmul.mubr.msk.f32.gmra.mrb[14].mxu0 %vm311_vm1, %v11140_v5 }
  0xf4   : > { %9408 = vmatprep.mubr.msk.f32.mxu0 %vm311_vm1, %v11142_v6 }
  0xf7   : > { %9409 = vmatmul.mubr.msk.f32.gmra.mrb[16].mxu0 %vm311_vm1, %v11148_v7 }
  0xf8   : > { %9411 = vmatprep.mubr.msk.f32.mxu0 %vm311_vm1, %v11150_v8 }
  0xfb   : > { %9412 = vmatmul.mubr.msk.f32.gmra.mrb[18].mxu0 %vm311_vm1, %v11156_v9 }
  0xfc   : > { %9414 = vmatprep.mubr.msk.f32.mxu0 %vm311_vm1, %v11158_v10 }
  0xff   : > { %9415 = vmatmul.mubr.msk.f32.gmra.mrb[20].mxu0 %vm311_vm1, %v11164_v11 }
 0x100   : > { %9417 = vmatprep.mubr.msk.f32.mxu0 %vm311_vm1, %v11166_v12 }
 0x103   : > { %9418 = vmatmul.mubr.msk.f32.gmra.mrb[22].mxu0 %vm311_vm1, %v11172_v13 }
 0x104   : > { %9420 = vmatprep.mubr.msk.f32.mxu0 %vm311_vm1, %v11174_v14 }
 0x107   : > { %9421 = vmatmul.mubr.msk.f32.gmra.mrb[24].mxu0 %vm311_vm1, %v11180_v15 }
 0x108   : > { %9423 = vmatprep.mubr.msk.f32.mxu0 %vm311_vm1, %v11182_v16 }
 0x10b   : > { %9424 = vmatmul.mubr.msk.f32.gmra.mrb[26].mxu0 %vm311_vm1, %v11192_v19 }
 0x10c   : > { %9426 = vmatprep.mubr.msk.f32.mxu0 %vm311_vm1, %v11194_v20 }
 0x10f   : > { %9427 = vmatmul.mubr.msk.f32.gmra.mrb[28].mxu0 %vm311_vm1, %v11200_v21 }
 0x110   : > { %9429 = vmatprep.mubr.msk.f32.mxu0 %vm311_vm1, %v11463_v52 }
 0x113   : > { %9430 = vmatmul.mubr.msk.f32.gmra.mrb[30].mxu0 %vm311_vm1, %v11469_v54 }
 0x114   : > { %9434 = vmatprep.mubr.msk.f32.mxu0 %vm311_vm1, %v10990_v26  ;;  %v13214_v26 = vld [vmem:[#allocation31_spill] sm:$0xff] }
 0x117   : > { %9435 = vmatmul.mubr.msk.f32.vlgmr.msra.gmra.mrb[0].mxu0 %vm311_vm1, %v10992_v27  ;;  %v11536_v27 = vld [vmem:[#allocation2 + $0x208] sm:$0xff] }
 0x118   : > { %9483 = vmatpush3.msk.msra.mxu0 %vm581_vm0, %v8125_v35  ;;  %9437 = vmatprep.mubr.msk.f32.mxu0 %vm311_vm1, %v10994_v28  ;;  %13215 = vst [vmem:[#allocation38_spill] sm:$0xff] %v11536_v27  ;;  %v11542_v35 = vld [vmem:[#allocation2 + $0x210] sm:$0xff] }
 0x119   : > { %9532 = vmatprep.subr.msk.mxu0 %vm581_vm0, %v8159_v25  ;;  %13216 = vst [vmem:[#allocation39_spill] sm:$0xff] %v11542_v35 }
 0x11b   : > { %9438 = vmatmul.mubr.msk.f32.gmra.mrb[2].mxu0 %vm311_vm1, %v11005_v29 }
 0x11c   : > { %9440 = vmatprep.mubr.msk.f32.mxu0 %vm311_vm1, %v11007_v30 }
 0x11f   : > { %9441 = vmatmul.mubr.msk.f32.gmra.mrb[4].mxu0 %vm311_vm1, %v11013_v31 }
 0x120   : > { %9443 = vmatprep.mubr.msk.f32.mxu0 %vm311_vm1, %v11015_v32 }
 0x123   : > { %9444 = vmatmul.mubr.msk.f32.gmra.mrb[6].mxu0 %vm311_vm1, %v11019_v33 }
 0x124   : > { %9446 = vmatprep.mubr.msk.f32.mxu0 %vm311_vm1, %v11023_v34 }
 0x127   : > { %9447 = vmatmul.mubr.msk.f32.gmra.mrb[8].mxu0 %vm311_vm1, %v11047_v45 }
 0x128   : > { %9449 = vmatprep.mubr.msk.f32.mxu0 %vm311_vm1, %v11051_v46 }
 0x12b   : > { %9450 = vmatmul.mubr.msk.f32.gmra.mrb[10].mxu0 %vm311_vm1, %v11057_v47 }
 0x12c   : > { %9452 = vmatprep.mubr.msk.f32.mxu0 %vm311_vm1, %v11059_v48 }
 0x12f   : > { %9453 = vmatmul.mubr.msk.f32.gmra.mrb[12].mxu0 %vm311_vm1, %v11065_v49 }
 0x130   : > { %9455 = vmatprep.mubr.msk.f32.mxu0 %vm311_vm1, %v11265_v53 }
 0x133   : > { %9456 = vmatmul.mubr.msk.f32.gmra.mrb[14].mxu0 %vm311_vm1, %v11271_v18 }
 0x134   : > { %9458 = vmatprep.mubr.msk.f32.mxu0 %vm311_vm1, %v11281_v23 }
 0x137   : > { %9459 = vmatmul.mubr.msk.f32.gmra.mrb[16].mxu0 %vm311_vm1, %v11287_v51 }
 0x138   : > { %9461 = vmatprep.mubr.msk.f32.mxu0 %vm311_vm1, %v11297_v17 }
 0x13b   : > { %9462 = vmatmul.mubr.msk.f32.gmra.mrb[18].mxu0 %vm311_vm1, %v11303_v44 }
 0x13c   : > { %9464 = vmatprep.mubr.msk.f32.mxu0 %vm311_vm1, %v11313_v1 }
 0x13f   : > { %9465 = vmatmul.mubr.msk.f32.gmra.mrb[20].mxu0 %vm311_vm1, %v11319_v42 }
 0x140   : > { %9467 = vmatprep.mubr.msk.f32.mxu0 %vm311_vm1, %v11329_v22 }
 0x143   : > { %9468 = vmatmul.mubr.msk.f32.gmra.mrb[22].mxu0 %vm311_vm1, %v11335_v40 }
 0x144   : > { %9470 = vmatprep.mubr.msk.f32.mxu0 %vm311_vm1, %v11345_v50  ;;  %v13227_v50 = vld [vmem:[#allocation14_spill] sm:$0xff] }
 0x147   : > { %9471 = vmatmul.mubr.msk.f32.gmra.mrb[24].mxu0 %vm311_vm1, %v11351_v38  ;;  %v13223_v38 = vld [vmem:[#allocation10_spill] sm:$0xff] }
 0x148   : > { %9473 = vmatprep.mubr.msk.f32.mxu0 %vm311_vm1, %v13214_v26  ;;  %v13217_v26 = vld [vmem:[#allocation4_spill] sm:$0xff] }
 0x14b   : > { %9474 = vmatmul.mubr.msk.f32.gmra.mrb[26].mxu0 %vm311_vm1, %v11367_v36  ;;  %v13218_v36 = vld [vmem:[#allocation5_spill] sm:$0xff] }
 0x14c   : > { %9476 = vmatprep.mubr.msk.f32.mxu0 %vm311_vm1, %v11377_v41  ;;  %v8193_v41 = vld [vmem:[%s13053_s1 + $0x1c] sm:$0xf] }
 0x14f   : > { %9477 = vmatmul.mubr.msk.f32.gmra.mrb[28].mxu0 %vm311_vm1, %v11383_v24  ;;  %v13219_v24 = vld [vmem:[#allocation6_spill] sm:$0xff] }
 0x150   : > { %9479 = vmatprep.mubr.msk.f32.mxu0 %vm311_vm1, %v11536_v27  ;;  %v13220_v27 = vld [vmem:[#allocation7_spill] sm:$0xff] }
 0x153   : > { %9480 = vmatmul.mubr.msk.f32.gmra.mrb[30].mxu0 %vm311_vm1, %v11542_v35  ;;  %v13221_v35 = vld [vmem:[#allocation8_spill] sm:$0xff] }
 0x154   : > { %9484 = vmatprep.mubr.msk.f32.mxu0 %vm311_vm1, %v13217_v26  ;;  %v13222_v26 = vld [vmem:[#allocation9_spill] sm:$0xff] }
 0x157   : > { %9485 = vmatmul.mubr.msk.f32.vlgmr.msra.gmra.mrb[0].mxu0 %vm311_vm1, %v13218_v36  ;;  %v13224_v36 = vld [vmem:[#allocation11_spill] sm:$0xff] }
 0x158   : > { %9533 = vmatpush3.msk.msra.mxu0 %vm581_vm0, %v8159_v25  ;;  %9487 = vmatprep.mubr.msk.f32.mxu0 %vm311_vm1, %v13219_v24  ;;  %v13225_v25 = vld [vmem:[#allocation12_spill] sm:$0xff]  ;;  %v13226_v24 = vld [vmem:[#allocation13_spill] sm:$0xff] }
 0x159   : > { %9582 = vmatprep.subr.msk.mxu0 %vm581_vm0, %v8193_v41 }
 0x15b   : > { %9488 = vmatmul.mubr.msk.f32.gmra.mrb[2].mxu0 %vm311_vm1, %v13220_v27  ;;  %v13228_v27 = vld [vmem:[#allocation15_spill] sm:$0xff] }
 0x15c   : > { %9490 = vmatprep.mubr.msk.f32.mxu0 %vm311_vm1, %v13221_v35  ;;  %v13229_v35 = vld [vmem:[#allocation16_spill] sm:$0xff] }
 0x15f   : > { %9491 = vmatmul.mubr.msk.f32.gmra.mrb[4].mxu0 %vm311_vm1, %v13222_v26  ;;  %v13230_v26 = vld [vmem:[#allocation17_spill] sm:$0xff] }
 0x160   : > { %9493 = vmatprep.mubr.msk.f32.mxu0 %vm311_vm1, %v13223_v38  ;;  %v13231_v38 = vld [vmem:[#allocation18_spill] sm:$0xff] }
 0x163   : > { %9494 = vmatmul.mubr.msk.f32.gmra.mrb[6].mxu0 %vm311_vm1, %v13224_v36  ;;  %v13232_v36 = vld [vmem:[#allocation19_spill] sm:$0xff] }
 0x164   : > { %9496 = vmatprep.mubr.msk.f32.mxu0 %vm311_vm1, %v13225_v25  ;;  %v13233_v25 = vld [vmem:[#allocation20_spill] sm:$0xff] }
 0x167   : > { %9497 = vmatmul.mubr.msk.f32.gmra.mrb[8].mxu0 %vm311_vm1, %v13226_v24  ;;  %v13234_v24 = vld [vmem:[#allocation21_spill] sm:$0xff] }
 0x168   : > { %9499 = vmatprep.mubr.msk.f32.mxu0 %vm311_vm1, %v13227_v50  ;;  %v13235_v50 = vld [vmem:[#allocation22_spill] sm:$0xff] }
 0x16b   : > { %9500 = vmatmul.mubr.msk.f32.gmra.mrb[10].mxu0 %vm311_vm1, %v13228_v27  ;;  %v13236_v27 = vld [vmem:[#allocation23_spill] sm:$0xff] }
 0x16c   : > { %9502 = vmatprep.mubr.msk.f32.mxu0 %vm311_vm1, %v13229_v35  ;;  %v13237_v35 = vld [vmem:[#allocation24_spill] sm:$0xff] }
 0x16f   : > { %9503 = vmatmul.mubr.msk.f32.gmra.mrb[12].mxu0 %vm311_vm1, %v13230_v26  ;;  %v13238_v26 = vld [vmem:[#allocation25_spill] sm:$0xff] }
 0x170   : > { %9505 = vmatprep.mubr.msk.f32.mxu0 %vm311_vm1, %v13231_v38  ;;  %v13239_v38 = vld [vmem:[#allocation26_spill] sm:$0xff] }
 0x173   : > { %9506 = vmatmul.mubr.msk.f32.gmra.mrb[14].mxu0 %vm311_vm1, %v13232_v36  ;;  %v13240_v36 = vld [vmem:[#allocation28_spill] sm:$0xff] }
 0x174   : > { %9508 = vmatprep.mubr.msk.f32.mxu0 %vm311_vm1, %v13233_v25  ;;  %v13241_v25 = vld [vmem:[#allocation30_spill] sm:$0xff] }
 0x177   : > { %9509 = vmatmul.mubr.msk.f32.gmra.mrb[16].mxu0 %vm311_vm1, %v13234_v24  ;;  %v13242_v24 = vld [vmem:[#allocation32_spill] sm:$0xff] }
 0x178   : > { %9511 = vmatprep.mubr.msk.f32.mxu0 %vm311_vm1, %v13235_v50  ;;  %v13243_v50 = vld [vmem:[#allocation34_spill] sm:$0xff] }
 0x17b   : > { %9512 = vmatmul.mubr.msk.f32.gmra.mrb[18].mxu0 %vm311_vm1, %v13236_v27 }
 0x17c   : > { %9514 = vmatprep.mubr.msk.f32.mxu0 %vm311_vm1, %v13237_v35 }
 0x17f   : > { %9515 = vmatmul.mubr.msk.f32.gmra.mrb[20].mxu0 %vm311_vm1, %v13238_v26  ;;  %v11609_v26 = vld [vmem:[#allocation2 + $0x209] sm:$0xff] }
 0x180   : > { %9517 = vmatprep.mubr.msk.f32.mxu0 %vm311_vm1, %v13239_v38 }
 0x183   : > { %9518 = vmatmul.mubr.msk.f32.gmra.mrb[22].mxu0 %vm311_vm1, %v13240_v36 }
 0x184   : > { %9520 = vmatprep.mubr.msk.f32.mxu0 %vm311_vm1, %v13241_v25  ;;  %v11615_v25 = vld [vmem:[#allocation2 + $0x211] sm:$0xff] }
 0x187   : > { %9521 = vmatmul.mubr.msk.f32.gmra.mrb[24].mxu0 %vm311_vm1, %v13242_v24 }
 0x188   : > { %9523 = vmatprep.mubr.msk.f32.mxu0 %vm311_vm1, %v13243_v50 }
 0x18b   : > { %9524 = vmatmul.mubr.msk.f32.gmra.mrb[26].mxu0 %vm311_vm1, %v11381_v37 }
 0x18c   : > { %9526 = vmatprep.mubr.msk.f32.mxu0 %vm311_vm1, %v11387_v43  ;;  %v8227_v43 = vld [vmem:[%s13053_s1 + $0x20] sm:$0xf] }
 0x18f   : > { %9527 = vmatmul.mubr.msk.f32.gmra.mrb[28].mxu0 %vm311_vm1, %v11395_v39 }
 0x190   : > { %9529 = vmatprep.mubr.msk.f32.mxu0 %vm311_vm1, %v11609_v26 }
 0x193   : > { %9530 = vmatmul.mubr.msk.f32.gmra.mrb[30].mxu0 %vm311_vm1, %v11615_v25 }
 0x194   : > { %9534 = vmatprep.mubr.msk.f32.mxu0 %vm311_vm1, %v11084_v55  ;;  %v2725_v55 = vld [vmem:[#allocation2 + $0x227] sm:$0xff] }
 0x197   : > { %9535 = vmatmul.mubr.msk.f32.vlgmr.msra.gmra.mrb[0].mxu0 %vm311_vm1, %v11092_v56  ;;  %v2726_v56 = vld [vmem:[#allocation2 + $0x22f] sm:$0xff] }
 0x198   : > { %9583 = vmatpush3.msk.msra.mxu0 %vm581_vm0, %v8193_v41  ;;  %9537 = vmatprep.mubr.msk.f32.mxu0 %vm311_vm1, %v11094_v57  ;;  %v8262_v57 = vld [vmem:[%s13055_s3 + $0x8] sm:$0x3f] }
 0x199   : > { %9632 = vmatprep.subr.msk.mxu0 %vm581_vm0, %v8227_v43  ;;  %9682 = vmatprep.subr.msk.mxu1 %vm4206_vm3, %v8262_v57 }
 0x19a   : > { %9683 = vmatpush3.msk.msra.mxu1 %vm4206_vm3, %v8262_v57 }
 0x19b   : > { %9538 = vmatmul.mubr.msk.f32.gmra.mrb[2].mxu0 %vm311_vm1, %v11100_v58  ;;  %v13255_v58 = vld [vmem:[#allocation9_spill] sm:$0xff] }
 0x19c   : > { %9540 = vmatprep.mubr.msk.f32.mxu0 %vm311_vm1, %v11102_v59  ;;  %v13256_v59 = vld [vmem:[#allocation10_spill] sm:$0xff] }
 0x19f   : > { %9541 = vmatmul.mubr.msk.f32.gmra.mrb[4].mxu0 %vm311_vm1, %v11108_v60  ;;  %v13257_v60 = vld [vmem:[#allocation11_spill] sm:$0xff] }
 0x1a0   : > { %9543 = vmatprep.mubr.msk.f32.mxu0 %vm311_vm1, %v11110_v61  ;;  %v13258_v61 = vld [vmem:[#allocation12_spill] sm:$0xff] }
 0x1a3   : > { %9544 = vmatmul.mubr.msk.f32.gmra.mrb[6].mxu0 %vm311_vm1, %v11116_v62  ;;  %v13259_v62 = vld [vmem:[#allocation13_spill] sm:$0xff] }
 0x1a4   : > { %9546 = vmatprep.mubr.msk.f32.mxu0 %vm311_vm1, %v11118_v63  ;;  %v13260_v63 = vld [vmem:[#allocation14_spill] sm:$0xff] }
 0x1a7   : > { %9547 = vmatmul.mubr.msk.f32.gmra.mrb[8].mxu0 %vm311_vm1, %v11124_v0  ;;  %v13261_v0 = vld [vmem:[#allocation15_spill] sm:$0xff] }
 0x1a8   : > { %9549 = vmatprep.mubr.msk.f32.mxu0 %vm311_vm1, %v11126_v2  ;;  %v13262_v2 = vld [vmem:[#allocation16_spill] sm:$0xff] }
 0x1ab   : > { %9550 = vmatmul.mubr.msk.f32.gmra.mrb[10].mxu0 %vm311_vm1, %v11132_v3  ;;  %v13263_v3 = vld [vmem:[#allocation17_spill] sm:$0xff] }
 0x1ac   : > { %9552 = vmatprep.mubr.msk.f32.mxu0 %vm311_vm1, %v11134_v4  ;;  %v13264_v4 = vld [vmem:[#allocation18_spill] sm:$0xff] }
 0x1af   : > { %9553 = vmatmul.mubr.msk.f32.gmra.mrb[12].mxu0 %vm311_vm1, %v11140_v5  ;;  %v13265_v5 = vld [vmem:[#allocation19_spill] sm:$0xff] }
 0x1b0   : > { %9555 = vmatprep.mubr.msk.f32.mxu0 %vm311_vm1, %v11142_v6  ;;  %v13266_v6 = vld [vmem:[#allocation20_spill] sm:$0xff] }
 0x1b3   : > { %9556 = vmatmul.mubr.msk.f32.gmra.mrb[14].mxu0 %vm311_vm1, %v11148_v7  ;;  %v13267_v7 = vld [vmem:[#allocation21_spill] sm:$0xff] }
 0x1b4   : > { %9558 = vmatprep.mubr.msk.f32.mxu0 %vm311_vm1, %v11150_v8  ;;  %v13268_v8 = vld [vmem:[#allocation22_spill] sm:$0xff] }
 0x1b7   : > { %9559 = vmatmul.mubr.msk.f32.gmra.mrb[16].mxu0 %vm311_vm1, %v11156_v9  ;;  %v13269_v9 = vld [vmem:[#allocation25_spill] sm:$0xff] }
 0x1b8   : > { %9561 = vmatprep.mubr.msk.f32.mxu0 %vm311_vm1, %v11158_v10  ;;  %v13270_v10 = vld [vmem:[#allocation30_spill] sm:$0xff] }
 0x1bb   : > { %9562 = vmatmul.mubr.msk.f32.gmra.mrb[18].mxu0 %vm311_vm1, %v11164_v11  ;;  %v13271_v11 = vld [vmem:[#allocation37_spill] sm:$0xff] }
 0x1bc   : > { %9564 = vmatprep.mubr.msk.f32.mxu0 %vm311_vm1, %v11166_v12  ;;  %v3505_v12 = vld [vmem:[#allocation2 + $0x229] sm:$0xff] }
 0x1bf   : > { %9565 = vmatmul.mubr.msk.f32.gmra.mrb[20].mxu0 %vm311_vm1, %v11172_v13  ;;  %v3506_v13 = vld [vmem:[#allocation2 + $0x231] sm:$0xff] }
 0x1c0   : > { %9567 = vmatprep.mubr.msk.f32.mxu0 %vm311_vm1, %v11174_v14  ;;  %v13272_v14 = vmov 0.0  }
 0x1c1   : > { %3944 = vst.msk [vmem:[#allocation3 + $0x30] sm:$0xff] %vm3936_vm4, %v13272_v14  ;;  %3937 = vst.msk [vmem:[#allocation3] sm:$0xff] %vm3936_vm4, %v13272_v14 }
 0x1c2   : > { %3938 = vst.msk [vmem:[#allocation3 + $0x8] sm:$0xff] %vm3936_vm4, %v13272_v14  ;;  %3939 = vst.msk [vmem:[#allocation3 + $0x10] sm:$0xff] %vm3936_vm4, %v13272_v14 }
 0x1c3   : > { %9568 = vmatmul.mubr.msk.f32.gmra.mrb[22].mxu0 %vm311_vm1, %v11180_v15  ;;  %3942 = vst.msk [vmem:[#allocation3 + $0x20] sm:$0xff] %vm3936_vm4, %v13272_v14  ;;  %3943 = vst.msk [vmem:[#allocation3 + $0x28] sm:$0xff] %vm3936_vm4, %v13272_v14 }
 0x1c4   : > { %9570 = vmatprep.mubr.msk.f32.mxu0 %vm311_vm1, %v11182_v16  ;;  %3946 = vst.msk [vmem:[#allocation3 + $0x40] sm:$0xff] %vm3936_vm4, %v13272_v14  ;;  %3947 = vst.msk [vmem:[#allocation3 + $0x48] sm:$0xff] %vm3936_vm4, %v13272_v14 }
 0x1c5   : > { %3948 = vst.msk [vmem:[#allocation3 + $0x50] sm:$0xff] %vm3936_vm4, %v13272_v14  ;;  %3950 = vst.msk [vmem:[#allocation3 + $0x60] sm:$0xff] %vm3936_vm4, %v13272_v14 }
 0x1c6   : > { %3951 = vst.msk [vmem:[#allocation3 + $0x68] sm:$0xff] %vm3936_vm4, %v13272_v14  ;;  %3952 = vst.msk [vmem:[#allocation3 + $0x70] sm:$0xff] %vm3936_vm4, %v13272_v14 }
 0x1c7   : > { %9571 = vmatmul.mubr.msk.f32.gmra.mrb[24].mxu0 %vm311_vm1, %v11192_v19  ;;  %3954 = vst.msk [vmem:[#allocation3 + $0x80] sm:$0xff] %vm3936_vm4, %v13272_v14  ;;  %3955 = vst.msk [vmem:[#allocation3 + $0x88] sm:$0xff] %vm3936_vm4, %v13272_v14  ;;  %v4075_v19 = vld [vmem:[%s13055_s3] sm:$0x3f] }
 0x1c8   : > { %9573 = vmatprep.mubr.msk.f32.mxu0 %vm311_vm1, %v11194_v20  ;;  %3956 = vst.msk [vmem:[#allocation3 + $0x90] sm:$0xff] %vm3936_vm4, %v13272_v14  ;;  %3958 = vst.msk [vmem:[#allocation3 + $0xa0] sm:$0xff] %vm3936_vm4, %v13272_v14  ;;  %9732 = vmatprep.subr.msk.mxu1 %vm4206_vm3, %v4075_v19  ;;  %v11967_v20 = vpop.f32.mrb[0].mxu1 }
 0x1c9   : > { %3959 = vst.msk [vmem:[#allocation3 + $0xa8] sm:$0xff] %vm3936_vm4, %v13272_v14  ;;  %3960 = vst.msk [vmem:[#allocation3 + $0xb0] sm:$0xff] %vm3936_vm4, %v13272_v14  ;;  %v4076_v15 = vld [vmem:[#allocation3 + $0x8] sm:$0xff]  ;;  %v4077_v16 = vld [vmem:[#allocation3 + $0x10] sm:$0xff] }
 0x1ca   : > { %3962 = vst.msk [vmem:[#allocation3 + $0xc0] sm:$0xff] %vm3936_vm4, %v13272_v14  ;;  %3963 = vst.msk [vmem:[#allocation3 + $0xc8] sm:$0xff] %vm3936_vm4, %v13272_v14  ;;  %9684 = vmatprep.mubr.msk.f32.mxu1 %vm3936_vm4, %v4076_v15 }
 0x1cb   : > { %9574 = vmatmul.mubr.msk.f32.gmra.mrb[26].mxu0 %vm311_vm1, %v11200_v21  ;;  %3964 = vst.msk [vmem:[#allocation3 + $0xd0] sm:$0xff] %vm3936_vm4, %v13272_v14  ;;  %3966 = vst.msk [vmem:[#allocation3 + $0xe0] sm:$0xff] %vm3936_vm4, %v13272_v14  ;;  %9685 = vmatmul.mubr.msk.f32.vlgmr.msra.gmra.mrb[16].mxu1 %vm3936_vm4, %v4077_v16  ;;  %v11969_v21 = vpop.f32.mrb[1].mxu1 }
 0x1cc   : > { %9576 = vmatprep.mubr.msk.f32.mxu0 %vm311_vm1, %v11463_v52  ;;  %3967 = vst.msk [vmem:[#allocation3 + $0xe8] sm:$0xff] %vm3936_vm4, %v13272_v14  ;;  %3968 = vst.msk [vmem:[#allocation3 + $0xf0] sm:$0xff] %vm3936_vm4, %v13272_v14  ;;  %9733 = vmatpush3.msk.msra.mxu1 %vm4206_vm3, %v4075_v19 }
 0x1cd   : > { %3970 = vst.msk [vmem:[#allocation3 + $0x100] sm:$0xff] %vm3936_vm4, %v13272_v14  ;;  %3971 = vst.msk [vmem:[#allocation3 + $0x108] sm:$0xff] %vm3936_vm4, %v13272_v14 }
 0x1ce   : > { %3972 = vst.msk [vmem:[#allocation3 + $0x110] sm:$0xff] %vm3936_vm4, %v13272_v14  ;;  %3974 = vst.msk [vmem:[#allocation3 + $0x120] sm:$0xff] %vm3936_vm4, %v13272_v14 }
 0x1cf   : > { %9577 = vmatmul.mubr.msk.f32.gmra.mrb[28].mxu0 %vm311_vm1, %v11469_v54  ;;  %3975 = vst.msk [vmem:[#allocation3 + $0x128] sm:$0xff] %vm3936_vm4, %v13272_v14  ;;  %3976 = vst.msk [vmem:[#allocation3 + $0x130] sm:$0xff] %vm3936_vm4, %v13272_v14 }
 0x1d0   : > { %9579 = vmatprep.mubr.msk.f32.mxu0 %vm311_vm1, %v2725_v55  ;;  %3978 = vst.msk [vmem:[#allocation3 + $0x140] sm:$0xff] %vm3936_vm4, %v13272_v14  ;;  %3979 = vst.msk [vmem:[#allocation3 + $0x148] sm:$0xff] %vm3936_vm4, %v13272_v14 }
 0x1d1   : > { %3980 = vst.msk [vmem:[#allocation3 + $0x150] sm:$0xff] %vm3936_vm4, %v13272_v14  ;;  %3982 = vst.msk [vmem:[#allocation3 + $0x160] sm:$0xff] %vm3936_vm4, %v13272_v14 }
 0x1d2   : > { %3983 = vst.msk [vmem:[#allocation3 + $0x168] sm:$0xff] %vm3936_vm4, %v13272_v14  ;;  %3984 = vst.msk [vmem:[#allocation3 + $0x170] sm:$0xff] %vm3936_vm4, %v13272_v14 }
 0x1d3   : > { %9580 = vmatmul.mubr.msk.f32.gmra.mrb[30].mxu0 %vm311_vm1, %v2726_v56  ;;  %3986 = vst.msk [vmem:[#allocation3 + $0x180] sm:$0xff] %vm3936_vm4, %v13272_v14  ;;  %3987 = vst.msk [vmem:[#allocation3 + $0x188] sm:$0xff] %vm3936_vm4, %v13272_v14 }
 0x1d4   : > { %9584 = vmatprep.mubr.msk.f32.mxu0 %vm311_vm1, %v10994_v28  ;;  %v13244_v28 = vld [vmem:[#allocation27_spill] sm:$0xff]  ;;  %3988 = vst.msk [vmem:[#allocation3 + $0x190] sm:$0xff] %vm3936_vm4, %v13272_v14  ;;  %3990 = vst.msk [vmem:[#allocation3 + $0x1a0] sm:$0xff] %vm3936_vm4, %v13272_v14 }
 0x1d5   : > { %3991 = vst.msk [vmem:[#allocation3 + $0x1a8] sm:$0xff] %vm3936_vm4, %v13272_v14  ;;  %3992 = vst.msk [vmem:[#allocation3 + $0x1b0] sm:$0xff] %vm3936_vm4, %v13272_v14 }
 0x1d6   : > { %3994 = vst.msk [vmem:[#allocation3 + $0x1c0] sm:$0xff] %vm3936_vm4, %v13272_v14  ;;  %3995 = vst.msk [vmem:[#allocation3 + $0x1c8] sm:$0xff] %vm3936_vm4, %v13272_v14 }
 0x1d7   : > { %9585 = vmatmul.mubr.msk.f32.vlgmr.msra.gmra.mrb[0].mxu0 %vm311_vm1, %v11005_v29  ;;  %v13245_v29 = vld [vmem:[#allocation29_spill] sm:$0xff]  ;;  %3996 = vst.msk [vmem:[#allocation3 + $0x1d0] sm:$0xff] %vm3936_vm4, %v13272_v14  ;;  %3998 = vst.msk [vmem:[#allocation3 + $0x1e0] sm:$0xff] %vm3936_vm4, %v13272_v14 }
 0x1d8   : > { %9633 = vmatpush3.msk.msra.mxu0 %vm581_vm0, %v8227_v43  ;;  %9587 = vmatprep.mubr.msk.f32.mxu0 %vm311_vm1, %v11007_v30  ;;  %v13246_v30 = vld [vmem:[#allocation31_spill] sm:$0xff]  ;;  %3999 = vst.msk [vmem:[#allocation3 + $0x1e8] sm:$0xff] %vm3936_vm4, %v13272_v14  ;;  %4000 = vst.msk [vmem:[#allocation3 + $0x1f0] sm:$0xff] %vm3936_vm4, %v13272_v14 }
 0x1d9   : > { %4002 = vst.msk [vmem:[#allocation3 + $0x200] sm:$0xff] %vm3936_vm4, %v13272_v14  ;;  %4003 = vst.msk [vmem:[#allocation3 + $0x208] sm:$0xff] %vm3936_vm4, %v13272_v14 }
 0x1da   : > { %4004 = vst.msk [vmem:[#allocation3 + $0x210] sm:$0xff] %vm3936_vm4, %v13272_v14  ;;  %4006 = vst.msk [vmem:[#allocation3 + $0x220] sm:$0xff] %vm3936_vm4, %v13272_v14 }
 0x1db   : > { %9588 = vmatmul.mubr.msk.f32.gmra.mrb[2].mxu0 %vm311_vm1, %v11013_v31  ;;  %v13247_v31 = vld [vmem:[#allocation33_spill] sm:$0xff]  ;;  %4007 = vst.msk [vmem:[#allocation3 + $0x228] sm:$0xff] %vm3936_vm4, %v13272_v14  ;;  %4008 = vst.msk [vmem:[#allocation3 + $0x230] sm:$0xff] %vm3936_vm4, %v13272_v14 }
 0x1dc   : > { %9590 = vmatprep.mubr.msk.f32.mxu0 %vm311_vm1, %v11015_v32  ;;  %v13249_v32 = vld [vmem:[#allocation36_spill] sm:$0xff]  ;;  %3941 = vst.msk [vmem:[#allocation3 + $0x18] sm:$0x1] %vm3940_vm5, %v13272_v14  ;;  %3945 = vst.msk [vmem:[#allocation3 + $0x38] sm:$0x1] %vm3940_vm5, %v13272_v14 }
 0x1dd   : > { %3949 = vst.msk [vmem:[#allocation3 + $0x58] sm:$0x1] %vm3940_vm5, %v13272_v14  ;;  %3953 = vst.msk [vmem:[#allocation3 + $0x78] sm:$0x1] %vm3940_vm5, %v13272_v14 }
 0x1de   : > { %3957 = vst.msk [vmem:[#allocation3 + $0x98] sm:$0x1] %vm3940_vm5, %v13272_v14  ;;  %3961 = vst.msk [vmem:[#allocation3 + $0xb8] sm:$0x1] %vm3940_vm5, %v13272_v14 }
 0x1df   : > { %9591 = vmatmul.mubr.msk.f32.gmra.mrb[4].mxu0 %vm311_vm1, %v11019_v33  ;;  %v13250_v33 = vld [vmem:[#allocation38_spill] sm:$0xff]  ;;  %3965 = vst.msk [vmem:[#allocation3 + $0xd8] sm:$0x1] %vm3940_vm5, %v13272_v14  ;;  %3969 = vst.msk [vmem:[#allocation3 + $0xf8] sm:$0x1] %vm3940_vm5, %v13272_v14 }
 0x1e0   : > { %9593 = vmatprep.mubr.msk.f32.mxu0 %vm311_vm1, %v11023_v34  ;;  %v3115_v34 = vld [vmem:[#allocation2 + $0x228] sm:$0xff]  ;;  %3973 = vst.msk [vmem:[#allocation3 + $0x118] sm:$0x1] %vm3940_vm5, %v13272_v14  ;;  %3977 = vst.msk [vmem:[#allocation3 + $0x138] sm:$0x1] %vm3940_vm5, %v13272_v14 }
 0x1e1   : > { %3981 = vst.msk [vmem:[#allocation3 + $0x158] sm:$0x1] %vm3940_vm5, %v13272_v14  ;;  %3985 = vst.msk [vmem:[#allocation3 + $0x178] sm:$0x1] %vm3940_vm5, %v13272_v14 }
 0x1e2   : > { %3989 = vst.msk [vmem:[#allocation3 + $0x198] sm:$0x1] %vm3940_vm5, %v13272_v14  ;;  %3993 = vst.msk [vmem:[#allocation3 + $0x1b8] sm:$0x1] %vm3940_vm5, %v13272_v14 }
 0x1e3   : > { %9594 = vmatmul.mubr.msk.f32.gmra.mrb[6].mxu0 %vm311_vm1, %v11047_v45  ;;  %v13251_v45 = vld [vmem:[#allocation39_spill] sm:$0xff]  ;;  %3997 = vst.msk [vmem:[#allocation3 + $0x1d8] sm:$0x1] %vm3940_vm5, %v13272_v14  ;;  %4001 = vst.msk [vmem:[#allocation3 + $0x1f8] sm:$0x1] %vm3940_vm5, %v13272_v14 }
 0x1e4   : > { %9596 = vmatprep.mubr.msk.f32.mxu0 %vm311_vm1, %v11051_v46  ;;  %v3116_v46 = vld [vmem:[#allocation2 + $0x230] sm:$0xff]  ;;  %4005 = vst.msk [vmem:[#allocation3 + $0x218] sm:$0x1] %vm3940_vm5, %v13272_v14  ;;  %4009 = vst.msk [vmem:[#allocation3 + $0x238] sm:$0x1] %vm3940_vm5, %v13272_v14 }
 0x1e7   : > { %9597 = vmatmul.mubr.msk.f32.gmra.mrb[8].mxu0 %vm311_vm1, %v11057_v47  ;;  %v13252_v47 = vld [vmem:[#allocation6_spill] sm:$0xff] }
 0x1e8   : > { %9599 = vmatprep.mubr.msk.f32.mxu0 %vm311_vm1, %v11059_v48  ;;  %v13253_v48 = vld [vmem:[#allocation7_spill] sm:$0xff] }
 0x1eb   : > { %9600 = vmatmul.mubr.msk.f32.gmra.mrb[10].mxu0 %vm311_vm1, %v11065_v49  ;;  %v13254_v49 = vld [vmem:[#allocation8_spill] sm:$0xff] }
 0x1ec   : > { %9602 = vmatprep.mubr.msk.f32.mxu0 %vm311_vm1, %v11265_v53 }
 0x1ef   : > { %9603 = vmatmul.mubr.msk.f32.gmra.mrb[12].mxu0 %vm311_vm1, %v11271_v18 }
 0x1f0   : > { %9605 = vmatprep.mubr.msk.f32.mxu0 %vm311_vm1, %v11281_v23  ;;  %v12009_v23 = vld [vmem:[%s13054_s2] ss:$0 sm:$0xff] }
 0x1f3   : > { %9606 = vmatmul.mubr.msk.f32.gmra.mrb[14].mxu0 %vm311_vm1, %v11287_v51 }
 0x1f4   : > { %9608 = vmatprep.mubr.msk.f32.mxu0 %vm311_vm1, %v11297_v17 }
 0x1f7   : > { %9609 = vmatmul.mubr.msk.f32.gmra.mrb[16].mxu0 %vm311_vm1, %v11303_v44 }
 0x1f8   : > { %9611 = vmatprep.mubr.msk.f32.mxu0 %vm311_vm1, %v11313_v1  ;;  %v13248_v1 = vld [vmem:[#allocation35_spill] sm:$0xff] }
 0x1fb   : > { %9612 = vmatmul.mubr.msk.f32.gmra.mrb[18].mxu0 %vm311_vm1, %v11319_v42 }
 0x1fc   : > { %9614 = vmatprep.mubr.msk.f32.mxu0 %vm311_vm1, %v11329_v22  ;;  %v12002_v22 = vld [vmem:[%s13055_s3 + $0x10] sm:$0x3f] }
 0x1fd   : > { %9782 = vmatprep.subr.msk.mxu1 %vm4206_vm3, %v12002_v22 }
 0x1ff   : > { %9615 = vmatmul.mubr.msk.f32.gmra.mrb[20].mxu0 %vm311_vm1, %v11335_v40 }
 0x200   : > { %9617 = vmatprep.mubr.msk.f32.mxu0 %vm311_vm1, %v13244_v28 }
 0x203   : > { %9618 = vmatmul.mubr.msk.f32.gmra.mrb[22].mxu0 %vm311_vm1, %v13245_v29 }
 0x204   : > { %9620 = vmatprep.mubr.msk.f32.mxu0 %vm311_vm1, %v13246_v30 }
 0x207   : > { %9621 = vmatmul.mubr.msk.f32.gmra.mrb[24].mxu0 %vm311_vm1, %v13247_v31 }
 0x208   : > { %9623 = vmatprep.mubr.msk.f32.mxu0 %vm311_vm1, %v13248_v1 }
 0x20b   : > { %9624 = vmatmul.mubr.msk.f32.gmra.mrb[26].mxu0 %vm311_vm1, %v13249_v32 }
 0x20c   : > { %9626 = vmatprep.mubr.msk.f32.mxu0 %vm311_vm1, %v13250_v33 }
 0x20f   : > { %9627 = vmatmul.mubr.msk.f32.gmra.mrb[28].mxu0 %vm311_vm1, %v13251_v45 }
 0x210   : > { %9629 = vmatprep.mubr.msk.f32.mxu0 %vm311_vm1, %v3115_v34 }
 0x213   : > { %9630 = vmatmul.mubr.msk.f32.gmra.mrb[30].mxu0 %vm311_vm1, %v3116_v46 }
 0x214   : > { %9634 = vmatprep.mubr.msk.f32.mxu0 %vm311_vm1, %v13252_v47 }
 0x217   : > { %9635 = vmatmul.mubr.msk.f32.vlgmr.msra.gmra.mrb[0].mxu0 %vm311_vm1, %v13253_v48 }
 0x218   : > { %9637 = vmatprep.mubr.msk.f32.mxu0 %vm311_vm1, %v13254_v49 }
 0x21b   : > { %9638 = vmatmul.mubr.msk.f32.gmra.mrb[2].mxu0 %vm311_vm1, %v13255_v58 }
 0x21c   : > { %9640 = vmatprep.mubr.msk.f32.mxu0 %vm311_vm1, %v13256_v59 }
 0x21f   : > { %9641 = vmatmul.mubr.msk.f32.gmra.mrb[4].mxu0 %vm311_vm1, %v13257_v60 }
 0x220   : > { %9643 = vmatprep.mubr.msk.f32.mxu0 %vm311_vm1, %v13258_v61 }
 0x223   : > { %9644 = vmatmul.mubr.msk.f32.gmra.mrb[6].mxu0 %vm311_vm1, %v13259_v62 }
 0x224   : > { %9646 = vmatprep.mubr.msk.f32.mxu0 %vm311_vm1, %v13260_v63 }
 0x227   : > { %9647 = vmatmul.mubr.msk.f32.gmra.mrb[8].mxu0 %vm311_vm1, %v13261_v0 }
 0x228   : > { %9649 = vmatprep.mubr.msk.f32.mxu0 %vm311_vm1, %v13262_v2 }
 0x22b   : > { %9650 = vmatmul.mubr.msk.f32.gmra.mrb[10].mxu0 %vm311_vm1, %v13263_v3 }
 0x22c   : > { %9652 = vmatprep.mubr.msk.f32.mxu0 %vm311_vm1, %v13264_v4 }
 0x22f   : > { %9653 = vmatmul.mubr.msk.f32.gmra.mrb[12].mxu0 %vm311_vm1, %v13265_v5 }
 0x230   : > { %9655 = vmatprep.mubr.msk.f32.mxu0 %vm311_vm1, %v13266_v6 }
 0x233   : > { %9656 = vmatmul.mubr.msk.f32.gmra.mrb[14].mxu0 %vm311_vm1, %v13267_v7 }
 0x234   : > { %9658 = vmatprep.mubr.msk.f32.mxu0 %vm311_vm1, %v13268_v8 }
 0x237   : > { %9659 = vmatmul.mubr.msk.f32.gmra.mrb[16].mxu0 %vm311_vm1, %v13236_v27 }
 0x238   : > { %9661 = vmatprep.mubr.msk.f32.mxu0 %vm311_vm1, %v13237_v35 }
 0x23b   : > { %9662 = vmatmul.mubr.msk.f32.gmra.mrb[18].mxu0 %vm311_vm1, %v13269_v9 }
 0x23c   : > { %9664 = vmatprep.mubr.msk.f32.mxu0 %vm311_vm1, %v13239_v38 }
 0x23f   : > { %9665 = vmatmul.mubr.msk.f32.gmra.mrb[20].mxu0 %vm311_vm1, %v13240_v36 }
 0x240   : > { %9667 = vmatprep.mubr.msk.f32.mxu0 %vm311_vm1, %v13270_v10 }
 0x243   : > { %9668 = vmatmul.mubr.msk.f32.gmra.mrb[22].mxu0 %vm311_vm1, %v13242_v24  ;;  %v11971_v24 = vpop.f32.mrb[2].mxu1 }
 0x244   : > { %9670 = vmatprep.mubr.msk.f32.mxu0 %vm311_vm1, %v13243_v50 }
 0x247   : > { %9671 = vmatmul.mubr.msk.f32.gmra.mrb[24].mxu0 %vm311_vm1, %v11381_v37  ;;  %v11973_v37 = vpop.f32.mrb[3].mxu1 }
 0x248   : > { %9673 = vmatprep.mubr.msk.f32.mxu0 %vm311_vm1, %v13271_v11  ;;  %v11975_v38 = vpop.f32.mrb[4].mxu1 }
 0x24b   : > { %9674 = vmatmul.mubr.msk.f32.gmra.mrb[26].mxu0 %vm311_vm1, %v11395_v39  ;;  %v11977_v39 = vpop.f32.mrb[5].mxu1 }
 0x24c   : > { %9676 = vmatprep.mubr.msk.f32.mxu0 %vm311_vm1, %v11609_v26  ;;  %v11979_v40 = vpop.f32.mrb[6].mxu1 }
 0x24d   : > { %v11981_v41 = vpop.f32.mrb[7].mxu1 }
 0x24e   : > { %v11983_v42 = vpop.f32.mrb[8].mxu1 }
 0x24f   : > { %9677 = vmatmul.mubr.msk.f32.gmra.mrb[28].mxu0 %vm311_vm1, %v11615_v25  ;;  %v11985_v43 = vpop.f32.mrb[9].mxu1 }
 0x250   : > { %9679 = vmatprep.mubr.msk.f32.mxu0 %vm311_vm1, %v3505_v12  ;;  %v11987_v44 = vpop.f32.mrb[10].mxu1 }
 0x251   : > { %v11989_v50 = vpop.f32.mrb[11].mxu1 }
 0x252   : > { %v11991_v51 = vpop.f32.mrb[12].mxu1 }
 0x253   : > { %9680 = vmatmul.mubr.msk.f32.gmra.mrb[30].mxu0 %vm311_vm1, %v3506_v13  ;;  %v11993_v53 = vpop.f32.mrb[13].mxu1 }
 0x254   : > { %v11995_v17 = vpop.f32.mrb[14].mxu1 }
 0x255   : > { %v11997_v18 = vpop.f32.mrb[15].mxu1 }
 0x2ea   : > { %v9636_v52 = vpop.f32.mrb[0].mxu0 }
 0x2eb   : > { %v3873_v54 = vadd.f32 %v9636_v52, %v12009_v23  ;;  %v3674_v27 = vpop.f32.mrb[1].mxu0 }
 0x2ec   : > { %v3872_v35 = vadd.f32 %v12009_v23, %v3674_v27 }
 0x2ed   : > { %v3905_v26 = vmax.f32 %v3873_v54, 0.0 }
 0x2ee   : > { %v3904_v36 = vmax.f32 %v3872_v35, 0.0  ;;  %v9639_v25 = vpop.f32.mrb[2].mxu0 }
 0x2ef   : > { %4012 = vst.msk [vmem:[#allocation3 + $0x30] sm:$0xff] %vm3936_vm4, %v3905_v26  ;;  %v3875_v55 = vadd.f32 %v9639_v25, %v12009_v23  ;;  %v3684_v56 = vpop.f32.mrb[3].mxu0 }
 0x2f0   : > { %4011 = vst.msk [vmem:[#allocation3 + $0x28] sm:$0xff] %vm3936_vm4, %v3904_v36  ;;  %v3874_v57 = vadd.f32 %v12009_v23, %v3684_v56 }
 0x2f1   : > { %v3907_v28 = vmax.f32 %v3875_v55, 0.0 }
 0x2f2   : > { %v3906_v29 = vmax.f32 %v3874_v57, 0.0  ;;  %v9642_v30 = vpop.f32.mrb[4].mxu0 }
 0x2f3   : > { %4014 = vst.msk [vmem:[#allocation3 + $0x50] sm:$0xff] %vm3936_vm4, %v3907_v28  ;;  %v3877_v31 = vadd.f32 %v9642_v30, %v12009_v23  ;;  %v3694_v1 = vpop.f32.mrb[5].mxu0 }
 0x2f4   : > { %4013 = vst.msk [vmem:[#allocation3 + $0x48] sm:$0xff] %vm3936_vm4, %v3906_v29  ;;  %v3876_v32 = vadd.f32 %v12009_v23, %v3694_v1 }
 0x2f5   : > { %v3909_v33 = vmax.f32 %v3877_v31, 0.0 }
 0x2f6   : > { %v3908_v34 = vmax.f32 %v3876_v32, 0.0  ;;  %v9645_v45 = vpop.f32.mrb[6].mxu0  ;;  %v12029_v58 = vld [vmem:[#allocation3 + $0x30] sm:$0xff] }
 0x2f7   : > { %4016 = vst.msk [vmem:[#allocation3 + $0x70] sm:$0xff] %vm3936_vm4, %v3909_v33  ;;  %v3879_v46 = vadd.f32 %v9645_v45, %v12009_v23  ;;  %v3704_v47 = vpop.f32.mrb[7].mxu0  ;;  %v12023_v48 = vld [vmem:[#allocation3 + $0x28] sm:$0xff] }
 0x2f8   : > { %4015 = vst.msk [vmem:[#allocation3 + $0x68] sm:$0xff] %vm3936_vm4, %v3908_v34  ;;  %v3878_v49 = vadd.f32 %v12009_v23, %v3704_v47  ;;  %9687 = vmatprep.mubr.msk.f32.mxu1 %vm3936_vm4, %v12023_v48 }
 0x2f9   : > { %v3911_v59 = vmax.f32 %v3879_v46, 0.0  ;;  %9688 = vmatmul.mubr.msk.f32.gmra.mrb[18].mxu1 %vm3936_vm4, %v12029_v58 }
 0x2fa   : > { %v3910_v60 = vmax.f32 %v3878_v49, 0.0  ;;  %v9648_v61 = vpop.f32.mrb[8].mxu0  ;;  %v12041_v3 = vld [vmem:[#allocation3 + $0x50] sm:$0xff] }
 0x2fb   : > { %4018 = vst.msk [vmem:[#allocation3 + $0x90] sm:$0xff] %vm3936_vm4, %v3911_v59  ;;  %v3881_v62 = vadd.f32 %v9648_v61, %v12009_v23  ;;  %v3714_v63 = vpop.f32.mrb[9].mxu0  ;;  %v12035_v0 = vld [vmem:[#allocation3 + $0x48] sm:$0xff] }
 0x2fc   : > { %4017 = vst.msk [vmem:[#allocation3 + $0x88] sm:$0xff] %vm3936_vm4, %v3910_v60  ;;  %v3880_v2 = vadd.f32 %v12009_v23, %v3714_v63  ;;  %9690 = vmatprep.mubr.msk.f32.mxu1 %vm3936_vm4, %v12035_v0 }
 0x2fd   : > { %v3913_v4 = vmax.f32 %v3881_v62, 0.0  ;;  %9691 = vmatmul.mubr.msk.f32.gmra.mrb[20].mxu1 %vm3936_vm4, %v12041_v3 }
 0x2fe   : > { %v3912_v5 = vmax.f32 %v3880_v2, 0.0  ;;  %v9651_v6 = vpop.f32.mrb[10].mxu0  ;;  %v12053_v11 = vld [vmem:[#allocation3 + $0x70] sm:$0xff] }
 0x2ff   : > { %4020 = vst.msk [vmem:[#allocation3 + $0xb0] sm:$0xff] %vm3936_vm4, %v3913_v4  ;;  %v3883_v7 = vadd.f32 %v9651_v6, %v12009_v23  ;;  %v3724_v8 = vpop.f32.mrb[11].mxu0  ;;  %v12047_v9 = vld [vmem:[#allocation3 + $0x68] sm:$0xff] }
 0x300   : > { %4019 = vst.msk [vmem:[#allocation3 + $0xa8] sm:$0xff] %vm3936_vm4, %v3912_v5  ;;  %v3882_v10 = vadd.f32 %v12009_v23, %v3724_v8  ;;  %9693 = vmatprep.mubr.msk.f32.mxu1 %vm3936_vm4, %v12047_v9 }
 0x301   : > { %v3915_v12 = vmax.f32 %v3883_v7, 0.0  ;;  %9694 = vmatmul.mubr.msk.f32.gmra.mrb[22].mxu1 %vm3936_vm4, %v12053_v11 }
 0x302   : > { %v3914_v13 = vmax.f32 %v3882_v10, 0.0  ;;  %v9654_v14 = vpop.f32.mrb[12].mxu0  ;;  %v12065_v54 = vld [vmem:[#allocation3 + $0x90] sm:$0xff] }
 0x303   : > { %4022 = vst.msk [vmem:[#allocation3 + $0xd0] sm:$0xff] %vm3936_vm4, %v3915_v12  ;;  %v3885_v15 = vadd.f32 %v9654_v14, %v12009_v23  ;;  %v3734_v16 = vpop.f32.mrb[13].mxu0  ;;  %v12059_v19 = vld [vmem:[#allocation3 + $0x88] sm:$0xff] }
 0x304   : > { %4021 = vst.msk [vmem:[#allocation3 + $0xc8] sm:$0xff] %vm3936_vm4, %v3914_v13  ;;  %v3884_v52 = vadd.f32 %v12009_v23, %v3734_v16  ;;  %9696 = vmatprep.mubr.msk.f32.mxu1 %vm3936_vm4, %v12059_v19 }
 0x305   : > { %v3917_v27 = vmax.f32 %v3885_v15, 0.0  ;;  %9697 = vmatmul.mubr.msk.f32.gmra.mrb[24].mxu1 %vm3936_vm4, %v12065_v54 }
 0x306   : > { %v3916_v35 = vmax.f32 %v3884_v52, 0.0  ;;  %v9657_v26 = vpop.f32.mrb[14].mxu0  ;;  %v12077_v57 = vld [vmem:[#allocation3 + $0xb0] sm:$0xff] }
 0x307   : > { %4024 = vst.msk [vmem:[#allocation3 + $0xf0] sm:$0xff] %vm3936_vm4, %v3917_v27  ;;  %v3887_v36 = vadd.f32 %v9657_v26, %v12009_v23  ;;  %v3744_v25 = vpop.f32.mrb[15].mxu0  ;;  %v12071_v55 = vld [vmem:[#allocation3 + $0xa8] sm:$0xff] }
 0x308   : > { %4023 = vst.msk [vmem:[#allocation3 + $0xe8] sm:$0xff] %vm3936_vm4, %v3916_v35  ;;  %v3886_v56 = vadd.f32 %v12009_v23, %v3744_v25  ;;  %9699 = vmatprep.mubr.msk.f32.mxu1 %vm3936_vm4, %v12071_v55 }
 0x309   : > { %v3919_v28 = vmax.f32 %v3887_v36, 0.0  ;;  %9700 = vmatmul.mubr.msk.f32.gmra.mrb[26].mxu1 %vm3936_vm4, %v12077_v57 }
 0x30a   : > { %v3918_v29 = vmax.f32 %v3886_v56, 0.0  ;;  %v9660_v30 = vpop.f32.mrb[16].mxu0  ;;  %v12089_v34 = vld [vmem:[#allocation3 + $0xd0] sm:$0xff] }
 0x30b   : > { %4026 = vst.msk [vmem:[#allocation3 + $0x110] sm:$0xff] %vm3936_vm4, %v3919_v28  ;;  %v10184_v31 = vadd.f32 %v9660_v30, %v11967_v20  ;;  %v3754_v1 = vpop.f32.mrb[17].mxu0  ;;  %v12083_v32 = vld [vmem:[#allocation3 + $0xc8] sm:$0xff] }
 0x30c   : > { %4025 = vst.msk [vmem:[#allocation3 + $0x108] sm:$0xff] %vm3936_vm4, %v3918_v29  ;;  %v10185_v33 = vadd.f32 %v3754_v1, %v11969_v21  ;;  %9702 = vmatprep.mubr.msk.f32.mxu1 %vm3936_vm4, %v12083_v32 }
 0x30d   : > { %v3889_v45 = vadd.f32 %v10184_v31, %v12009_v23  ;;  %9703 = vmatmul.mubr.msk.f32.gmra.mrb[28].mxu1 %vm3936_vm4, %v12089_v34 }
 0x30e   : > { %v3888_v46 = vadd.f32 %v10185_v33, %v12009_v23  ;;  %v9663_v20 = vpop.f32.mrb[18].mxu0  ;;  %v12101_v62 = vld [vmem:[#allocation3 + $0xf0] sm:$0xff] }
 0x30f   : > { %v3921_v47 = vmax.f32 %v3889_v45, 0.0  ;;  %v10186_v49 = vadd.f32 %v9663_v20, %v11971_v24  ;;  %v3764_v59 = vpop.f32.mrb[19].mxu0  ;;  %v12096_v60 = vld [vmem:[#allocation3 + $0xe8] sm:$0xff] }
 0x310   : > { %v3920_v21 = vmax.f32 %v3888_v46, 0.0  ;;  %v10187_v61 = vadd.f32 %v3764_v59, %v11973_v37  ;;  %9705 = vmatprep.mubr.msk.f32.mxu1 %vm3936_vm4, %v12096_v60 }
 0x311   : > { %4028 = vst.msk [vmem:[#allocation3 + $0x130] sm:$0xff] %vm3936_vm4, %v3921_v47  ;;  %v3891_v63 = vadd.f32 %v10186_v49, %v12009_v23  ;;  %9706 = vmatmul.mubr.msk.f32.gmra.mrb[30].mxu1 %vm3936_vm4, %v12101_v62 }
 0x312   : > { %4027 = vst.msk [vmem:[#allocation3 + $0x128] sm:$0xff] %vm3936_vm4, %v3920_v21  ;;  %v3890_v24 = vadd.f32 %v10187_v61, %v12009_v23  ;;  %v9666_v2 = vpop.f32.mrb[20].mxu0  ;;  %v12115_v10 = vld [vmem:[#allocation3 + $0x110] sm:$0xff] }
 0x313   : > { %v3923_v4 = vmax.f32 %v3891_v63, 0.0  ;;  %v10188_v37 = vadd.f32 %v9666_v2, %v11975_v38  ;;  %v3774_v5 = vpop.f32.mrb[21].mxu0  ;;  %v12110_v6 = vld [vmem:[#allocation3 + $0x108] sm:$0xff] }
 0x314   : > { %v3922_v7 = vmax.f32 %v3890_v24, 0.0  ;;  %v10189_v8 = vadd.f32 %v3774_v5, %v11977_v39  ;;  %9708 = vmatprep.mubr.msk.f32.mxu1 %vm3936_vm4, %v12110_v6 }
 0x315   : > { %4030 = vst.msk [vmem:[#allocation3 + $0x150] sm:$0xff] %vm3936_vm4, %v3923_v4  ;;  %v3893_v12 = vadd.f32 %v10188_v37, %v12009_v23  ;;  %9709 = vmatmul.mubr.msk.f32.gmra.mrb[32].mxu1 %vm3936_vm4, %v12115_v10 }
 0x316   : > { %4029 = vst.msk [vmem:[#allocation3 + $0x148] sm:$0xff] %vm3936_vm4, %v3922_v7  ;;  %v3892_v38 = vadd.f32 %v10189_v8, %v12009_v23  ;;  %v9669_v13 = vpop.f32.mrb[22].mxu0 }
 0x317   : > { %v3925_v14 = vmax.f32 %v3893_v12, 0.0  ;;  %v10190_v39 = vadd.f32 %v9669_v13, %v11979_v40  ;;  %v3784_v15 = vpop.f32.mrb[23].mxu0 }
 0x318   : > { %v3924_v16 = vmax.f32 %v3892_v38, 0.0  ;;  %v10191_v52 = vadd.f32 %v3784_v15, %v11981_v41  ;;  %v12133_v25 = vld [vmem:[#allocation3 + $0x130] sm:$0xff] }
 0x319   : > { %4032 = vst.msk [vmem:[#allocation3 + $0x170] sm:$0xff] %vm3936_vm4, %v3925_v14  ;;  %v3895_v27 = vadd.f32 %v10190_v39, %v12009_v23  ;;  %v12127_v35 = vld [vmem:[#allocation3 + $0x128] sm:$0xff] }
 0x31a   : > { %4031 = vst.msk [vmem:[#allocation3 + $0x168] sm:$0xff] %vm3936_vm4, %v3924_v16  ;;  %v3894_v26 = vadd.f32 %v10191_v52, %v12009_v23  ;;  %v9672_v36 = vpop.f32.mrb[24].mxu0  ;;  %9711 = vmatprep.mubr.msk.f32.mxu1 %vm3936_vm4, %v12127_v35 }
 0x31b   : > { %v3927_v40 = vmax.f32 %v3895_v27, 0.0  ;;  %v10192_v56 = vadd.f32 %v9672_v36, %v11983_v42  ;;  %v3794_v41 = vpop.f32.mrb[25].mxu0  ;;  %9712 = vmatmul.mubr.msk.f32.gmra.mrb[34].mxu1 %vm3936_vm4, %v12133_v25  ;;  %v4043_v36 = vld [vmem:[#allocation3 + $0x7] sm:$0xff] }
 0x31c   : > { %v3926_v28 = vmax.f32 %v3894_v26, 0.0  ;;  %v10193_v29 = vadd.f32 %v3794_v41, %v11985_v43  ;;  %v12147_v42 = vld [vmem:[#allocation3 + $0x150] sm:$0xff]  ;;  %v12215_v41 = vld [vmem:[%s13055_s3 + $0x18] sm:$0x3f] }
 0x31d   : > { %4034 = vst.msk [vmem:[#allocation3 + $0x190] sm:$0xff] %vm3936_vm4, %v3927_v40  ;;  %v3897_v30 = vadd.f32 %v10192_v56, %v12009_v23  ;;  %v12141_v31 = vld [vmem:[#allocation3 + $0x148] sm:$0xff] }
 0x31e   : > { %4033 = vst.msk [vmem:[#allocation3 + $0x188] sm:$0xff] %vm3936_vm4, %v3926_v28  ;;  %v3896_v1 = vadd.f32 %v10193_v29, %v12009_v23  ;;  %v9675_v33 = vpop.f32.mrb[26].mxu0  ;;  %9714 = vmatprep.mubr.msk.f32.mxu1 %vm3936_vm4, %v12141_v31  ;;  %v4044_v56 = vld [vmem:[#allocation3 + $0xf] sm:$0xff]  ;;  %v12218_v28 = vld [vmem:[#allocation3 + $0x27] sm:$0xff] }
 0x31f   : > { %v3929_v45 = vmax.f32 %v3897_v30, 0.0  ;;  %v10194_v46 = vadd.f32 %v9675_v33, %v11987_v44  ;;  %v3804_v43 = vpop.f32.mrb[27].mxu0  ;;  %9715 = vmatmul.mubr.msk.f32.gmra.mrb[36].mxu1 %vm3936_vm4, %v12147_v42  ;;  %v12226_v29 = vld [vmem:[#allocation3 + $0x2f] sm:$0xff]  ;;  %v12230_v30 = vld [vmem:[#allocation3 + $0x47] sm:$0xff] }
 0x320   : > { %v3928_v20 = vmax.f32 %v3896_v1, 0.0  ;;  %v10195_v47 = vadd.f32 %v3804_v43, %v11989_v50  ;;  %v12161_v44 = vld [vmem:[#allocation3 + $0x170] sm:$0xff]  ;;  %v12254_v43 = vld [vmem:[#allocation3 + $0xa7] sm:$0xff] }
 0x321   : > { %4036 = vst.msk [vmem:[#allocation3 + $0x1b0] sm:$0xff] %vm3936_vm4, %v3929_v45  ;;  %v3899_v49 = vadd.f32 %v10194_v46, %v12009_v23  ;;  %v12155_v59 = vld [vmem:[#allocation3 + $0x168] sm:$0xff] }
 0x322   : > { %4035 = vst.msk [vmem:[#allocation3 + $0x1a8] sm:$0xff] %vm3936_vm4, %v3928_v20  ;;  %v3898_v21 = vadd.f32 %v10195_v47, %v12009_v23  ;;  %v9678_v61 = vpop.f32.mrb[28].mxu0  ;;  %9717 = vmatprep.mubr.msk.f32.mxu1 %vm3936_vm4, %v12155_v59  ;;  %v12234_v1 = vld [vmem:[#allocation3 + $0x4f] sm:$0xff]  ;;  %v12246_v45 = vld [vmem:[#allocation3 + $0x87] sm:$0xff] }
 0x323   : > { %v3931_v63 = vmax.f32 %v3899_v49, 0.0  ;;  %v10196_v24 = vadd.f32 %v9678_v61, %v11991_v51  ;;  %v3814_v50 = vpop.f32.mrb[29].mxu0  ;;  %9718 = vmatmul.mubr.msk.f32.gmra.mrb[38].mxu1 %vm3936_vm4, %v12161_v44  ;;  %v12242_v33 = vld [vmem:[#allocation3 + $0x6f] sm:$0xff]  ;;  %v12262_v47 = vld [vmem:[#allocation3 + $0xc7] sm:$0xff] }
 0x324   : > { %v3930_v2 = vmax.f32 %v3898_v21, 0.0  ;;  %v10197_v4 = vadd.f32 %v3814_v50, %v11993_v53  ;;  %v12175_v51 = vld [vmem:[#allocation3 + $0x190] sm:$0xff]  ;;  %v12270_v21 = vld [vmem:[#allocation3 + $0xe7] sm:$0xff] }
 0x325   : > { %4038 = vst.msk [vmem:[#allocation3 + $0x1d0] sm:$0xff] %vm3936_vm4, %v3931_v63  ;;  %v3901_v37 = vadd.f32 %v10196_v24, %v12009_v23  ;;  %v12169_v5 = vld [vmem:[#allocation3 + $0x188] sm:$0xff] }
 0x326   : > { %4037 = vst.msk [vmem:[#allocation3 + $0x1c8] sm:$0xff] %vm3936_vm4, %v3930_v2  ;;  %v3900_v7 = vadd.f32 %v10197_v4, %v12009_v23  ;;  %v9681_v8 = vpop.f32.mrb[30].mxu0  ;;  %9720 = vmatprep.mubr.msk.f32.mxu1 %vm3936_vm4, %v12169_v5  ;;  %v12250_v46 = vld [vmem:[#allocation3 + $0x8f] sm:$0xff]  ;;  %v12278_v63 = vld [vmem:[#allocation3 + $0x107] sm:$0xff] }
 0x327   : > { %v3933_v12 = vmax.f32 %v3901_v37, 0.0  ;;  %v10198_v38 = vadd.f32 %v9681_v8, %v11995_v17  ;;  %v3824_v53 = vpop.f32.mrb[31].mxu0  ;;  %9721 = vmatmul.mubr.msk.f32.gmra.mrb[40].mxu1 %vm3936_vm4, %v12175_v51  ;;  %v12258_v20 = vld [vmem:[#allocation3 + $0xaf] sm:$0xff]  ;;  %v12286_v50 = vld [vmem:[#allocation3 + $0x127] sm:$0xff] }
 0x328   : > { %v3932_v13 = vmax.f32 %v3900_v7, 0.0  ;;  %v10199_v14 = vadd.f32 %v3824_v53, %v11997_v18  ;;  %v12189_v17 = vld [vmem:[#allocation3 + $0x1b0] sm:$0xff]  ;;  %v12294_v4 = vld [vmem:[#allocation3 + $0x147] sm:$0xff] }
 0x329   : > { %4040 = vst.msk [vmem:[#allocation3 + $0x1f0] sm:$0xff] %vm3936_vm4, %v3933_v12  ;;  %v3903_v39 = vadd.f32 %v10198_v38, %v12009_v23  ;;  %v12183_v15 = vld [vmem:[#allocation3 + $0x1a8] sm:$0xff] }
 0x32a   : > { %4039 = vst.msk [vmem:[#allocation3 + $0x1e8] sm:$0xff] %vm3936_vm4, %v3932_v13  ;;  %v3902_v16 = vadd.f32 %v10199_v14, %v12009_v23  ;;  %9723 = vmatprep.mubr.msk.f32.mxu1 %vm3936_vm4, %v12183_v15  ;;  %v12266_v49 = vld [vmem:[#allocation3 + $0xcf] sm:$0xff]  ;;  %v12302_v7 = vld [vmem:[#allocation3 + $0x167] sm:$0xff] }
 0x32b   : > { %v3935_v52 = vmax.f32 %v3903_v39, 0.0  ;;  %9724 = vmatmul.mubr.msk.f32.gmra.mrb[42].mxu1 %vm3936_vm4, %v12189_v17  ;;  %v12274_v61 = vld [vmem:[#allocation3 + $0xef] sm:$0xff]  ;;  %v12310_v12 = vld [vmem:[#allocation3 + $0x187] sm:$0xff] }
 0x32c   : > { %v3934_v18 = vmax.f32 %v3902_v16, 0.0  ;;  %v12199_v23 = vld [vmem:[#allocation3 + $0x1d0] sm:$0xff]  ;;  %v12318_v53 = vld [vmem:[#allocation3 + $0x1a7] sm:$0xff] }
 0x32d   : > { %4042 = vst.msk [vmem:[#allocation3 + $0x210] sm:$0xff] %vm3936_vm4, %v3935_v52  ;;  %v12194_v27 = vld [vmem:[#allocation3 + $0x1c8] sm:$0xff] }
 0x32e   : > { %4041 = vst.msk [vmem:[#allocation3 + $0x208] sm:$0xff] %vm3936_vm4, %v3934_v18  ;;  %9726 = vmatprep.mubr.msk.f32.mxu1 %vm3936_vm4, %v12194_v27  ;;  %v12282_v24 = vld [vmem:[#allocation3 + $0x10f] sm:$0xff]  ;;  %v12326_v14 = vld [vmem:[#allocation3 + $0x1c7] sm:$0xff] }
 0x32f   : > { %9727 = vmatmul.mubr.msk.f32.gmra.mrb[44].mxu1 %vm3936_vm4, %v12199_v23  ;;  %v12290_v2 = vld [vmem:[#allocation3 + $0x12f] sm:$0xff] }
 0x330   : > { %v12207_v40 = vld [vmem:[#allocation3 + $0x1f0] sm:$0xff] }
 0x331   : > { %v12203_v26 = vld [vmem:[#allocation3 + $0x1e8] sm:$0xff]  ;;  %13274 = vst [vmem:[#allocation5_spill] sm:$0xff] %v12207_v40 }
 0x332   : > { %13273 = vst [vmem:[#allocation4_spill] sm:$0xff] %v12203_v26  ;;  %9729 = vmatprep.mubr.msk.f32.mxu1 %vm3936_vm4, %v12203_v26  ;;  %v12298_v37 = vld [vmem:[#allocation3 + $0x14f] sm:$0xff]  ;;  %v12334_v16 = vld [vmem:[#allocation3 + $0x1e7] sm:$0xff] }
 0x333   : > { %9730 = vmatmul.mubr.msk.f32.gmra.mrb[46].mxu1 %vm3936_vm4, %v12207_v40  ;;  %v12306_v8 = vld [vmem:[#allocation3 + $0x16f] sm:$0xff] }
 0x334   : > { %9734 = vmatprep.mubr.msk.f32.mxu1 %vm3936_vm4, %v4043_v36  ;;  %v12314_v38 = vld [vmem:[#allocation3 + $0x18f] sm:$0xff] }
 0x335   : > { %v12322_v13 = vld [vmem:[#allocation3 + $0x1af] sm:$0xff] }
 0x336   : > { %v12330_v39 = vld [vmem:[#allocation3 + $0x1cf] sm:$0xff] }
 0x337   : > { %9735 = vmatmul.mubr.msk.f32.vlgmr.msra.gmra.mrb[16].mxu1 %vm3936_vm4, %v4044_v56  ;;  %v4759_v52 = vld [vmem:[#allocation3 + $0x9] sm:$0xff]  ;;  %v4760_v36 = vld [vmem:[#allocation3 + $0x11] sm:$0xff]  ;;  %v12346_v56 = vld [vmem:[%s13055_s3 + $0x20] sm:$0x3f] }
 0x338   : > { %9783 = vmatpush3.msk.msra.mxu1 %vm4206_vm3, %v12002_v22  ;;  %9737 = vmatprep.mubr.msk.f32.mxu1 %vm3936_vm4, %v12218_v28  ;;  %v12238_v22 = vld [vmem:[#allocation3 + $0x67] sm:$0xff]  ;;  %v12338_v18 = vld [vmem:[#allocation3 + $0x1ef] sm:$0xff] }
 0x339   : > { %9832 = vmatprep.subr.msk.mxu1 %vm4206_vm3, %v12215_v41  ;;  %v12349_v40 = vld [vmem:[#allocation3 + $0x29] sm:$0xff] }
 0x33a   : > { %13275 = vst [vmem:[#allocation23_spill] sm:$0xff] %v12349_v40  ;;  %v12361_v26 = vld [vmem:[#allocation3 + $0x49] sm:$0xff] }
 0x33b   : > { %9738 = vmatmul.mubr.msk.f32.gmra.mrb[18].mxu1 %vm3936_vm4, %v12226_v29  ;;  %13277 = vst [vmem:[#allocation26_spill] sm:$0xff] %v12361_v26 }
 0x33c   : > { %9740 = vmatprep.mubr.msk.f32.mxu1 %vm3936_vm4, %v12230_v30 }
 0x33f   : > { %9741 = vmatmul.mubr.msk.f32.gmra.mrb[20].mxu1 %vm3936_vm4, %v12234_v1 }
 0x340   : > { %9743 = vmatprep.mubr.msk.f32.mxu1 %vm3936_vm4, %v12238_v22 }
 0x343   : > { %9744 = vmatmul.mubr.msk.f32.gmra.mrb[22].mxu1 %vm3936_vm4, %v12242_v33 }
 0x344   : > { %9746 = vmatprep.mubr.msk.f32.mxu1 %vm3936_vm4, %v12246_v45 }
 0x347   : > { %9747 = vmatmul.mubr.msk.f32.gmra.mrb[24].mxu1 %vm3936_vm4, %v12250_v46 }
 0x348   : > { %9749 = vmatprep.mubr.msk.f32.mxu1 %vm3936_vm4, %v12254_v43 }
 0x34b   : > { %9750 = vmatmul.mubr.msk.f32.gmra.mrb[26].mxu1 %vm3936_vm4, %v12258_v20 }
 0x34c   : > { %9752 = vmatprep.mubr.msk.f32.mxu1 %vm3936_vm4, %v12262_v47 }
 0x34f   : > { %9753 = vmatmul.mubr.msk.f32.gmra.mrb[28].mxu1 %vm3936_vm4, %v12266_v49 }
 0x350   : > { %9755 = vmatprep.mubr.msk.f32.mxu1 %vm3936_vm4, %v12270_v21 }
 0x353   : > { %9756 = vmatmul.mubr.msk.f32.gmra.mrb[30].mxu1 %vm3936_vm4, %v12274_v61 }
 0x354   : > { %9758 = vmatprep.mubr.msk.f32.mxu1 %vm3936_vm4, %v12278_v63 }
 0x357   : > { %9759 = vmatmul.mubr.msk.f32.gmra.mrb[32].mxu1 %vm3936_vm4, %v12282_v24 }
 0x358   : > { %9761 = vmatprep.mubr.msk.f32.mxu1 %vm3936_vm4, %v12286_v50 }
 0x35b   : > { %9762 = vmatmul.mubr.msk.f32.gmra.mrb[34].mxu1 %vm3936_vm4, %v12290_v2 }
 0x35c   : > { %9764 = vmatprep.mubr.msk.f32.mxu1 %vm3936_vm4, %v12294_v4 }
 0x35f   : > { %9765 = vmatmul.mubr.msk.f32.gmra.mrb[36].mxu1 %vm3936_vm4, %v12298_v37 }
 0x360   : > { %9767 = vmatprep.mubr.msk.f32.mxu1 %vm3936_vm4, %v12302_v7 }
 0x363   : > { %9768 = vmatmul.mubr.msk.f32.gmra.mrb[38].mxu1 %vm3936_vm4, %v12306_v8 }
 0x364   : > { %9770 = vmatprep.mubr.msk.f32.mxu1 %vm3936_vm4, %v12310_v12 }
 0x367   : > { %9771 = vmatmul.mubr.msk.f32.gmra.mrb[40].mxu1 %vm3936_vm4, %v12314_v38 }
 0x368   : > { %9773 = vmatprep.mubr.msk.f32.mxu1 %vm3936_vm4, %v12318_v53 }
 0x36b   : > { %9774 = vmatmul.mubr.msk.f32.gmra.mrb[42].mxu1 %vm3936_vm4, %v12322_v13 }
 0x36c   : > { %9776 = vmatprep.mubr.msk.f32.mxu1 %vm3936_vm4, %v12326_v14 }
 0x36f   : > { %9777 = vmatmul.mubr.msk.f32.gmra.mrb[44].mxu1 %vm3936_vm4, %v12330_v39 }
 0x370   : > { %9779 = vmatprep.mubr.msk.f32.mxu1 %vm3936_vm4, %v12334_v16 }
 0x373   : > { %9780 = vmatmul.mubr.msk.f32.gmra.mrb[46].mxu1 %vm3936_vm4, %v12338_v18 }
 0x374   : > { %9784 = vmatprep.mubr.msk.f32.mxu1 %vm3936_vm4, %v4759_v52  ;;  %v12357_v52 = vld [vmem:[#allocation3 + $0x31] sm:$0xff] }
 0x375   : > { %13276 = vst [vmem:[#allocation24_spill] sm:$0xff] %v12357_v52 }
 0x377   : > { %9785 = vmatmul.mubr.msk.f32.vlgmr.msra.gmra.mrb[16].mxu1 %vm3936_vm4, %v4760_v36  ;;  %v12365_v36 = vld [vmem:[#allocation3 + $0x51] sm:$0xff] }
 0x378   : > { %9833 = vmatpush3.msk.msra.mxu1 %vm4206_vm3, %v12215_v41  ;;  %9787 = vmatprep.mubr.msk.f32.mxu1 %vm3936_vm4, %v12349_v40  ;;  %13278 = vst [vmem:[#allocation28_spill] sm:$0xff] %v12365_v36  ;;  %v12369_v41 = vld [vmem:[#allocation3 + $0x69] sm:$0xff]  ;;  %v12373_v40 = vld [vmem:[#allocation3 + $0x71] sm:$0xff] }
 0x379   : > { %9882 = vmatprep.subr.msk.mxu1 %vm4206_vm3, %v12346_v56  ;;  %13279 = vst [vmem:[#allocation32_spill] sm:$0xff] %v12369_v41  ;;  %13280 = vst [vmem:[#allocation34_spill] sm:$0xff] %v12373_v40 }
 0x37b   : > { %9788 = vmatmul.mubr.msk.f32.gmra.mrb[18].mxu1 %vm3936_vm4, %v12357_v52  ;;  %v12377_v52 = vld [vmem:[#allocation3 + $0x89] sm:$0xff] }
 0x37c   : > { %9790 = vmatprep.mubr.msk.f32.mxu1 %vm3936_vm4, %v12361_v26  ;;  %13281 = vst [vmem:[#allocation27_spill] sm:$0xff] %v12377_v52  ;;  %v12381_v26 = vld [vmem:[#allocation3 + $0x91] sm:$0xff] }
 0x37d   : > { %13282 = vst [vmem:[#allocation29_spill] sm:$0xff] %v12381_v26 }
 0x37f   : > { %9791 = vmatmul.mubr.msk.f32.gmra.mrb[20].mxu1 %vm3936_vm4, %v12365_v36  ;;  %v12385_v36 = vld [vmem:[#allocation3 + $0xa9] sm:$0xff] }
 0x380   : > { %9793 = vmatprep.mubr.msk.f32.mxu1 %vm3936_vm4, %v12369_v41  ;;  %13283 = vst [vmem:[#allocation31_spill] sm:$0xff] %v12385_v36  ;;  %v12389_v41 = vld [vmem:[#allocation3 + $0xb1] sm:$0xff] }
 0x381   : > { %13284 = vst [vmem:[#allocation33_spill] sm:$0xff] %v12389_v41 }
 0x383   : > { %9794 = vmatmul.mubr.msk.f32.gmra.mrb[22].mxu1 %vm3936_vm4, %v12373_v40  ;;  %v12393_v40 = vld [vmem:[#allocation3 + $0xc9] sm:$0xff] }
 0x384   : > { %9796 = vmatprep.mubr.msk.f32.mxu1 %vm3936_vm4, %v12377_v52  ;;  %13285 = vst [vmem:[#allocation35_spill] sm:$0xff] %v12393_v40  ;;  %v12397_v52 = vld [vmem:[#allocation3 + $0xd1] sm:$0xff] }
 0x385   : > { %13286 = vst [vmem:[#allocation36_spill] sm:$0xff] %v12397_v52 }
 0x387   : > { %9797 = vmatmul.mubr.msk.f32.gmra.mrb[24].mxu1 %vm3936_vm4, %v12381_v26  ;;  %v12401_v26 = vld [vmem:[#allocation3 + $0xe9] sm:$0xff] }
 0x388   : > { %9799 = vmatprep.mubr.msk.f32.mxu1 %vm3936_vm4, %v12385_v36  ;;  %13287 = vst [vmem:[#allocation38_spill] sm:$0xff] %v12401_v26  ;;  %v12405_v36 = vld [vmem:[#allocation3 + $0xf1] sm:$0xff] }
 0x389   : > { %13288 = vst [vmem:[#allocation39_spill] sm:$0xff] %v12405_v36 }
 0x38b   : > { %9800 = vmatmul.mubr.msk.f32.gmra.mrb[26].mxu1 %vm3936_vm4, %v12389_v41  ;;  %v12409_v41 = vld [vmem:[#allocation3 + $0x109] sm:$0xff] }
 0x38c   : > { %9802 = vmatprep.mubr.msk.f32.mxu1 %vm3936_vm4, %v12393_v40  ;;  %13289 = vst [vmem:[#allocation6_spill] sm:$0xff] %v12409_v41  ;;  %v12413_v40 = vld [vmem:[#allocation3 + $0x111] sm:$0xff] }
 0x38d   : > { %13290 = vst [vmem:[#allocation7_spill] sm:$0xff] %v12413_v40 }
 0x38f   : > { %9803 = vmatmul.mubr.msk.f32.gmra.mrb[28].mxu1 %vm3936_vm4, %v12397_v52  ;;  %v12417_v52 = vld [vmem:[#allocation3 + $0x129] sm:$0xff] }
 0x390   : > { %9805 = vmatprep.mubr.msk.f32.mxu1 %vm3936_vm4, %v12401_v26  ;;  %13291 = vst [vmem:[#allocation8_spill] sm:$0xff] %v12417_v52  ;;  %v12421_v26 = vld [vmem:[#allocation3 + $0x131] sm:$0xff] }
 0x391   : > { %13292 = vst [vmem:[#allocation9_spill] sm:$0xff] %v12421_v26 }
 0x393   : > { %9806 = vmatmul.mubr.msk.f32.gmra.mrb[30].mxu1 %vm3936_vm4, %v12405_v36  ;;  %v12425_v36 = vld [vmem:[#allocation3 + $0x149] sm:$0xff] }
 0x394   : > { %9808 = vmatprep.mubr.msk.f32.mxu1 %vm3936_vm4, %v12409_v41  ;;  %13293 = vst [vmem:[#allocation10_spill] sm:$0xff] %v12425_v36  ;;  %v12429_v41 = vld [vmem:[#allocation3 + $0x151] sm:$0xff] }
 0x395   : > { %13294 = vst [vmem:[#allocation11_spill] sm:$0xff] %v12429_v41 }
 0x397   : > { %9809 = vmatmul.mubr.msk.f32.gmra.mrb[32].mxu1 %vm3936_vm4, %v12413_v40  ;;  %v12433_v40 = vld [vmem:[#allocation3 + $0x169] sm:$0xff] }
 0x398   : > { %9811 = vmatprep.mubr.msk.f32.mxu1 %vm3936_vm4, %v12417_v52  ;;  %13295 = vst [vmem:[#allocation12_spill] sm:$0xff] %v12433_v40  ;;  %v12437_v52 = vld [vmem:[#allocation3 + $0x171] sm:$0xff] }
 0x399   : > { %13296 = vst [vmem:[#allocation13_spill] sm:$0xff] %v12437_v52 }
 0x39b   : > { %9812 = vmatmul.mubr.msk.f32.gmra.mrb[34].mxu1 %vm3936_vm4, %v12421_v26  ;;  %v12441_v26 = vld [vmem:[#allocation3 + $0x189] sm:$0xff] }
 0x39c   : > { %9814 = vmatprep.mubr.msk.f32.mxu1 %vm3936_vm4, %v12425_v36  ;;  %13297 = vst [vmem:[#allocation14_spill] sm:$0xff] %v12441_v26  ;;  %v12445_v36 = vld [vmem:[#allocation3 + $0x191] sm:$0xff] }
 0x39d   : > { %13298 = vst [vmem:[#allocation15_spill] sm:$0xff] %v12445_v36 }
 0x39f   : > { %9815 = vmatmul.mubr.msk.f32.gmra.mrb[36].mxu1 %vm3936_vm4, %v12429_v41  ;;  %v12449_v41 = vld [vmem:[#allocation3 + $0x1a9] sm:$0xff] }
 0x3a0   : > { %9817 = vmatprep.mubr.msk.f32.mxu1 %vm3936_vm4, %v12433_v40  ;;  %13299 = vst [vmem:[#allocation16_spill] sm:$0xff] %v12449_v41  ;;  %v12453_v40 = vld [vmem:[#allocation3 + $0x1b1] sm:$0xff] }
 0x3a3   : > { %9818 = vmatmul.mubr.msk.f32.gmra.mrb[38].mxu1 %vm3936_vm4, %v12437_v52  ;;  %v12457_v52 = vld [vmem:[#allocation3 + $0x1c9] sm:$0xff] }
 0x3a4   : > { %9820 = vmatprep.mubr.msk.f32.mxu1 %vm3936_vm4, %v12441_v26  ;;  %13300 = vst [vmem:[#allocation17_spill] sm:$0xff] %v12457_v52  ;;  %v12461_v26 = vld [vmem:[#allocation3 + $0x1d1] sm:$0xff] }
 0x3a7   : > { %9821 = vmatmul.mubr.msk.f32.gmra.mrb[40].mxu1 %vm3936_vm4, %v12445_v36  ;;  %v12465_v36 = vld [vmem:[#allocation3 + $0x1e9] sm:$0xff] }
 0x3a8   : > { %9823 = vmatprep.mubr.msk.f32.mxu1 %vm3936_vm4, %v12449_v41  ;;  %13301 = vst [vmem:[#allocation18_spill] sm:$0xff] %v12465_v36  ;;  %v12469_v41 = vld [vmem:[#allocation3 + $0x1f1] sm:$0xff] }
 0x3ab   : > { %9824 = vmatmul.mubr.msk.f32.gmra.mrb[42].mxu1 %vm3936_vm4, %v12453_v40 }
 0x3ac   : > { %9826 = vmatprep.mubr.msk.f32.mxu1 %vm3936_vm4, %v12457_v52  ;;  %v8431_v52 = vld [vmem:[%s13055_s3 + $0x28] sm:$0x3f] }
 0x3af   : > { %9827 = vmatmul.mubr.msk.f32.gmra.mrb[44].mxu1 %vm3936_vm4, %v12461_v26 }
 0x3b0   : > { %9829 = vmatprep.mubr.msk.f32.mxu1 %vm3936_vm4, %v12465_v36 }
 0x3b3   : > { %9830 = vmatmul.mubr.msk.f32.gmra.mrb[46].mxu1 %vm3936_vm4, %v12469_v41 }
 0x3b4   : > { %9834 = vmatprep.mubr.msk.f32.mxu1 %vm3936_vm4, %v12218_v28  ;;  %v12539_v28 = vld [vmem:[#allocation3 + $0x207] sm:$0xff] }
 0x3b7   : > { %9835 = vmatmul.mubr.msk.f32.vlgmr.msra.gmra.mrb[16].mxu1 %vm3936_vm4, %v12226_v29  ;;  %v12543_v29 = vld [vmem:[#allocation3 + $0x20f] sm:$0xff] }
 0x3b8   : > { %9883 = vmatpush3.msk.msra.mxu1 %vm4206_vm3, %v12346_v56  ;;  %9837 = vmatprep.mubr.msk.f32.mxu1 %vm3936_vm4, %v12230_v30  ;;  %v8465_v56 = vld [vmem:[%s13055_s3 + $0x30] sm:$0x3f] }
 0x3b9   : > { %9932 = vmatprep.subr.msk.mxu1 %vm4206_vm3, %v8431_v52 }
 0x3bb   : > { %9838 = vmatmul.mubr.msk.f32.gmra.mrb[18].mxu1 %vm3936_vm4, %v12234_v1 }
 0x3bc   : > { %9840 = vmatprep.mubr.msk.f32.mxu1 %vm3936_vm4, %v12238_v22 }
 0x3bf   : > { %9841 = vmatmul.mubr.msk.f32.gmra.mrb[20].mxu1 %vm3936_vm4, %v12242_v33 }
 0x3c0   : > { %9843 = vmatprep.mubr.msk.f32.mxu1 %vm3936_vm4, %v12246_v45 }
 0x3c3   : > { %9844 = vmatmul.mubr.msk.f32.gmra.mrb[22].mxu1 %vm3936_vm4, %v12250_v46 }
 0x3c4   : > { %9846 = vmatprep.mubr.msk.f32.mxu1 %vm3936_vm4, %v12254_v43 }
 0x3c7   : > { %9847 = vmatmul.mubr.msk.f32.gmra.mrb[24].mxu1 %vm3936_vm4, %v12258_v20 }
 0x3c8   : > { %9849 = vmatprep.mubr.msk.f32.mxu1 %vm3936_vm4, %v12262_v47 }
 0x3cb   : > { %9850 = vmatmul.mubr.msk.f32.gmra.mrb[26].mxu1 %vm3936_vm4, %v12266_v49 }
 0x3cc   : > { %9852 = vmatprep.mubr.msk.f32.mxu1 %vm3936_vm4, %v12270_v21 }
 0x3cf   : > { %9853 = vmatmul.mubr.msk.f32.gmra.mrb[28].mxu1 %vm3936_vm4, %v12274_v61 }
 0x3d0   : > { %9855 = vmatprep.mubr.msk.f32.mxu1 %vm3936_vm4, %v12278_v63 }
 0x3d3   : > { %9856 = vmatmul.mubr.msk.f32.gmra.mrb[30].mxu1 %vm3936_vm4, %v12282_v24 }
 0x3d4   : > { %9858 = vmatprep.mubr.msk.f32.mxu1 %vm3936_vm4, %v12286_v50 }
 0x3d7   : > { %9859 = vmatmul.mubr.msk.f32.gmra.mrb[32].mxu1 %vm3936_vm4, %v12290_v2 }
 0x3d8   : > { %9861 = vmatprep.mubr.msk.f32.mxu1 %vm3936_vm4, %v12294_v4 }
 0x3db   : > { %9862 = vmatmul.mubr.msk.f32.gmra.mrb[34].mxu1 %vm3936_vm4, %v12298_v37 }
 0x3dc   : > { %9864 = vmatprep.mubr.msk.f32.mxu1 %vm3936_vm4, %v12302_v7 }
 0x3df   : > { %9865 = vmatmul.mubr.msk.f32.gmra.mrb[36].mxu1 %vm3936_vm4, %v12306_v8 }
 0x3e0   : > { %9867 = vmatprep.mubr.msk.f32.mxu1 %vm3936_vm4, %v12310_v12 }
 0x3e3   : > { %9868 = vmatmul.mubr.msk.f32.gmra.mrb[38].mxu1 %vm3936_vm4, %v12314_v38 }
 0x3e4   : > { %9870 = vmatprep.mubr.msk.f32.mxu1 %vm3936_vm4, %v12318_v53 }
 0x3e7   : > { %9871 = vmatmul.mubr.msk.f32.gmra.mrb[40].mxu1 %vm3936_vm4, %v12322_v13 }
 0x3e8   : > { %9873 = vmatprep.mubr.msk.f32.mxu1 %vm3936_vm4, %v12326_v14 }
 0x3eb   : > { %9874 = vmatmul.mubr.msk.f32.gmra.mrb[42].mxu1 %vm3936_vm4, %v12330_v39 }
 0x3ec   : > { %9876 = vmatprep.mubr.msk.f32.mxu1 %vm3936_vm4, %v12334_v16 }
 0x3ef   : > { %9877 = vmatmul.mubr.msk.f32.gmra.mrb[44].mxu1 %vm3936_vm4, %v12338_v18 }
 0x3f0   : > { %9879 = vmatprep.mubr.msk.f32.mxu1 %vm3936_vm4, %v12539_v28 }
 0x3f3   : > { %9880 = vmatmul.mubr.msk.f32.gmra.mrb[46].mxu1 %vm3936_vm4, %v12543_v29 }
 0x3f4   : > { %9884 = vmatprep.mubr.msk.f32.mxu1 %vm3936_vm4, %v12023_v48  ;;  %v13302_v48 = vld [vmem:[#allocation4_spill] sm:$0xff] }
 0x3f7   : > { %9885 = vmatmul.mubr.msk.f32.vlgmr.msra.gmra.mrb[16].mxu1 %vm3936_vm4, %v12029_v58  ;;  %v13303_v58 = vld [vmem:[#allocation5_spill] sm:$0xff] }
 0x3f8   : > { %9933 = vmatpush3.msk.msra.mxu1 %vm4206_vm3, %v8431_v52  ;;  %9887 = vmatprep.mubr.msk.f32.mxu1 %vm3936_vm4, %v12035_v0  ;;  %v12612_v0 = vld [vmem:[#allocation3 + $0x208] sm:$0xff]  ;;  %v13317_v52 = vld [vmem:[#allocation39_spill] sm:$0xff] }
 0x3f9   : > { %9982 = vmatprep.subr.msk.mxu1 %vm4206_vm3, %v8465_v56 }
 0x3fb   : > { %9888 = vmatmul.mubr.msk.f32.gmra.mrb[18].mxu1 %vm3936_vm4, %v12041_v3  ;;  %v12616_v3 = vld [vmem:[#allocation3 + $0x210] sm:$0xff] }
 0x3fc   : > { %9890 = vmatprep.mubr.msk.f32.mxu1 %vm3936_vm4, %v12047_v9  ;;  %v13304_v9 = vld [vmem:[#allocation23_spill] sm:$0xff] }
 0x3ff   : > { %9891 = vmatmul.mubr.msk.f32.gmra.mrb[20].mxu1 %vm3936_vm4, %v12053_v11  ;;  %v8499_v11 = vld [vmem:[%s13055_s3 + $0x38] sm:$0x3f] }
 0x400   : > { %9893 = vmatprep.mubr.msk.f32.mxu1 %vm3936_vm4, %v12059_v19  ;;  %v13305_v19 = vld [vmem:[#allocation24_spill] sm:$0xff] }
 0x403   : > { %9894 = vmatmul.mubr.msk.f32.gmra.mrb[22].mxu1 %vm3936_vm4, %v12065_v54  ;;  %v13306_v54 = vld [vmem:[#allocation26_spill] sm:$0xff] }
 0x404   : > { %9896 = vmatprep.mubr.msk.f32.mxu1 %vm3936_vm4, %v12071_v55  ;;  %v13307_v55 = vld [vmem:[#allocation28_spill] sm:$0xff] }
 0x407   : > { %9897 = vmatmul.mubr.msk.f32.gmra.mrb[24].mxu1 %vm3936_vm4, %v12077_v57  ;;  %v13308_v57 = vld [vmem:[#allocation32_spill] sm:$0xff] }
 0x408   : > { %9899 = vmatprep.mubr.msk.f32.mxu1 %vm3936_vm4, %v12083_v32  ;;  %v13309_v32 = vld [vmem:[#allocation34_spill] sm:$0xff] }
 0x40b   : > { %9900 = vmatmul.mubr.msk.f32.gmra.mrb[26].mxu1 %vm3936_vm4, %v12089_v34  ;;  %v13310_v34 = vld [vmem:[#allocation27_spill] sm:$0xff] }
 0x40c   : > { %9902 = vmatprep.mubr.msk.f32.mxu1 %vm3936_vm4, %v12096_v60  ;;  %v13311_v60 = vld [vmem:[#allocation29_spill] sm:$0xff] }
 0x40f   : > { %9903 = vmatmul.mubr.msk.f32.gmra.mrb[28].mxu1 %vm3936_vm4, %v12101_v62  ;;  %v13312_v62 = vld [vmem:[#allocation31_spill] sm:$0xff] }
 0x410   : > { %9905 = vmatprep.mubr.msk.f32.mxu1 %vm3936_vm4, %v12110_v6  ;;  %v13313_v6 = vld [vmem:[#allocation33_spill] sm:$0xff] }
 0x413   : > { %9906 = vmatmul.mubr.msk.f32.gmra.mrb[30].mxu1 %vm3936_vm4, %v12115_v10  ;;  %v13314_v10 = vld [vmem:[#allocation35_spill] sm:$0xff] }
 0x414   : > { %9908 = vmatprep.mubr.msk.f32.mxu1 %vm3936_vm4, %v12127_v35  ;;  %v13315_v35 = vld [vmem:[#allocation36_spill] sm:$0xff] }
 0x417   : > { %9909 = vmatmul.mubr.msk.f32.gmra.mrb[32].mxu1 %vm3936_vm4, %v12133_v25  ;;  %v13316_v25 = vld [vmem:[#allocation38_spill] sm:$0xff] }
 0x418   : > { %9911 = vmatprep.mubr.msk.f32.mxu1 %vm3936_vm4, %v12141_v31 }
 0x41b   : > { %9912 = vmatmul.mubr.msk.f32.gmra.mrb[34].mxu1 %vm3936_vm4, %v12147_v42 }
 0x41c   : > { %9914 = vmatprep.mubr.msk.f32.mxu1 %vm3936_vm4, %v12155_v59 }
 0x41f   : > { %9915 = vmatmul.mubr.msk.f32.gmra.mrb[36].mxu1 %vm3936_vm4, %v12161_v44 }
 0x420   : > { %9917 = vmatprep.mubr.msk.f32.mxu1 %vm3936_vm4, %v12169_v5 }
 0x423   : > { %9918 = vmatmul.mubr.msk.f32.gmra.mrb[38].mxu1 %vm3936_vm4, %v12175_v51 }
 0x424   : > { %9920 = vmatprep.mubr.msk.f32.mxu1 %vm3936_vm4, %v12183_v15 }
 0x427   : > { %9921 = vmatmul.mubr.msk.f32.gmra.mrb[40].mxu1 %vm3936_vm4, %v12189_v17 }
 0x428   : > { %9923 = vmatprep.mubr.msk.f32.mxu1 %vm3936_vm4, %v12194_v27 }
 0x42b   : > { %9924 = vmatmul.mubr.msk.f32.gmra.mrb[42].mxu1 %vm3936_vm4, %v12199_v23 }
 0x42c   : > { %9926 = vmatprep.mubr.msk.f32.mxu1 %vm3936_vm4, %v13302_v48 }
 0x42f   : > { %9927 = vmatmul.mubr.msk.f32.gmra.mrb[44].mxu1 %vm3936_vm4, %v13303_v58 }
 0x430   : > { %9929 = vmatprep.mubr.msk.f32.mxu1 %vm3936_vm4, %v12612_v0 }
 0x433   : > { %9930 = vmatmul.mubr.msk.f32.gmra.mrb[46].mxu1 %vm3936_vm4, %v12616_v3 }
 0x434   : > { %9934 = vmatprep.mubr.msk.f32.mxu1 %vm3936_vm4, %v13304_v9  ;;  %v13319_v9 = vld [vmem:[#allocation7_spill] sm:$0xff] }
 0x437   : > { %9935 = vmatmul.mubr.msk.f32.vlgmr.msra.gmra.mrb[16].mxu1 %vm3936_vm4, %v13305_v19  ;;  %v13320_v19 = vld [vmem:[#allocation8_spill] sm:$0xff] }
 0x438   : > { %9983 = vmatpush3.msk.msra.mxu1 %vm4206_vm3, %v8465_v56  ;;  %9937 = vmatprep.mubr.msk.f32.mxu1 %vm3936_vm4, %v13306_v54  ;;  %v13318_v56 = vld [vmem:[#allocation6_spill] sm:$0xff] }
 0x439   : > { %10032 = vmatprep.subr.msk.mxu1 %vm4206_vm3, %v8499_v11 }
 0x43b   : > { %9938 = vmatmul.mubr.msk.f32.gmra.mrb[18].mxu1 %vm3936_vm4, %v13307_v55 }
 0x43c   : > { %9940 = vmatprep.mubr.msk.f32.mxu1 %vm3936_vm4, %v13308_v57 }
 0x43f   : > { %9941 = vmatmul.mubr.msk.f32.gmra.mrb[20].mxu1 %vm3936_vm4, %v13309_v32 }
 0x440   : > { %9943 = vmatprep.mubr.msk.f32.mxu1 %vm3936_vm4, %v13310_v34 }
 0x443   : > { %9944 = vmatmul.mubr.msk.f32.gmra.mrb[22].mxu1 %vm3936_vm4, %v13311_v60 }
 0x444   : > { %9946 = vmatprep.mubr.msk.f32.mxu1 %vm3936_vm4, %v13312_v62 }
 0x447   : > { %9947 = vmatmul.mubr.msk.f32.gmra.mrb[24].mxu1 %vm3936_vm4, %v13313_v6  ;;  %v13321_v6 = vld [vmem:[#allocation9_spill] sm:$0xff] }
 0x448   : > { %9949 = vmatprep.mubr.msk.f32.mxu1 %vm3936_vm4, %v13314_v10  ;;  %v13322_v10 = vld [vmem:[#allocation10_spill] sm:$0xff] }
 0x44b   : > { %9950 = vmatmul.mubr.msk.f32.gmra.mrb[26].mxu1 %vm3936_vm4, %v13315_v35  ;;  %v13323_v35 = vld [vmem:[#allocation11_spill] sm:$0xff] }
 0x44c   : > { %9952 = vmatprep.mubr.msk.f32.mxu1 %vm3936_vm4, %v13316_v25  ;;  %v13324_v25 = vld [vmem:[#allocation12_spill] sm:$0xff] }
 0x44f   : > { %9953 = vmatmul.mubr.msk.f32.gmra.mrb[28].mxu1 %vm3936_vm4, %v13317_v52  ;;  %v13325_v52 = vld [vmem:[#allocation13_spill] sm:$0xff] }
 0x450   : > { %9955 = vmatprep.mubr.msk.f32.mxu1 %vm3936_vm4, %v13318_v56  ;;  %v13326_v56 = vld [vmem:[#allocation14_spill] sm:$0xff] }
 0x453   : > { %9956 = vmatmul.mubr.msk.f32.gmra.mrb[30].mxu1 %vm3936_vm4, %v13319_v9  ;;  %v13327_v9 = vld [vmem:[#allocation15_spill] sm:$0xff] }
 0x454   : > { %9958 = vmatprep.mubr.msk.f32.mxu1 %vm3936_vm4, %v13320_v19  ;;  %v13328_v19 = vld [vmem:[#allocation16_spill] sm:$0xff] }
 0x457   : > { %9959 = vmatmul.mubr.msk.f32.gmra.mrb[32].mxu1 %vm3936_vm4, %v13321_v6 }
 0x458   : > { %9961 = vmatprep.mubr.msk.f32.mxu1 %vm3936_vm4, %v13322_v10  ;;  %v13329_v10 = vld [vmem:[#allocation17_spill] sm:$0xff] }
 0x45b   : > { %9962 = vmatmul.mubr.msk.f32.gmra.mrb[34].mxu1 %vm3936_vm4, %v13323_v35 }
 0x45c   : > { %9964 = vmatprep.mubr.msk.f32.mxu1 %vm3936_vm4, %v13324_v25 }
 0x45f   : > { %9965 = vmatmul.mubr.msk.f32.gmra.mrb[36].mxu1 %vm3936_vm4, %v13325_v52 }
 0x460   : > { %9967 = vmatprep.mubr.msk.f32.mxu1 %vm3936_vm4, %v13326_v56  ;;  %v12685_v56 = vld [vmem:[#allocation3 + $0x209] sm:$0xff] }
 0x463   : > { %9968 = vmatmul.mubr.msk.f32.gmra.mrb[38].mxu1 %vm3936_vm4, %v13327_v9 }
 0x464   : > { %9970 = vmatprep.mubr.msk.f32.mxu1 %vm3936_vm4, %v13328_v19  ;;  %v12689_v19 = vld [vmem:[#allocation3 + $0x211] sm:$0xff] }
 0x467   : > { %9971 = vmatmul.mubr.msk.f32.gmra.mrb[40].mxu1 %vm3936_vm4, %v12453_v40 }
 0x468   : > { %9973 = vmatprep.mubr.msk.f32.mxu1 %vm3936_vm4, %v13329_v10 }
 0x46b   : > { %9974 = vmatmul.mubr.msk.f32.gmra.mrb[42].mxu1 %vm3936_vm4, %v12461_v26 }
 0x46c   : > { %9976 = vmatprep.mubr.msk.f32.mxu1 %vm3936_vm4, %v12465_v36  ;;  %v8533_v36 = vld [vmem:[%s13055_s3 + $0x40] sm:$0x3f] }
 0x46f   : > { %9977 = vmatmul.mubr.msk.f32.gmra.mrb[44].mxu1 %vm3936_vm4, %v12469_v41 }
 0x470   : > { %9979 = vmatprep.mubr.msk.f32.mxu1 %vm3936_vm4, %v12685_v56 }
 0x473   : > { %9980 = vmatmul.mubr.msk.f32.gmra.mrb[46].mxu1 %vm3936_vm4, %v12689_v19 }
 0x474   : > { %9984 = vmatprep.mubr.msk.f32.mxu1 %vm3936_vm4, %v12230_v30  ;;  %v6350_v30 = vld [vmem:[#allocation3 + $0x227] sm:$0xff] }
 0x477   : > { %9985 = vmatmul.mubr.msk.f32.vlgmr.msra.gmra.mrb[16].mxu1 %vm3936_vm4, %v12234_v1  ;;  %v6351_v1 = vld [vmem:[#allocation3 + $0x22f] sm:$0xff] }
 0x478   : > { %10033 = vmatpush3.msk.msra.mxu1 %vm4206_vm3, %v8499_v11  ;;  %9987 = vmatprep.mubr.msk.f32.mxu1 %vm3936_vm4, %v12238_v22  ;;  %v6710_v22 = vld [vmem:[#allocation3 + $0x48] sm:$0xff] }
 0x479   : > { %10082 = vmatprep.subr.msk.mxu1 %vm4206_vm3, %v8533_v36 }
 0x47b   : > { %9988 = vmatmul.mubr.msk.f32.gmra.mrb[18].mxu1 %vm3936_vm4, %v12242_v33  ;;  %v7529_v33 = vld [vmem:[%s13057_s5] sm:$0xff] }
 0x47c   : > { %9990 = vmatprep.mubr.msk.f32.mxu1 %vm3936_vm4, %v12246_v45  ;;  %10132 = vmatprep.subr.mxu0 %v7529_v33  ;;  %v6711_v45 = vld [vmem:[#allocation3 + $0x50] sm:$0xff] }
 0x47d   : > { %10133 = vmatpush3.msra.mxu0 %v7529_v33 }
 0x47f   : > { %9991 = vmatmul.mubr.msk.f32.gmra.mrb[20].mxu1 %vm3936_vm4, %v12250_v46  ;;  %v6712_v46 = vld [vmem:[#allocation3 + $0x68] sm:$0xff] }
 0x480   : > { %9993 = vmatprep.mubr.msk.f32.mxu1 %vm3936_vm4, %v12254_v43  ;;  %v6713_v43 = vld [vmem:[#allocation3 + $0x70] sm:$0xff] }
 0x483   : > { %9994 = vmatmul.mubr.msk.f32.gmra.mrb[22].mxu1 %vm3936_vm4, %v12258_v20  ;;  %v6714_v20 = vld [vmem:[#allocation3 + $0x88] sm:$0xff] }
 0x484   : > { %9996 = vmatprep.mubr.msk.f32.mxu1 %vm3936_vm4, %v12262_v47  ;;  %v6715_v47 = vld [vmem:[#allocation3 + $0x90] sm:$0xff] }
 0x487   : > { %9997 = vmatmul.mubr.msk.f32.gmra.mrb[24].mxu1 %vm3936_vm4, %v12266_v49  ;;  %v6716_v49 = vld [vmem:[#allocation3 + $0xa8] sm:$0xff] }
 0x488   : > { %9999 = vmatprep.mubr.msk.f32.mxu1 %vm3936_vm4, %v12270_v21  ;;  %v6717_v21 = vld [vmem:[#allocation3 + $0xb0] sm:$0xff] }
 0x48b   : > { %10000 = vmatmul.mubr.msk.f32.gmra.mrb[26].mxu1 %vm3936_vm4, %v12274_v61  ;;  %v6718_v61 = vld [vmem:[#allocation3 + $0xc8] sm:$0xff] }
 0x48c   : > { %10002 = vmatprep.mubr.msk.f32.mxu1 %vm3936_vm4, %v12278_v63  ;;  %v6719_v63 = vld [vmem:[#allocation3 + $0xd0] sm:$0xff] }
 0x48f   : > { %10003 = vmatmul.mubr.msk.f32.gmra.mrb[28].mxu1 %vm3936_vm4, %v12282_v24  ;;  %v6720_v24 = vld [vmem:[#allocation3 + $0xe8] sm:$0xff] }
 0x490   : > { %10005 = vmatprep.mubr.msk.f32.mxu1 %vm3936_vm4, %v12286_v50  ;;  %v6721_v50 = vld [vmem:[#allocation3 + $0xf0] sm:$0xff] }
 0x493   : > { %10006 = vmatmul.mubr.msk.f32.gmra.mrb[30].mxu1 %vm3936_vm4, %v12290_v2  ;;  %v6722_v2 = vld [vmem:[#allocation3 + $0x108] sm:$0xff] }
 0x494   : > { %10008 = vmatprep.mubr.msk.f32.mxu1 %vm3936_vm4, %v12294_v4  ;;  %v6723_v4 = vld [vmem:[#allocation3 + $0x110] sm:$0xff] }
 0x497   : > { %10009 = vmatmul.mubr.msk.f32.gmra.mrb[32].mxu1 %vm3936_vm4, %v12298_v37  ;;  %v6724_v37 = vld [vmem:[#allocation3 + $0x128] sm:$0xff] }
 0x498   : > { %10011 = vmatprep.mubr.msk.f32.mxu1 %vm3936_vm4, %v12302_v7  ;;  %v6725_v7 = vld [vmem:[#allocation3 + $0x130] sm:$0xff] }
 0x49b   : > { %10012 = vmatmul.mubr.msk.f32.gmra.mrb[34].mxu1 %vm3936_vm4, %v12306_v8  ;;  %v13338_v8 = vld [vmem:[#allocation10_spill] sm:$0xff] }
 0x49c   : > { %10014 = vmatprep.mubr.msk.f32.mxu1 %vm3936_vm4, %v12310_v12  ;;  %v13339_v12 = vld [vmem:[#allocation14_spill] sm:$0xff] }
 0x49f   : > { %10015 = vmatmul.mubr.msk.f32.gmra.mrb[36].mxu1 %vm3936_vm4, %v12314_v38  ;;  %v13340_v38 = vld [vmem:[#allocation16_spill] sm:$0xff] }
 0x4a0   : > { %10017 = vmatprep.mubr.msk.f32.mxu1 %vm3936_vm4, %v12318_v53  ;;  %v13341_v53 = vld [vmem:[#allocation18_spill] sm:$0xff] }
 0x4a3   : > { %10018 = vmatmul.mubr.msk.f32.gmra.mrb[38].mxu1 %vm3936_vm4, %v12322_v13  ;;  %v7130_v13 = vld [vmem:[#allocation3 + $0x229] sm:$0xff] }
 0x4a4   : > { %10020 = vmatprep.mubr.msk.f32.mxu1 %vm3936_vm4, %v12326_v14 }
 0x4a7   : > { %10021 = vmatmul.mubr.msk.f32.gmra.mrb[40].mxu1 %vm3936_vm4, %v12330_v39 }
 0x4a8   : > { %10023 = vmatprep.mubr.msk.f32.mxu1 %vm3936_vm4, %v12334_v16 }
 0x4ab   : > { %10024 = vmatmul.mubr.msk.f32.gmra.mrb[42].mxu1 %vm3936_vm4, %v12338_v18 }
 0x4ac   : > { %10026 = vmatprep.mubr.msk.f32.mxu1 %vm3936_vm4, %v12539_v28 }
 0x4af   : > { %10027 = vmatmul.mubr.msk.f32.gmra.mrb[44].mxu1 %vm3936_vm4, %v12543_v29 }
 0x4b0   : > { %10029 = vmatprep.mubr.msk.f32.mxu1 %vm3936_vm4, %v6350_v30 }
 0x4b3   : > { %10030 = vmatmul.mubr.msk.f32.gmra.mrb[46].mxu1 %vm3936_vm4, %v6351_v1 }
 0x4b4   : > { %10034 = vmatprep.mubr.msk.f32.mxu1 %vm3936_vm4, %v6710_v22 }
 0x4b7   : > { %10035 = vmatmul.mubr.msk.f32.vlgmr.msra.gmra.mrb[16].mxu1 %vm3936_vm4, %v6711_v45 }
 0x4b8   : > { %10083 = vmatpush3.msk.msra.mxu1 %vm4206_vm3, %v8533_v36  ;;  %10037 = vmatprep.mubr.msk.f32.mxu1 %vm3936_vm4, %v6712_v46 }
 0x4bb   : > { %10038 = vmatmul.mubr.msk.f32.gmra.mrb[18].mxu1 %vm3936_vm4, %v6713_v43 }
 0x4bc   : > { %10040 = vmatprep.mubr.msk.f32.mxu1 %vm3936_vm4, %v6714_v20 }
 0x4bf   : > { %10041 = vmatmul.mubr.msk.f32.gmra.mrb[20].mxu1 %vm3936_vm4, %v6715_v47 }
 0x4c0   : > { %10043 = vmatprep.mubr.msk.f32.mxu1 %vm3936_vm4, %v6716_v49 }
 0x4c3   : > { %10044 = vmatmul.mubr.msk.f32.gmra.mrb[22].mxu1 %vm3936_vm4, %v6717_v21 }
 0x4c4   : > { %10046 = vmatprep.mubr.msk.f32.mxu1 %vm3936_vm4, %v6718_v61 }
 0x4c7   : > { %10047 = vmatmul.mubr.msk.f32.gmra.mrb[24].mxu1 %vm3936_vm4, %v6719_v63 }
 0x4c8   : > { %10049 = vmatprep.mubr.msk.f32.mxu1 %vm3936_vm4, %v6720_v24 }
 0x4cb   : > { %10050 = vmatmul.mubr.msk.f32.gmra.mrb[26].mxu1 %vm3936_vm4, %v6721_v50 }
 0x4cc   : > { %10052 = vmatprep.mubr.msk.f32.mxu1 %vm3936_vm4, %v6722_v2 }
 0x4cf   : > { %10053 = vmatmul.mubr.msk.f32.gmra.mrb[28].mxu1 %vm3936_vm4, %v6723_v4 }
 0x4d0   : > { %10055 = vmatprep.mubr.msk.f32.mxu1 %vm3936_vm4, %v6724_v37 }
 0x4d3   : > { %10056 = vmatmul.mubr.msk.f32.gmra.mrb[30].mxu1 %vm3936_vm4, %v6725_v7 }
 0x4d4   : > { %10058 = vmatprep.mubr.msk.f32.mxu1 %vm3936_vm4, %v12141_v31  ;;  %v6740_v31 = vld [vmem:[#allocation3 + $0x228] sm:$0xff] }
 0x4d7   : > { %10059 = vmatmul.mubr.msk.f32.gmra.mrb[32].mxu1 %vm3936_vm4, %v12147_v42  ;;  %v6741_v42 = vld [vmem:[#allocation3 + $0x230] sm:$0xff] }
 0x4d8   : > { %10061 = vmatprep.mubr.msk.f32.mxu1 %vm3936_vm4, %v12155_v59  ;;  %v13330_v59 = vld [vmem:[#allocation33_spill] sm:$0xff] }
 0x4db   : > { %10062 = vmatmul.mubr.msk.f32.gmra.mrb[34].mxu1 %vm3936_vm4, %v12161_v44  ;;  %v13331_v44 = vld [vmem:[#allocation35_spill] sm:$0xff] }
 0x4dc   : > { %10064 = vmatprep.mubr.msk.f32.mxu1 %vm3936_vm4, %v12169_v5  ;;  %v13332_v5 = vld [vmem:[#allocation36_spill] sm:$0xff] }
 0x4df   : > { %10065 = vmatmul.mubr.msk.f32.gmra.mrb[36].mxu1 %vm3936_vm4, %v12175_v51  ;;  %v13333_v51 = vld [vmem:[#allocation38_spill] sm:$0xff] }
 0x4e0   : > { %10067 = vmatprep.mubr.msk.f32.mxu1 %vm3936_vm4, %v12183_v15  ;;  %v13334_v15 = vld [vmem:[#allocation39_spill] sm:$0xff] }
 0x4e3   : > { %10068 = vmatmul.mubr.msk.f32.gmra.mrb[38].mxu1 %vm3936_vm4, %v12189_v17  ;;  %v13335_v17 = vld [vmem:[#allocation6_spill] sm:$0xff] }
 0x4e4   : > { %10070 = vmatprep.mubr.msk.f32.mxu1 %vm3936_vm4, %v12194_v27  ;;  %v13336_v27 = vld [vmem:[#allocation7_spill] sm:$0xff] }
 0x4e7   : > { %10071 = vmatmul.mubr.msk.f32.gmra.mrb[40].mxu1 %vm3936_vm4, %v12199_v23  ;;  %v13337_v23 = vld [vmem:[#allocation8_spill] sm:$0xff] }
 0x4e8   : > { %10073 = vmatprep.mubr.msk.f32.mxu1 %vm3936_vm4, %v13302_v48 }
 0x4eb   : > { %10074 = vmatmul.mubr.msk.f32.gmra.mrb[42].mxu1 %vm3936_vm4, %v13303_v58 }
 0x4ec   : > { %10076 = vmatprep.mubr.msk.f32.mxu1 %vm3936_vm4, %v12612_v0 }
 0x4ef   : > { %10077 = vmatmul.mubr.msk.f32.gmra.mrb[44].mxu1 %vm3936_vm4, %v12616_v3 }
 0x4f0   : > { %10079 = vmatprep.mubr.msk.f32.mxu1 %vm3936_vm4, %v6740_v31 }
 0x4f3   : > { %10080 = vmatmul.mubr.msk.f32.gmra.mrb[46].mxu1 %vm3936_vm4, %v6741_v42 }
 0x4f4   : > { %10084 = vmatprep.mubr.msk.f32.mxu1 %vm3936_vm4, %v13306_v54 }
 0x4f7   : > { %10085 = vmatmul.mubr.msk.f32.vlgmr.msra.gmra.mrb[16].mxu1 %vm3936_vm4, %v13307_v55 }
 0x4f8   : > { %10087 = vmatprep.mubr.msk.f32.mxu1 %vm3936_vm4, %v13308_v57 }
 0x4fb   : > { %10088 = vmatmul.mubr.msk.f32.gmra.mrb[18].mxu1 %vm3936_vm4, %v13309_v32 }
 0x4fc   : > { %10090 = vmatprep.mubr.msk.f32.mxu1 %vm3936_vm4, %v13310_v34 }
 0x4ff   : > { %10091 = vmatmul.mubr.msk.f32.gmra.mrb[20].mxu1 %vm3936_vm4, %v13311_v60 }
 0x500   : > { %10093 = vmatprep.mubr.msk.f32.mxu1 %vm3936_vm4, %v13312_v62 }
 0x503   : > { %10094 = vmatmul.mubr.msk.f32.gmra.mrb[22].mxu1 %vm3936_vm4, %v13330_v59 }
 0x504   : > { %10096 = vmatprep.mubr.msk.f32.mxu1 %vm3936_vm4, %v13331_v44 }
 0x507   : > { %10097 = vmatmul.mubr.msk.f32.gmra.mrb[24].mxu1 %vm3936_vm4, %v13332_v5 }
 0x508   : > { %10099 = vmatprep.mubr.msk.f32.mxu1 %vm3936_vm4, %v13333_v51 }
 0x50b   : > { %10100 = vmatmul.mubr.msk.f32.gmra.mrb[26].mxu1 %vm3936_vm4, %v13334_v15 }
 0x50c   : > { %10102 = vmatprep.mubr.msk.f32.mxu1 %vm3936_vm4, %v13335_v17 }
 0x50f   : > { %10103 = vmatmul.mubr.msk.f32.gmra.mrb[28].mxu1 %vm3936_vm4, %v13336_v27 }
 0x510   : > { %10105 = vmatprep.mubr.msk.f32.mxu1 %vm3936_vm4, %v13337_v23 }
 0x513   : > { %10106 = vmatmul.mubr.msk.f32.gmra.mrb[30].mxu1 %vm3936_vm4, %v13321_v6 }
 0x514   : > { %10108 = vmatprep.mubr.msk.f32.mxu1 %vm3936_vm4, %v13338_v8 }
 0x517   : > { %10109 = vmatmul.mubr.msk.f32.gmra.mrb[32].mxu1 %vm3936_vm4, %v13323_v35 }
 0x518   : > { %10111 = vmatprep.mubr.msk.f32.mxu1 %vm3936_vm4, %v13324_v25 }
 0x51b   : > { %10112 = vmatmul.mubr.msk.f32.gmra.mrb[34].mxu1 %vm3936_vm4, %v13325_v52 }
 0x51c   : > { %10114 = vmatprep.mubr.msk.f32.mxu1 %vm3936_vm4, %v13339_v12 }
 0x51f   : > { %10115 = vmatmul.mubr.msk.f32.gmra.mrb[36].mxu1 %vm3936_vm4, %v13327_v9 }
 0x520   : > { %10117 = vmatprep.mubr.msk.f32.mxu1 %vm3936_vm4, %v13340_v38 }
 0x523   : > { %10118 = vmatmul.mubr.msk.f32.gmra.mrb[38].mxu1 %vm3936_vm4, %v12453_v40  ;;  %v7131_v40 = vld [vmem:[#allocation3 + $0x231] sm:$0xff] }
 0x524   : > { %10120 = vmatprep.mubr.msk.f32.mxu1 %vm3936_vm4, %v13329_v10 }
 0x527   : > { %10121 = vmatmul.mubr.msk.f32.gmra.mrb[40].mxu1 %vm3936_vm4, %v12461_v26  ;;  %v12875_v26 = vld [vmem:[%s13056_s4] ss:$0 sm:$0xff] }
 0x528   : > { %10123 = vmatprep.mubr.msk.f32.mxu1 %vm3936_vm4, %v13341_v53 }
 0x52b   : > { %10124 = vmatmul.mubr.msk.f32.gmra.mrb[42].mxu1 %vm3936_vm4, %v12469_v41 }
 0x52c   : > { %10126 = vmatprep.mubr.msk.f32.mxu1 %vm3936_vm4, %v12685_v56 }
 0x52f   : > { %10127 = vmatmul.mubr.msk.f32.gmra.mrb[44].mxu1 %vm3936_vm4, %v12689_v19 }
 0x530   : > { %10129 = vmatprep.mubr.msk.f32.mxu1 %vm3936_vm4, %v7130_v13 }
 0x533   : > { %10130 = vmatmul.mubr.msk.f32.gmra.mrb[46].mxu1 %vm3936_vm4, %v7131_v40 }
 0x5ca   : > { %v10086_v14 = vpop.f32.mrb[16].mxu1 }
 0x5cb   : > { %v7299_v39 = vpop.f32.mrb[17].mxu1  ;;  %v7498_v18 = vadd.f32 %v10086_v14, %v12875_v26 }
 0x5cc   : > { %v7497_v16 = vadd.f32 %v12875_v26, %v7299_v39  ;;  %v12944_v39 = vld [vmem:[%s13058_s6] ss:$0 sm:$0xff] }
 0x5ce   : > { %v10089_v36 = vpop.f32.mrb[18].mxu1  ;;  %10134 = vmatprep.mubr.msk.f32.mxu0 %vm7537_vm6, %v7497_v16 }
 0x5cf   : > { %v7309_v41 = vpop.f32.mrb[19].mxu1  ;;  %10135 = vmatmul.mubr.msk.f32.vlgmr.msra.gmra.mrb[32].mxu0 %vm7537_vm6, %v7498_v18  ;;  %v7500_v29 = vadd.f32 %v10089_v36, %v12875_v26 }
 0x5d0   : > { %v7499_v28 = vadd.f32 %v12875_v26, %v7309_v41 }
 0x5d2   : > { %v10092_v48 = vpop.f32.mrb[20].mxu1  ;;  %10137 = vmatprep.mubr.msk.f32.mxu0 %vm7537_vm6, %v7499_v28 }
 0x5d3   : > { %v7319_v58 = vpop.f32.mrb[21].mxu1  ;;  %10138 = vmatmul.mubr.msk.f32.gmra.mrb[34].mxu0 %vm7537_vm6, %v7500_v29  ;;  %v7502_v3 = vadd.f32 %v10092_v48, %v12875_v26 }
 0x5d4   : > { %v7501_v0 = vadd.f32 %v12875_v26, %v7319_v58 }
 0x5d6   : > { %v10095_v11 = vpop.f32.mrb[22].mxu1  ;;  %10140 = vmatprep.mubr.msk.f32.mxu0 %vm7537_vm6, %v7501_v0 }
 0x5d7   : > { %v7329_v54 = vpop.f32.mrb[23].mxu1  ;;  %10141 = vmatmul.mubr.msk.f32.gmra.mrb[36].mxu0 %vm7537_vm6, %v7502_v3  ;;  %v7504_v57 = vadd.f32 %v10095_v11, %v12875_v26 }
 0x5d8   : > { %v7503_v55 = vadd.f32 %v12875_v26, %v7329_v54 }
 0x5da   : > { %v10098_v32 = vpop.f32.mrb[24].mxu1  ;;  %10143 = vmatprep.mubr.msk.f32.mxu0 %vm7537_vm6, %v7503_v55 }
 0x5db   : > { %v7339_v34 = vpop.f32.mrb[25].mxu1  ;;  %10144 = vmatmul.mubr.msk.f32.gmra.mrb[38].mxu0 %vm7537_vm6, %v7504_v57  ;;  %v7506_v62 = vadd.f32 %v10098_v32, %v12875_v26 }
 0x5dc   : > { %v7505_v60 = vadd.f32 %v12875_v26, %v7339_v34 }
 0x5de   : > { %v10101_v6 = vpop.f32.mrb[26].mxu1  ;;  %10146 = vmatprep.mubr.msk.f32.mxu0 %vm7537_vm6, %v7505_v60 }
 0x5df   : > { %v7349_v10 = vpop.f32.mrb[27].mxu1  ;;  %10147 = vmatmul.mubr.msk.f32.gmra.mrb[40].mxu0 %vm7537_vm6, %v7506_v62  ;;  %v7508_v25 = vadd.f32 %v10101_v6, %v12875_v26 }
 0x5e0   : > { %v7507_v35 = vadd.f32 %v12875_v26, %v7349_v10 }
 0x5e2   : > { %v10104_v52 = vpop.f32.mrb[28].mxu1  ;;  %10149 = vmatprep.mubr.msk.f32.mxu0 %vm7537_vm6, %v7507_v35 }
 0x5e3   : > { %v7359_v56 = vpop.f32.mrb[29].mxu1  ;;  %10150 = vmatmul.mubr.msk.f32.gmra.mrb[42].mxu0 %vm7537_vm6, %v7508_v25  ;;  %v7510_v19 = vadd.f32 %v10104_v52, %v12875_v26 }
 0x5e4   : > { %v7509_v9 = vadd.f32 %v12875_v26, %v7359_v56 }
 0x5e6   : > { %v10107_v30 = vpop.f32.mrb[30].mxu1  ;;  %10152 = vmatprep.mubr.msk.f32.mxu0 %vm7537_vm6, %v7509_v9 }
 0x5e7   : > { %v7369_v1 = vpop.f32.mrb[31].mxu1  ;;  %10153 = vmatmul.mubr.msk.f32.gmra.mrb[44].mxu0 %vm7537_vm6, %v7510_v19  ;;  %v7512_v33 = vadd.f32 %v10107_v30, %v12875_v26 }
 0x5e8   : > { %v7511_v22 = vadd.f32 %v12875_v26, %v7369_v1 }
 0x5ea   : > { %v10110_v45 = vpop.f32.mrb[32].mxu1  ;;  %10155 = vmatprep.mubr.msk.f32.mxu0 %vm7537_vm6, %v7511_v22 }
 0x5eb   : > { %v7379_v46 = vpop.f32.mrb[33].mxu1  ;;  %10156 = vmatmul.mubr.msk.f32.gmra.mrb[46].mxu0 %vm7537_vm6, %v7512_v33  ;;  %v7514_v20 = vadd.f32 %v10110_v45, %v12875_v26 }
 0x5ec   : > { %v7513_v43 = vadd.f32 %v12875_v26, %v7379_v46 }
 0x5ee   : > { %v10113_v47 = vpop.f32.mrb[34].mxu1  ;;  %10158 = vmatprep.mubr.msk.f32.mxu0 %vm7537_vm6, %v7513_v43 }
 0x5ef   : > { %v7389_v49 = vpop.f32.mrb[35].mxu1  ;;  %10159 = vmatmul.mubr.msk.f32.gmra.mrb[48].mxu0 %vm7537_vm6, %v7514_v20  ;;  %v7516_v61 = vadd.f32 %v10113_v47, %v12875_v26 }
 0x5f0   : > { %v7515_v21 = vadd.f32 %v12875_v26, %v7389_v49 }
 0x5f2   : > { %v10116_v63 = vpop.f32.mrb[36].mxu1  ;;  %10161 = vmatprep.mubr.msk.f32.mxu0 %vm7537_vm6, %v7515_v21 }
 0x5f3   : > { %v7399_v24 = vpop.f32.mrb[37].mxu1  ;;  %10162 = vmatmul.mubr.msk.f32.gmra.mrb[50].mxu0 %vm7537_vm6, %v7516_v61  ;;  %v7518_v2 = vadd.f32 %v10116_v63, %v12875_v26 }
 0x5f4   : > { %v7517_v50 = vadd.f32 %v12875_v26, %v7399_v24 }
 0x5f6   : > { %v10119_v4 = vpop.f32.mrb[38].mxu1  ;;  %10164 = vmatprep.mubr.msk.f32.mxu0 %vm7537_vm6, %v7517_v50 }
 0x5f7   : > { %v7409_v37 = vpop.f32.mrb[39].mxu1  ;;  %10165 = vmatmul.mubr.msk.f32.gmra.mrb[52].mxu0 %vm7537_vm6, %v7518_v2  ;;  %v7520_v31 = vadd.f32 %v10119_v4, %v12875_v26 }
 0x5f8   : > { %v7519_v7 = vadd.f32 %v12875_v26, %v7409_v37 }
 0x5fa   : > { %v10122_v42 = vpop.f32.mrb[40].mxu1  ;;  %10167 = vmatprep.mubr.msk.f32.mxu0 %vm7537_vm6, %v7519_v7 }
 0x5fb   : > { %v7419_v59 = vpop.f32.mrb[41].mxu1  ;;  %10168 = vmatmul.mubr.msk.f32.gmra.mrb[54].mxu0 %vm7537_vm6, %v7520_v31  ;;  %v7522_v5 = vadd.f32 %v10122_v42, %v12875_v26 }
 0x5fc   : > { %v7521_v44 = vadd.f32 %v12875_v26, %v7419_v59 }
 0x5fe   : > { %v10125_v51 = vpop.f32.mrb[42].mxu1  ;;  %10170 = vmatprep.mubr.msk.f32.mxu0 %vm7537_vm6, %v7521_v44 }
 0x5ff   : > { %v7429_v15 = vpop.f32.mrb[43].mxu1  ;;  %10171 = vmatmul.mubr.msk.f32.gmra.mrb[56].mxu0 %vm7537_vm6, %v7522_v5  ;;  %v7524_v27 = vadd.f32 %v10125_v51, %v12875_v26 }
 0x600   : > { %v7523_v17 = vadd.f32 %v12875_v26, %v7429_v15 }
 0x602   : > { %v10128_v23 = vpop.f32.mrb[44].mxu1  ;;  %10173 = vmatprep.mubr.msk.f32.mxu0 %vm7537_vm6, %v7523_v17 }
 0x603   : > { %v7439_v8 = vpop.f32.mrb[45].mxu1  ;;  %10174 = vmatmul.mubr.msk.f32.gmra.mrb[58].mxu0 %vm7537_vm6, %v7524_v27  ;;  %v7526_v38 = vadd.f32 %v10128_v23, %v12875_v26 }
 0x604   : > { %v7525_v12 = vadd.f32 %v12875_v26, %v7439_v8 }
 0x606   : > { %v10131_v53 = vpop.f32.mrb[46].mxu1  ;;  %10176 = vmatprep.mubr.msk.f32.mxu0 %vm7537_vm6, %v7525_v12 }
 0x607   : > { %v7449_v13 = vpop.f32.mrb[47].mxu1  ;;  %10177 = vmatmul.mubr.msk.f32.gmra.mrb[60].mxu0 %vm7537_vm6, %v7526_v38  ;;  %v7528_v14 = vadd.f32 %v10131_v53, %v12875_v26 }
 0x608   : > { %v7527_v40 = vadd.f32 %v12875_v26, %v7449_v13 }
 0x60a   : > { %10179 = vmatprep.mubr.msk.f32.mxu0 %vm7537_vm6, %v7527_v40 }
 0x60b   : > { %10180 = vmatmul.mubr.msk.f32.gmra.mrb[62].mxu0 %vm7537_vm6, %v7528_v14 }
 0x6a2   : > { %v10136_v26 = vpop.f32.mrb[32].mxu0 }
 0x6a3   : > { %v7706_v16 = vadd.f32 %v10136_v26, %v12944_v39  ;;  %v7700_v18 = vpop.f32.mrb[33].mxu0 }
 0x6a4   : > { %v7701_v36 = vadd.f32 %v12944_v39, %v7700_v18 }
 0x6a5   : > { %7861 = vst.msk [vmem:[%s12951_s14 + $0x8] sm:$0xff] %vm7859_vm7, %v7706_v16 }
 0x6a6   : > { %7860 = vst.msk [vmem:[%s12951_s14] sm:$0xff] %vm7859_vm7, %v7701_v36  ;;  %v10139_v41 = vpop.f32.mrb[34].mxu0 }
 0x6a7   : > { %v7716_v28 = vadd.f32 %v10139_v41, %v12944_v39  ;;  %v7710_v29 = vpop.f32.mrb[35].mxu0 }
 0x6a8   : > { %v7711_v48 = vadd.f32 %v12944_v39, %v7710_v29 }
 0x6a9   : > { %7863 = vst.msk [vmem:[%s12951_s14 + $0x18] sm:$0xff] %vm7859_vm7, %v7716_v28 }
 0x6aa   : > { %7862 = vst.msk [vmem:[%s12951_s14 + $0x10] sm:$0xff] %vm7859_vm7, %v7711_v48  ;;  %v10142_v58 = vpop.f32.mrb[36].mxu0 }
 0x6ab   : > { %v7726_v0 = vadd.f32 %v10142_v58, %v12944_v39  ;;  %v7720_v3 = vpop.f32.mrb[37].mxu0 }
 0x6ac   : > { %v7721_v11 = vadd.f32 %v12944_v39, %v7720_v3 }
 0x6ad   : > { %7865 = vst.msk [vmem:[%s12951_s14 + $0x28] sm:$0xff] %vm7859_vm7, %v7726_v0 }
 0x6ae   : > { %7864 = vst.msk [vmem:[%s12951_s14 + $0x20] sm:$0xff] %vm7859_vm7, %v7721_v11  ;;  %v10145_v54 = vpop.f32.mrb[38].mxu0 }
 0x6af   : > { %v7736_v55 = vadd.f32 %v10145_v54, %v12944_v39  ;;  %v7730_v57 = vpop.f32.mrb[39].mxu0 }
 0x6b0   : > { %v7731_v32 = vadd.f32 %v12944_v39, %v7730_v57 }
 0x6b1   : > { %7867 = vst.msk [vmem:[%s12951_s14 + $0x38] sm:$0xff] %vm7859_vm7, %v7736_v55 }
 0x6b2   : > { %7866 = vst.msk [vmem:[%s12951_s14 + $0x30] sm:$0xff] %vm7859_vm7, %v7731_v32  ;;  %v10148_v34 = vpop.f32.mrb[40].mxu0 }
 0x6b3   : > { %v7746_v60 = vadd.f32 %v10148_v34, %v12944_v39  ;;  %v7740_v62 = vpop.f32.mrb[41].mxu0 }
 0x6b4   : > { %v7741_v6 = vadd.f32 %v12944_v39, %v7740_v62 }
 0x6b5   : > { %7869 = vst.msk [vmem:[%s12951_s14 + $0x48] sm:$0xff] %vm7859_vm7, %v7746_v60 }
 0x6b6   : > { %7868 = vst.msk [vmem:[%s12951_s14 + $0x40] sm:$0xff] %vm7859_vm7, %v7741_v6  ;;  %v10151_v10 = vpop.f32.mrb[42].mxu0 }
 0x6b7   : > { %v7756_v35 = vadd.f32 %v10151_v10, %v12944_v39  ;;  %v7750_v25 = vpop.f32.mrb[43].mxu0 }
 0x6b8   : > { %v7751_v52 = vadd.f32 %v12944_v39, %v7750_v25 }
 0x6b9   : > { %7871 = vst.msk [vmem:[%s12951_s14 + $0x58] sm:$0xff] %vm7859_vm7, %v7756_v35 }
 0x6ba   : > { %7870 = vst.msk [vmem:[%s12951_s14 + $0x50] sm:$0xff] %vm7859_vm7, %v7751_v52  ;;  %v10154_v56 = vpop.f32.mrb[44].mxu0 }
 0x6bb   : > { %v7766_v9 = vadd.f32 %v10154_v56, %v12944_v39  ;;  %v7760_v19 = vpop.f32.mrb[45].mxu0 }
 0x6bc   : > { %v7761_v30 = vadd.f32 %v12944_v39, %v7760_v19 }
 0x6bd   : > { %7873 = vst.msk [vmem:[%s12951_s14 + $0x68] sm:$0xff] %vm7859_vm7, %v7766_v9 }
 0x6be   : > { %7872 = vst.msk [vmem:[%s12951_s14 + $0x60] sm:$0xff] %vm7859_vm7, %v7761_v30  ;;  %v10157_v1 = vpop.f32.mrb[46].mxu0 }
 0x6bf   : > { %v7776_v22 = vadd.f32 %v10157_v1, %v12944_v39  ;;  %v7770_v33 = vpop.f32.mrb[47].mxu0 }
 0x6c0   : > { %v7771_v45 = vadd.f32 %v12944_v39, %v7770_v33 }
 0x6c1   : > { %7875 = vst.msk [vmem:[%s12951_s14 + $0x78] sm:$0xff] %vm7859_vm7, %v7776_v22 }
 0x6c2   : > { %7874 = vst.msk [vmem:[%s12951_s14 + $0x70] sm:$0xff] %vm7859_vm7, %v7771_v45  ;;  %v10160_v46 = vpop.f32.mrb[48].mxu0 }
 0x6c3   : > { %v7786_v43 = vadd.f32 %v10160_v46, %v12944_v39  ;;  %v7780_v20 = vpop.f32.mrb[49].mxu0 }
 0x6c4   : > { %v7781_v47 = vadd.f32 %v12944_v39, %v7780_v20 }
 0x6c5   : > { %7877 = vst.msk [vmem:[%s12951_s14 + $0x88] sm:$0xff] %vm7859_vm7, %v7786_v43 }
 0x6c6   : > { %7876 = vst.msk [vmem:[%s12951_s14 + $0x80] sm:$0xff] %vm7859_vm7, %v7781_v47  ;;  %v10163_v49 = vpop.f32.mrb[50].mxu0 }
 0x6c7   : > { %v7796_v21 = vadd.f32 %v10163_v49, %v12944_v39  ;;  %v7790_v61 = vpop.f32.mrb[51].mxu0 }
 0x6c8   : > { %v7791_v63 = vadd.f32 %v12944_v39, %v7790_v61 }
 0x6c9   : > { %7879 = vst.msk [vmem:[%s12951_s14 + $0x98] sm:$0xff] %vm7859_vm7, %v7796_v21 }
 0x6ca   : > { %7878 = vst.msk [vmem:[%s12951_s14 + $0x90] sm:$0xff] %vm7859_vm7, %v7791_v63  ;;  %v10166_v24 = vpop.f32.mrb[52].mxu0 }
 0x6cb   : > { %v7806_v50 = vadd.f32 %v10166_v24, %v12944_v39  ;;  %v7800_v2 = vpop.f32.mrb[53].mxu0 }
 0x6cc   : > { %v7801_v4 = vadd.f32 %v12944_v39, %v7800_v2 }
 0x6cd   : > { %7881 = vst.msk [vmem:[%s12951_s14 + $0xa8] sm:$0xff] %vm7859_vm7, %v7806_v50 }
 0x6ce   : > { %7880 = vst.msk [vmem:[%s12951_s14 + $0xa0] sm:$0xff] %vm7859_vm7, %v7801_v4  ;;  %v10169_v37 = vpop.f32.mrb[54].mxu0 }
 0x6cf   : > { %v7816_v7 = vadd.f32 %v10169_v37, %v12944_v39  ;;  %v7810_v31 = vpop.f32.mrb[55].mxu0 }
 0x6d0   : > { %v7811_v42 = vadd.f32 %v12944_v39, %v7810_v31 }
 0x6d1   : > { %7883 = vst.msk [vmem:[%s12951_s14 + $0xb8] sm:$0xff] %vm7859_vm7, %v7816_v7 }
 0x6d2   : > { %7882 = vst.msk [vmem:[%s12951_s14 + $0xb0] sm:$0xff] %vm7859_vm7, %v7811_v42  ;;  %v10172_v59 = vpop.f32.mrb[56].mxu0 }
 0x6d3   : > { %v7826_v44 = vadd.f32 %v10172_v59, %v12944_v39  ;;  %v7820_v5 = vpop.f32.mrb[57].mxu0 }
 0x6d4   : > { %v7821_v51 = vadd.f32 %v12944_v39, %v7820_v5 }
 0x6d5   : > { %7885 = vst.msk [vmem:[%s12951_s14 + $0xc8] sm:$0xff] %vm7859_vm7, %v7826_v44 }
 0x6d6   : > { %7884 = vst.msk [vmem:[%s12951_s14 + $0xc0] sm:$0xff] %vm7859_vm7, %v7821_v51  ;;  %v10175_v15 = vpop.f32.mrb[58].mxu0 }
 0x6d7   : > { %v7836_v17 = vadd.f32 %v10175_v15, %v12944_v39  ;;  %v7830_v27 = vpop.f32.mrb[59].mxu0 }
 0x6d8   : > { %v7831_v23 = vadd.f32 %v12944_v39, %v7830_v27 }
 0x6d9   : > { %7887 = vst.msk [vmem:[%s12951_s14 + $0xd8] sm:$0xff] %vm7859_vm7, %v7836_v17 }
 0x6da   : > { %7886 = vst.msk [vmem:[%s12951_s14 + $0xd0] sm:$0xff] %vm7859_vm7, %v7831_v23  ;;  %v10178_v8 = vpop.f32.mrb[60].mxu0 }
 0x6db   : > { %v7846_v12 = vadd.f32 %v10178_v8, %v12944_v39  ;;  %v7840_v38 = vpop.f32.mrb[61].mxu0 }
 0x6dc   : > { %v7841_v53 = vadd.f32 %v12944_v39, %v7840_v38 }
 0x6dd   : > { %7889 = vst.msk [vmem:[%s12951_s14 + $0xe8] sm:$0xff] %vm7859_vm7, %v7846_v12 }
 0x6de   : > { %7888 = vst.msk [vmem:[%s12951_s14 + $0xe0] sm:$0xff] %vm7859_vm7, %v7841_v53  ;;  %v10181_v13 = vpop.f32.mrb[62].mxu0 }
 0x6df   : > { %v7856_v40 = vadd.f32 %v10181_v13, %v12944_v39  ;;  %v7850_v14 = vpop.f32.mrb[63].mxu0 }
 0x6e0   : > { %v7851_v26 = vadd.f32 %v12944_v39, %v7850_v14 }
 0x6e1   : > { %7891 = vst.msk [vmem:[%s12951_s14 + $0xf8] sm:$0xff] %vm7859_vm7, %v7856_v40 }
 0x6e2   : > { %7890 = vst.msk [vmem:[%s12951_s14 + $0xf0] sm:$0xff] %vm7859_vm7, %v7851_v26 }
 0x6e3 PF: > { %s17_s24 = sadd.s32 1, %s10711_s24  }
 0x6e4   : > { %p14_p4 = scmp.ge.s32.totalorder %s17_s24, 4  }
 0x6e6   :  { %16 = sbr.rel (!%p14_p4) target bundleno = 1 (0x1), region = 98 }

</bundles_post_ra>
